<compile_context>
chip_gen: v6e
topology: v6e:2x2x1
jax: 0.10.0
libtpu: 0.0.40
codegen_flags: <defaults>
</compile_context>

<pallas_src>
import jax
import jax.numpy as jnp
from jax import lax
from jax.experimental import pallas as pl
from jax.experimental.pallas import tpu as pltpu

C_IN = 24
C1 = 128
C2 = 256
N_BINS = 256            # embedding rows; 255 boundaries
LN_EPS = 1e-5
K1_PAD = 128            # conv1 fused-K lane-padded 72 -> 128

MATMUL_DTYPE = jnp.bfloat16      # MXU operand dtype (f32 accumulation everywhere)
EMBED_OUT_DTYPE = jnp.bfloat16   # embedding rows == bf16 table rows -> lossless writeback


def _layernorm(x, gamma, beta):
    # single-pass statistics: var = E[x^2] - E[x]^2 (independent reductions)
    mu = jnp.mean(x, axis=-1, keepdims=True)
    ms = jnp.mean(x * x, axis=-1, keepdims=True)
    var = jnp.maximum(ms - mu * mu, 0.0)
    return (x - mu) * lax.rsqrt(var + LN_EPS) * gamma + beta


def pitch_predictor_kernel(xc_ref,
                           w1_ref, b1_ref, g1_ref, be1_ref,
                           w2_ref, b2_ref, g2_ref, be2_ref,
                           wl_ref, bl_ref,
                           lo_ref, hi_ref, emb_ref,
                           pred_ref, embed_ref):
    tile_t = embed_ref.shape[1]                          # static

    # ---- Conv1 (24->128, k=3): one fused-K (K=128, lane-padded) bf16 MXU matmul
    #      over the halo'd tap slab, + ReLU + LayerNorm (f32 stats). Dropout = identity.
    xc = xc_ref[0, 0]                                    # (tile_t+2, 128) bf16
    h = jnp.dot(xc, w1_ref[...], preferred_element_type=jnp.float32) + b1_ref[...]
    h = jnp.maximum(h, 0.0)
    h = _layernorm(h, g1_ref[...], be1_ref[...])         # (tile_t+2, 128) f32

    # Zero halo rows outside the true sequence (conv2's zero padding at t=-1 / t=T).
    # One (tile_t+2,1)-broadcast multiply on the bf16 copy (~tile_t/8 vreg muls);
    # tile-internal halos stay real.
    j = pl.program_id(1)
    last = pl.num_programs(1) - 1
    row = lax.broadcasted_iota(jnp.int32, (tile_t + 2, 1), 0)
    keep = jnp.logical_and(jnp.logical_or(row > 0, j > 0),
                           jnp.logical_or(row < tile_t + 1, j < last))
    h_bf = h.astype(MATMUL_DTYPE) * keep.astype(MATMUL_DTYPE)

    # ---- Conv2 (128->256, k=3): one fused-K (K=384) bf16 MXU matmul + ReLU + LN.
    x2 = jnp.concatenate(
        [h_bf[0:tile_t], h_bf[1:tile_t + 1], h_bf[2:tile_t + 2]], axis=-1)   # (tile_t, 384) bf16
    h2 = jnp.dot(x2, w2_ref[...], preferred_element_type=jnp.float32) + b2_ref[...]
    h2 = jnp.maximum(h2, 0.0)
    h2 = _layernorm(h2, g2_ref[...], be2_ref[...])       # (tile_t, 256) f32

    # ---- Linear(256 -> 1) kept in f32 (bucketize is boundary-sensitive); prediction = out * 1.0
    pred = jnp.dot(h2, wl_ref[...], preferred_element_type=jnp.float32) + bl_ref[...]  # (tile_t, 1)
    pred_ref[0, 0] = jnp.transpose(pred)                 # lane-dense (1, tile_t) store

    # ---- torch.bucketize(pred, boundaries, right=False) + Embedding lookup.
    # Interval test (f32 comparisons) gives the one-hot directly; one-hot @ table on the MXU.
    onehot = jnp.logical_and(pred > lo_ref[...],
                             pred <= hi_ref[...]).astype(MATMUL_DTYPE)       # (tile_t, 256)
    emb = jnp.dot(onehot, emb_ref[...], preferred_element_type=jnp.float32)
    embed_ref[0] = emb.astype(embed_ref.dtype)           # exact: rows are bf16 table rows


def _pick_tile_t(B, T, requested=None):
    if requested is not None:
        assert T % requested == 0, "tile_t must divide T"
        assert requested == T or requested % 8 == 0, "tile_t must be a multiple of 8"
        return requested
    # Prefer large tiles: ~0.35 us per-grid-step overhead, per-tile VMEM at 2048 is ~10-16 MiB.
    cands = (2048, 1024, 512, 384, 256, 128, 64, 32, 16, 8)
    tile = next((c for c in cands if T % c == 0), T)
    if B == 1 and tile == T:
        # v7x megacore: keep >= 2 grid steps so both TensorCores get work.
        for c in cands:
            if c < T and T % c == 0:
                tile = c
                break
    return tile


def pitch_predictor_forward(x, params, tile_t=None):
    """x: (B, T, 24) f32 -> (prediction (B, T, 1) f32, embedding (B, T, 256) bf16)."""
    B, T, cin = x.shape
    assert cin == C_IN
    tile_t = _pick_tile_t(B, T, tile_t)
    n_tiles = T // tile_t

    # --- wrapper-side layout plumbing (contiguous copies only, no fancy-index gather):
    # taps[b, i, :] = [x[t-1], x[t], x[t+1]] for t = i-1, zeros outside [0, T); lane-pad 72->128.
    xp = jnp.pad(x, ((0, 0), (2, 2), (0, 0)))                                       # (B, T+4, 24)
    taps = jnp.concatenate([xp[:, 0:T + 2], xp[:, 1:T + 3], xp[:, 2:T + 4]], -1)    # (B, T+2, 72)
    taps = jnp.pad(taps, ((0, 0), (0, 0), (0, K1_PAD - 3 * C_IN)))                  # (B, T+2, 128)
    taps = taps.astype(MATMUL_DTYPE)                                                # halve input DMA
    # overlapping (halo) per-tile slabs: static slices + stack
    x_cat = jnp.stack([taps[:, j * tile_t:j * tile_t + tile_t + 2]
                       for j in range(n_tiles)], axis=1)                            # (B, nt, tile_t+2, 128)

    # conv weights fused along K (tap-major, matching x_cat / x2), lane-padded, bf16
    w1c = jnp.pad(params["w1"].reshape(3 * C_IN, C1),
                  ((0, K1_PAD - 3 * C_IN), (0, 0))).astype(MATMUL_DTYPE)            # (128, 128)
    w2c = params["w2"].reshape(3 * C1, C2).astype(MATMUL_DTYPE)                     # (384, 256)
    embt = params["emb"].astype(MATMUL_DTYPE)                                       # (256, 256)

    kernel_args = (x_cat,
                   w1c, params["b1"], params["g1"], params["be1"],
                   w2c, params["b2"], params["g2"], params["be2"],
                   params["wl"], params["bl"],
                   params["lower"], params["upper"], embt)

    def resident_spec(a):
        # Constant index map -> Pallas keeps the operand resident across the grid.
        # (pl.Buffered(1) would drop the second weight buffer; skipped, ~0.4 MiB total.)
        zeros = (0,) * a.ndim
        return pl.BlockSpec(a.shape, lambda b, j, _z=zeros: _z)

    in_specs = ([pl.BlockSpec((1, 1, tile_t + 2, K1_PAD), lambda b, j: (b, j, 0, 0))]
                + [resident_spec(a) for a in kernel_args[1:]])

    out_specs = (pl.BlockSpec((1, 1, 1, tile_t), lambda b, j: (b, j, 0, 0)),
                 pl.BlockSpec((1, tile_t, C2), lambda b, j: (b, j, 0)))
    out_shapes = (jax.ShapeDtypeStruct((B, n_tiles, 1, tile_t), jnp.float32),
                  jax.ShapeDtypeStruct((B, T, C2), EMBED_OUT_DTYPE))

    pred_tiles, embed = pl.pallas_call(
        pitch_predictor_kernel,
        out_shape=out_shapes,
        grid_spec=pltpu.PrefetchScalarGridSpec(
            num_scalar_prefetch=0,
            grid=(B, n_tiles),
            in_specs=in_specs,
            out_specs=out_specs,
        ),
        compiler_params=pltpu.CompilerParams(
            dimension_semantics=("parallel", "parallel"),   # halo'd tiles are independent
            vmem_limit_bytes=48 * 1024 * 1024),             # <= ~48 MiB: safe on v7x's 64 MiB physical
    )(*kernel_args)

    prediction = pred_tiles.reshape(B, T, 1)
    return prediction, embed


def init_params(key):
    ks = jax.random.split(key, 7)
    p = {
        # conv weights stored as (k=3, Cin, Cout); equal to torch weight[:, :, k].T
        "w1": jax.random.normal(ks[0], (3, C_IN, C1), jnp.float32) * 0.05,
        "b1": jax.random.normal(ks[1], (1, C1), jnp.float32) * 0.05,
        "g1": jnp.ones((1, C1), jnp.float32),
        "be1": jnp.zeros((1, C1), jnp.float32),
        "w2": jax.random.normal(ks[2], (3, C1, C2), jnp.float32) * 0.05,
        "b2": jax.random.normal(ks[3], (1, C2), jnp.float32) * 0.05,
        "g2": jnp.ones((1, C2), jnp.float32),
        "be2": jnp.zeros((1, C2), jnp.float32),
        "wl": jax.random.normal(ks[4], (C2, 1), jnp.float32) * 0.05,
        "bl": jax.random.normal(ks[5], (1, 1), jnp.float32) * 0.05,
        "emb": jax.random.normal(ks[6], (N_BINS, C2), jnp.float32) * 0.05,
    }
    pitch_min, pitch_max = -1.0, 1.0   # deterministic stand-in for the .npy stats
    boundaries = jnp.linspace(pitch_min, pitch_max, N_BINS - 1).astype(jnp.float32)
    p["boundaries"] = boundaries
    p["lower"] = jnp.concatenate([jnp.array([-jnp.inf], jnp.float32), boundaries]).reshape(1, N_BINS)
    p["upper"] = jnp.concatenate([boundaries, jnp.array([jnp.inf], jnp.float32)]).reshape(1, N_BINS)
    return p


def reference_forward(x, p):
    """Pure-JAX f32 reference mirroring the PyTorch forward (eval mode)."""
    def conv(h, w, b):
        hp = jnp.pad(h, ((0, 0), (1, 1), (0, 0)))
        return (hp[:, :-2] @ w[0] + hp[:, 1:-1] @ w[1] + hp[:, 2:] @ w[2]) + b

    def ln(h, g, be):
        mu = jnp.mean(h, -1, keepdims=True)
        var = jnp.mean((h - mu) ** 2, -1, keepdims=True)
        return (h - mu) / jnp.sqrt(var + LN_EPS) * g + be

    h = ln(jnp.maximum(conv(x, p["w1"], p["b1"]), 0.0), p["g1"], p["be1"])
    h = ln(jnp.maximum(conv(h, p["w2"], p["b2"]), 0.0), p["g2"], p["be2"])
    pred = h @ p["wl"] + p["bl"]                                          # (B,T,1)
    idx = jnp.sum(pred > p["boundaries"], axis=-1)                        # bucketize (right=False)
    emb = p["emb"][idx]
    return pred, emb


if __name__ == "__main__":
    key = jax.random.PRNGKey(0)
    k_x, k_p = jax.random.split(key)

    B, T = 2, 256
    x = jax.random.normal(k_x, (B, T, C_IN), jnp.float32)
    params = init_params(k_p)

    pred, emb = pitch_predictor_forward(x, params)      # tile_t auto -> 256, grid = (2, 1)
    jax.block_until_ready((pred, emb))

    assert pred.shape == (B, T, 1) and pred.dtype == jnp.float32
    assert emb.shape == (B, T, C2) and emb.dtype == EMBED_OUT_DTYPE

    # Prediction vs the pure-f32 reference (bf16 MXU operands -> loose tolerance).
    pred_ref, emb_ref = reference_forward(x, params)
    err = jnp.abs(pred - pred_ref)
    assert float(jnp.max(err)) < 1.5e-1 and float(jnp.mean(err)) < 2.5e-2, \
        (float(jnp.max(err)), float(jnp.mean(err)))

    # Bucketize + embedding path is exact given the kernel's own prediction:
    idx_k = jnp.sum(pred > params["boundaries"], axis=-1)                 # (B, T)
    emb_expected = params["emb"].astype(EMBED_OUT_DTYPE)[idx_k]
    assert float(jnp.max(jnp.abs(emb.astype(jnp.float32)
                                 - emb_expected.astype(jnp.float32)))) < 1e-5

    # Cross-check vs the f32 reference embedding wherever both predictions pick the same bucket.
    idx_ref = jnp.sum(pred_ref > params["boundaries"], axis=-1)
    same = (idx_k == idx_ref)[..., None]
    assert bool(jnp.all(jnp.where(same,
                                  jnp.abs(emb.astype(jnp.float32) - emb_ref) < 5e-3,
                                  True)))

    print("KERNEL_OK")
</pallas_src>

<mosaic_0001>
module attributes {stable_mosaic.version = 11 : i64} {
  func.func @pitch_predictor_kernel(%arg0: i32, %arg1: i32, %arg2: memref<1x1x258x128xbf16, #tpu.memory_space<vmem>>, %arg3: memref<128x128xbf16, #tpu.memory_space<vmem>>, %arg4: memref<1x128xf32, #tpu.memory_space<vmem>>, %arg5: memref<1x128xf32, #tpu.memory_space<vmem>>, %arg6: memref<1x128xf32, #tpu.memory_space<vmem>>, %arg7: memref<384x256xbf16, #tpu.memory_space<vmem>>, %arg8: memref<1x256xf32, #tpu.memory_space<vmem>>, %arg9: memref<1x256xf32, #tpu.memory_space<vmem>>, %arg10: memref<1x256xf32, #tpu.memory_space<vmem>>, %arg11: memref<256x1xf32, #tpu.memory_space<vmem>>, %arg12: memref<1x1xf32, #tpu.memory_space<vmem>>, %arg13: memref<1x256xf32, #tpu.memory_space<vmem>>, %arg14: memref<1x256xf32, #tpu.memory_space<vmem>>, %arg15: memref<256x256xbf16, #tpu.memory_space<vmem>>, %arg16: memref<1x1x1x256xf32, #tpu.memory_space<vmem>>, %arg17: memref<1x256x256xbf16, #tpu.memory_space<vmem>>) attributes {dimension_semantics = [#tpu.dimension_semantics<parallel>, #tpu.dimension_semantics<parallel>], iteration_bounds = array<i64: 2, 1>, scalar_prefetch = 0 : i64, scratch_operands = 0 : i64, tpu.core_type = #tpu.core_type<tc>, window_params = [{transform_indices = @transform_0, window_bounds = array<i64: 1, 1, 258, 128>}, {pipeline_mode = #tpu.pipeline_mode<synchronous>, transform_indices = @transform_1, window_bounds = array<i64: 128, 128>}, {pipeline_mode = #tpu.pipeline_mode<synchronous>, transform_indices = @transform_2, window_bounds = array<i64: 1, 128>}, {pipeline_mode = #tpu.pipeline_mode<synchronous>, transform_indices = @transform_3, window_bounds = array<i64: 1, 128>}, {pipeline_mode = #tpu.pipeline_mode<synchronous>, transform_indices = @transform_4, window_bounds = array<i64: 1, 128>}, {pipeline_mode = #tpu.pipeline_mode<synchronous>, transform_indices = @transform_5, window_bounds = array<i64: 384, 256>}, {pipeline_mode = #tpu.pipeline_mode<synchronous>, transform_indices = @transform_6, window_bounds = array<i64: 1, 256>}, {pipeline_mode = #tpu.pipeline_mode<synchronous>, transform_indices = @transform_7, window_bounds = array<i64: 1, 256>}, {pipeline_mode = #tpu.pipeline_mode<synchronous>, transform_indices = @transform_8, window_bounds = array<i64: 1, 256>}, {pipeline_mode = #tpu.pipeline_mode<synchronous>, transform_indices = @transform_9, window_bounds = array<i64: 256, 1>}, {pipeline_mode = #tpu.pipeline_mode<synchronous>, transform_indices = @transform_10, window_bounds = array<i64: 1, 1>}, {pipeline_mode = #tpu.pipeline_mode<synchronous>, transform_indices = @transform_11, window_bounds = array<i64: 1, 256>}, {pipeline_mode = #tpu.pipeline_mode<synchronous>, transform_indices = @transform_12, window_bounds = array<i64: 1, 256>}, {pipeline_mode = #tpu.pipeline_mode<synchronous>, transform_indices = @transform_13, window_bounds = array<i64: 256, 256>}, {transform_indices = @transform_14, window_bounds = array<i64: 1, 1, 1, 256>}, {transform_indices = @transform_15, window_bounds = array<i64: 1, 256, 256>}]} {
    %c0 = arith.constant 0 : index
    %c0_0 = arith.constant 0 : index
    %c0_1 = arith.constant 0 : index
    %c0_2 = arith.constant 0 : index
    %0 = vector.load %arg2[%c0, %c0_0, %c0_1, %c0_2] : memref<1x1x258x128xbf16, #tpu.memory_space<vmem>>, vector<1x1x258x128xbf16>
    %1 = vector.shape_cast %0 : vector<1x1x258x128xbf16> to vector<258x128xbf16>
    %c0_3 = arith.constant 0 : index
    %c0_4 = arith.constant 0 : index
    %2 = vector.load %arg3[%c0_3, %c0_4] : memref<128x128xbf16, #tpu.memory_space<vmem>>, vector<128x128xbf16>
    %cst = arith.constant dense<0.000000e+00> : vector<258x128xf32>
    %3 = tpu.matmul %1, %2, %cst {dimension_numbers = #tpu.dot_dimension_numbers<[1], [0], [0], [1], [0, 0, 1, 1], [], []>} : vector<258x128xbf16>, vector<128x128xbf16>, vector<258x128xf32> -> vector<258x128xf32>
    %c0_5 = arith.constant 0 : index
    %c0_6 = arith.constant 0 : index
    %4 = vector.load %arg4[%c0_5, %c0_6] : memref<1x128xf32, #tpu.memory_space<vmem>>, vector<1x128xf32>
    %5 = vector.broadcast %4 : vector<1x128xf32> to vector<258x128xf32>
    %6 = arith.addf %3, %5 : vector<258x128xf32>
    %cst_7 = arith.constant 0.000000e+00 : f32
    %7 = vector.broadcast %cst_7 : f32 to vector<258x128xf32>
    %8 = arith.maximumf %6, %7 : vector<258x128xf32>
    %c0_8 = arith.constant 0 : index
    %c0_9 = arith.constant 0 : index
    %9 = vector.load %arg5[%c0_8, %c0_9] : memref<1x128xf32, #tpu.memory_space<vmem>>, vector<1x128xf32>
    %c0_10 = arith.constant 0 : index
    %c0_11 = arith.constant 0 : index
    %10 = vector.load %arg6[%c0_10, %c0_11] : memref<1x128xf32, #tpu.memory_space<vmem>>, vector<1x128xf32>
    %cst_12 = arith.constant dense<0.000000e+00> : vector<258xf32>
    %11 = vector.multi_reduction <add>, %8, %cst_12 [1] : vector<258x128xf32> to vector<258xf32>
    %12 = vector.shape_cast %11 : vector<258xf32> to vector<258x1xf32>
    %cst_13 = arith.constant 1.280000e+02 : f32
    %13 = vector.broadcast %cst_13 : f32 to vector<258x1xf32>
    %14 = arith.divf %12, %13 : vector<258x1xf32>
    %15 = arith.mulf %8, %8 : vector<258x128xf32>
    %cst_14 = arith.constant dense<0.000000e+00> : vector<258xf32>
    %16 = vector.multi_reduction <add>, %15, %cst_14 [1] : vector<258x128xf32> to vector<258xf32>
    %17 = vector.shape_cast %16 : vector<258xf32> to vector<258x1xf32>
    %cst_15 = arith.constant 1.280000e+02 : f32
    %18 = vector.broadcast %cst_15 : f32 to vector<258x1xf32>
    %19 = arith.divf %17, %18 : vector<258x1xf32>
    %20 = arith.mulf %14, %14 : vector<258x1xf32>
    %21 = arith.subf %19, %20 : vector<258x1xf32>
    %cst_16 = arith.constant 0.000000e+00 : f32
    %22 = vector.broadcast %cst_16 : f32 to vector<258x1xf32>
    %23 = arith.maximumf %21, %22 : vector<258x1xf32>
    %24 = vector.broadcast %14 : vector<258x1xf32> to vector<258x128xf32>
    %25 = arith.subf %8, %24 : vector<258x128xf32>
    %cst_17 = arith.constant 9.99999974E-6 : f32
    %26 = vector.broadcast %cst_17 : f32 to vector<258x1xf32>
    %27 = arith.addf %23, %26 : vector<258x1xf32>
    %28 = math.rsqrt %27 : vector<258x1xf32>
    %29 = vector.broadcast %28 : vector<258x1xf32> to vector<258x128xf32>
    %30 = arith.mulf %25, %29 : vector<258x128xf32>
    %31 = vector.broadcast %9 : vector<1x128xf32> to vector<258x128xf32>
    %32 = arith.mulf %30, %31 : vector<258x128xf32>
    %33 = vector.broadcast %10 : vector<1x128xf32> to vector<258x128xf32>
    %34 = arith.addf %32, %33 : vector<258x128xf32>
    %35 = tpu.iota {dimensions = array<i32: 0>} : vector<258x1xi32>
    %c0_i32 = arith.constant 0 : i32
    %36 = vector.broadcast %c0_i32 : i32 to vector<258x1xi32>
    %37 = arith.cmpi sgt, %35, %36 : vector<258x1xi32>
    %c0_i32_18 = arith.constant 0 : i32
    %38 = arith.cmpi sgt, %arg1, %c0_i32_18 : i32
    %39 = vector.broadcast %38 : i1 to vector<258x1xi1>
    %40 = arith.ori %37, %39 : vector<258x1xi1>
    %c257_i32 = arith.constant 257 : i32
    %41 = vector.broadcast %c257_i32 : i32 to vector<258x1xi32>
    %42 = arith.cmpi slt, %35, %41 : vector<258x1xi32>
    %c0_i32_19 = arith.constant 0 : i32
    %43 = arith.cmpi slt, %arg1, %c0_i32_19 : i32
    %44 = vector.broadcast %43 : i1 to vector<258x1xi1>
    %45 = arith.ori %42, %44 : vector<258x1xi1>
    %46 = arith.andi %40, %45 : vector<258x1xi1>
    %47 = arith.truncf %34 : vector<258x128xf32> to vector<258x128xbf16>
    %48 = arith.extui %46 : vector<258x1xi1> to vector<258x1xi32>
    %49 = arith.sitofp %48 : vector<258x1xi32> to vector<258x1xf32>
    %50 = arith.truncf %49 : vector<258x1xf32> to vector<258x1xbf16>
    %51 = vector.broadcast %50 : vector<258x1xbf16> to vector<258x128xbf16>
    %52 = arith.mulf %47, %51 : vector<258x128xbf16>
    %53 = vector.extract_strided_slice %52 {offsets = [0, 0], sizes = [256, 128], strides = [1, 1]} : vector<258x128xbf16> to vector<256x128xbf16>
    %54 = vector.extract_strided_slice %52 {offsets = [1, 0], sizes = [256, 128], strides = [1, 1]} : vector<258x128xbf16> to vector<256x128xbf16>
    %55 = vector.extract_strided_slice %52 {offsets = [2, 0], sizes = [256, 128], strides = [1, 1]} : vector<258x128xbf16> to vector<256x128xbf16>
    %56 = tpu.concatenate %53, %54, %55 in 1 : vector<256x128xbf16>, vector<256x128xbf16>, vector<256x128xbf16> -> vector<256x384xbf16>
    %c0_20 = arith.constant 0 : index
    %c0_21 = arith.constant 0 : index
    %57 = vector.load %arg7[%c0_20, %c0_21] : memref<384x256xbf16, #tpu.memory_space<vmem>>, vector<384x256xbf16>
    %cst_22 = arith.constant dense<0.000000e+00> : vector<256x256xf32>
    %58 = tpu.matmul %56, %57, %cst_22 {dimension_numbers = #tpu.dot_dimension_numbers<[1], [0], [0], [1], [0, 0, 1, 1], [], []>} : vector<256x384xbf16>, vector<384x256xbf16>, vector<256x256xf32> -> vector<256x256xf32>
    %c0_23 = arith.constant 0 : index
    %c0_24 = arith.constant 0 : index
    %59 = vector.load %arg8[%c0_23, %c0_24] : memref<1x256xf32, #tpu.memory_space<vmem>>, vector<1x256xf32>
    %60 = vector.broadcast %59 : vector<1x256xf32> to vector<256x256xf32>
    %61 = arith.addf %58, %60 : vector<256x256xf32>
    %cst_25 = arith.constant 0.000000e+00 : f32
    %62 = vector.broadcast %cst_25 : f32 to vector<256x256xf32>
    %63 = arith.maximumf %61, %62 : vector<256x256xf32>
    %c0_26 = arith.constant 0 : index
    %c0_27 = arith.constant 0 : index
    %64 = vector.load %arg9[%c0_26, %c0_27] : memref<1x256xf32, #tpu.memory_space<vmem>>, vector<1x256xf32>
    %c0_28 = arith.constant 0 : index
    %c0_29 = arith.constant 0 : index
    %65 = vector.load %arg10[%c0_28, %c0_29] : memref<1x256xf32, #tpu.memory_space<vmem>>, vector<1x256xf32>
    %cst_30 = arith.constant dense<0.000000e+00> : vector<256xf32>
    %66 = vector.multi_reduction <add>, %63, %cst_30 [1] : vector<256x256xf32> to vector<256xf32>
    %67 = vector.shape_cast %66 : vector<256xf32> to vector<256x1xf32>
    %cst_31 = arith.constant 2.560000e+02 : f32
    %68 = vector.broadcast %cst_31 : f32 to vector<256x1xf32>
    %69 = arith.divf %67, %68 : vector<256x1xf32>
    %70 = arith.mulf %63, %63 : vector<256x256xf32>
    %cst_32 = arith.constant dense<0.000000e+00> : vector<256xf32>
    %71 = vector.multi_reduction <add>, %70, %cst_32 [1] : vector<256x256xf32> to vector<256xf32>
    %72 = vector.shape_cast %71 : vector<256xf32> to vector<256x1xf32>
    %cst_33 = arith.constant 2.560000e+02 : f32
    %73 = vector.broadcast %cst_33 : f32 to vector<256x1xf32>
    %74 = arith.divf %72, %73 : vector<256x1xf32>
    %75 = arith.mulf %69, %69 : vector<256x1xf32>
    %76 = arith.subf %74, %75 : vector<256x1xf32>
    %cst_34 = arith.constant 0.000000e+00 : f32
    %77 = vector.broadcast %cst_34 : f32 to vector<256x1xf32>
    %78 = arith.maximumf %76, %77 : vector<256x1xf32>
    %79 = vector.broadcast %69 : vector<256x1xf32> to vector<256x256xf32>
    %80 = arith.subf %63, %79 : vector<256x256xf32>
    %cst_35 = arith.constant 9.99999974E-6 : f32
    %81 = vector.broadcast %cst_35 : f32 to vector<256x1xf32>
    %82 = arith.addf %78, %81 : vector<256x1xf32>
    %83 = math.rsqrt %82 : vector<256x1xf32>
    %84 = vector.broadcast %83 : vector<256x1xf32> to vector<256x256xf32>
    %85 = arith.mulf %80, %84 : vector<256x256xf32>
    %86 = vector.broadcast %64 : vector<1x256xf32> to vector<256x256xf32>
    %87 = arith.mulf %85, %86 : vector<256x256xf32>
    %88 = vector.broadcast %65 : vector<1x256xf32> to vector<256x256xf32>
    %89 = arith.addf %87, %88 : vector<256x256xf32>
    %c0_36 = arith.constant 0 : index
    %c0_37 = arith.constant 0 : index
    %90 = vector.load %arg11[%c0_36, %c0_37] : memref<256x1xf32, #tpu.memory_space<vmem>>, vector<256x1xf32>
    %cst_38 = arith.constant dense<0.000000e+00> : vector<256x1xf32>
    %91 = tpu.matmul %89, %90, %cst_38 {dimension_numbers = #tpu.dot_dimension_numbers<[1], [0], [0], [1], [0, 0, 1, 1], [], []>} : vector<256x256xf32>, vector<256x1xf32>, vector<256x1xf32> -> vector<256x1xf32>
    %c0_39 = arith.constant 0 : index
    %c0_40 = arith.constant 0 : index
    %92 = vector.load %arg12[%c0_39, %c0_40] : memref<1x1xf32, #tpu.memory_space<vmem>>, vector<1x1xf32>
    %93 = vector.broadcast %92 : vector<1x1xf32> to vector<256x1xf32>
    %94 = arith.addf %91, %93 : vector<256x1xf32>
    %95 = tpu.transpose %94, [1, 0] : vector<256x1xf32> -> vector<1x256xf32>
    %c0_41 = arith.constant 0 : index
    %c0_42 = arith.constant 0 : index
    %c0_43 = arith.constant 0 : index
    %c0_44 = arith.constant 0 : index
    %96 = vector.load %arg16[%c0_41, %c0_42, %c0_43, %c0_44] : memref<1x1x1x256xf32, #tpu.memory_space<vmem>>, vector<1x1x1x256xf32>
    %97 = vector.shape_cast %96 : vector<1x1x1x256xf32> to vector<1x256xf32>
    %98 = vector.shape_cast %95 : vector<1x256xf32> to vector<1x1x1x256xf32>
    tpu.vector_store %arg16[%c0_41, %c0_42, %c0_43, %c0_44], %98 {strides = array<i32>} : memref<1x1x1x256xf32, #tpu.memory_space<vmem>>, vector<1x1x1x256xf32>,
    %c0_45 = arith.constant 0 : index
    %c0_46 = arith.constant 0 : index
    %99 = vector.load %arg13[%c0_45, %c0_46] : memref<1x256xf32, #tpu.memory_space<vmem>>, vector<1x256xf32>
    %100 = vector.broadcast %94 : vector<256x1xf32> to vector<256x256xf32>
    %101 = vector.broadcast %99 : vector<1x256xf32> to vector<256x256xf32>
    %102 = arith.cmpf ogt, %100, %101 : vector<256x256xf32>
    %c0_47 = arith.constant 0 : index
    %c0_48 = arith.constant 0 : index
    %103 = vector.load %arg14[%c0_47, %c0_48] : memref<1x256xf32, #tpu.memory_space<vmem>>, vector<1x256xf32>
    %104 = vector.broadcast %94 : vector<256x1xf32> to vector<256x256xf32>
    %105 = vector.broadcast %103 : vector<1x256xf32> to vector<256x256xf32>
    %106 = arith.cmpf ole, %104, %105 : vector<256x256xf32>
    %107 = arith.andi %102, %106 : vector<256x256xi1>
    %108 = arith.extui %107 : vector<256x256xi1> to vector<256x256xi32>
    %109 = arith.sitofp %108 : vector<256x256xi32> to vector<256x256xf32>
    %110 = arith.truncf %109 : vector<256x256xf32> to vector<256x256xbf16>
    %c0_49 = arith.constant 0 : index
    %c0_50 = arith.constant 0 : index
    %111 = vector.load %arg15[%c0_49, %c0_50] : memref<256x256xbf16, #tpu.memory_space<vmem>>, vector<256x256xbf16>
    %cst_51 = arith.constant dense<0.000000e+00> : vector<256x256xf32>
    %112 = tpu.matmul %110, %111, %cst_51 {dimension_numbers = #tpu.dot_dimension_numbers<[1], [0], [0], [1], [0, 0, 1, 1], [], []>} : vector<256x256xbf16>, vector<256x256xbf16>, vector<256x256xf32> -> vector<256x256xf32>
    %113 = arith.truncf %112 : vector<256x256xf32> to vector<256x256xbf16>
    %c0_52 = arith.constant 0 : index
    %c0_53 = arith.constant 0 : index
    %c0_54 = arith.constant 0 : index
    %114 = vector.load %arg17[%c0_52, %c0_53, %c0_54] : memref<1x256x256xbf16, #tpu.memory_space<vmem>>, vector<1x256x256xbf16>
    %115 = vector.shape_cast %114 : vector<1x256x256xbf16> to vector<256x256xbf16>
    %116 = vector.shape_cast %113 : vector<256x256xbf16> to vector<1x256x256xbf16>
    tpu.vector_store %arg17[%c0_52, %c0_53, %c0_54], %116 {strides = array<i32>} : memref<1x256x256xbf16, #tpu.memory_space<vmem>>, vector<1x256x256xbf16>,
    return
  }
  func.func @transform_0(%arg0: i32, %arg1: i32) -> (i32, i32, i32, i32) {
    %c0_i32 = arith.constant 0 : i32
    %c0_i32_0 = arith.constant 0 : i32
    %c0_i32_1 = arith.constant 0 : i32
    return %arg0, %arg1, %c0_i32, %c0_i32_0 : i32, i32, i32, i32
  }
  func.func @transform_1(%arg0: i32, %arg1: i32) -> (i32, i32) {
    %c0_i32 = arith.constant 0 : i32
    %c0_i32_0 = arith.constant 0 : i32
    %c0_i32_1 = arith.constant 0 : i32
    return %c0_i32, %c0_i32_0 : i32, i32
  }
  func.func @transform_2(%arg0: i32, %arg1: i32) -> (i32, i32) {
    %c0_i32 = arith.constant 0 : i32
    %c0_i32_0 = arith.constant 0 : i32
    %c0_i32_1 = arith.constant 0 : i32
    return %c0_i32, %c0_i32_0 : i32, i32
  }
  func.func @transform_3(%arg0: i32, %arg1: i32) -> (i32, i32) {
    %c0_i32 = arith.constant 0 : i32
    %c0_i32_0 = arith.constant 0 : i32
    %c0_i32_1 = arith.constant 0 : i32
    return %c0_i32, %c0_i32_0 : i32, i32
  }
  func.func @transform_4(%arg0: i32, %arg1: i32) -> (i32, i32) {
    %c0_i32 = arith.constant 0 : i32
    %c0_i32_0 = arith.constant 0 : i32
    %c0_i32_1 = arith.constant 0 : i32
    return %c0_i32, %c0_i32_0 : i32, i32
  }
  func.func @transform_5(%arg0: i32, %arg1: i32) -> (i32, i32) {
    %c0_i32 = arith.constant 0 : i32
    %c0_i32_0 = arith.constant 0 : i32
    %c0_i32_1 = arith.constant 0 : i32
    return %c0_i32, %c0_i32_0 : i32, i32
  }
  func.func @transform_6(%arg0: i32, %arg1: i32) -> (i32, i32) {
    %c0_i32 = arith.constant 0 : i32
    %c0_i32_0 = arith.constant 0 : i32
    %c0_i32_1 = arith.constant 0 : i32
    return %c0_i32, %c0_i32_0 : i32, i32
  }
  func.func @transform_7(%arg0: i32, %arg1: i32) -> (i32, i32) {
    %c0_i32 = arith.constant 0 : i32
    %c0_i32_0 = arith.constant 0 : i32
    %c0_i32_1 = arith.constant 0 : i32
    return %c0_i32, %c0_i32_0 : i32, i32
  }
  func.func @transform_8(%arg0: i32, %arg1: i32) -> (i32, i32) {
    %c0_i32 = arith.constant 0 : i32
    %c0_i32_0 = arith.constant 0 : i32
    %c0_i32_1 = arith.constant 0 : i32
    return %c0_i32, %c0_i32_0 : i32, i32
  }
  func.func @transform_9(%arg0: i32, %arg1: i32) -> (i32, i32) {
    %c0_i32 = arith.constant 0 : i32
    %c0_i32_0 = arith.constant 0 : i32
    %c0_i32_1 = arith.constant 0 : i32
    return %c0_i32, %c0_i32_0 : i32, i32
  }
  func.func @transform_10(%arg0: i32, %arg1: i32) -> (i32, i32) {
    %c0_i32 = arith.constant 0 : i32
    %c0_i32_0 = arith.constant 0 : i32
    %c0_i32_1 = arith.constant 0 : i32
    return %c0_i32, %c0_i32_0 : i32, i32
  }
  func.func @transform_11(%arg0: i32, %arg1: i32) -> (i32, i32) {
    %c0_i32 = arith.constant 0 : i32
    %c0_i32_0 = arith.constant 0 : i32
    %c0_i32_1 = arith.constant 0 : i32
    return %c0_i32, %c0_i32_0 : i32, i32
  }
  func.func @transform_12(%arg0: i32, %arg1: i32) -> (i32, i32) {
    %c0_i32 = arith.constant 0 : i32
    %c0_i32_0 = arith.constant 0 : i32
    %c0_i32_1 = arith.constant 0 : i32
    return %c0_i32, %c0_i32_0 : i32, i32
  }
  func.func @transform_13(%arg0: i32, %arg1: i32) -> (i32, i32) {
    %c0_i32 = arith.constant 0 : i32
    %c0_i32_0 = arith.constant 0 : i32
    %c0_i32_1 = arith.constant 0 : i32
    return %c0_i32, %c0_i32_0 : i32, i32
  }
  func.func @transform_14(%arg0: i32, %arg1: i32) -> (i32, i32, i32, i32) {
    %c0_i32 = arith.constant 0 : i32
    %c0_i32_0 = arith.constant 0 : i32
    %c0_i32_1 = arith.constant 0 : i32
    return %arg0, %arg1, %c0_i32, %c0_i32_0 : i32, i32, i32, i32
  }
  func.func @transform_15(%arg0: i32, %arg1: i32) -> (i32, i32, i32) {
    %c0_i32 = arith.constant 0 : i32
    %c0_i32_0 = arith.constant 0 : i32
    return %arg0, %arg1, %c0_i32 : i32, i32, i32
  }
}

</mosaic_0001>

<bundles_post_ra>
// kernel: tpu_custom_call.1
= control target key start
LH: loop header
LB: loop body
LE: loop exit
PB: predicated region body
PF: predicated region fallthrough
CT: control target
= control target key end

     0   :  { %s8598_s0 = inlined_call_operand.vmem [shape: bf16[2,1,258,128], index: 0, kind: input, shape index: {}]   ;;  %s8599_s1 = inlined_call_operand.vmem [shape: bf16[128,128], index: 1, kind: input, shape index: {}]   ;;  %s8600_s2 = inlined_call_operand.vmem [shape: f32[1,128], index: 2, kind: input, shape index: {}]   ;;  %s8601_s3 = inlined_call_operand.vmem [shape: f32[1,128], index: 3, kind: input, shape index: {}]   ;;  %s8602_s4 = inlined_call_operand.vmem [shape: f32[1,128], index: 4, kind: input, shape index: {}]   ;;  %s8603_s5 = inlined_call_operand.vmem [shape: bf16[384,256], index: 5, kind: input, shape index: {}]   ;;  %s8604_s6 = inlined_call_operand.vmem [shape: f32[1,256], index: 6, kind: input, shape index: {}]   ;;  %s8605_s7 = inlined_call_operand.vmem [shape: f32[1,256], index: 7, kind: input, shape index: {}]   ;;  %s8606_s8 = inlined_call_operand.vmem [shape: f32[1,256], index: 8, kind: input, shape index: {}]   ;;  %s8607_s9 = inlined_call_operand.vmem [shape: f32[256,1], index: 9, kind: input, shape index: {}]   ;;  %s8608_s10 = inlined_call_operand.<no memory space> [shape: f32[1,1], index: 10, kind: input, shape index: {}]   ;;  %s8609_s11 = inlined_call_operand.vmem [shape: f32[1,256], index: 11, kind: input, shape index: {}]   ;;  %s8610_s12 = inlined_call_operand.vmem [shape: f32[1,256], index: 12, kind: input, shape index: {}]   ;;  %s8611_s13 = inlined_call_operand.hbm [shape: bf16[256,256], index: 13, kind: input, shape index: {}]   ;;  %s8612_s14 = inlined_call_operand.hbm [shape: f32[2,1,1,256], index: 14, kind: output, shape index: {0}]   ;;  %s8613_s15 = inlined_call_operand.hbm [shape: bf16[2,256,256], index: 15, kind: output, shape index: {1}]  }
   0x1   :  { %8652 = sst [smem:[#allocation45_spill]] %s8598_s0  ;;  %v21_v0 = vstv %s8608_s10 }
   0x2   :  { %8653 = sst [smem:[#allocation46_spill]] %s8599_s1  ;;  %22 = vst [vmem:[#allocation2] sm:$0x1] %v21_v0 }
   0x3   :  { %8654 = sst [smem:[#allocation47_spill]] %s8600_s2 }
   0x4   :  { %8655 = sst [smem:[#allocation48_spill]] %s8601_s3 }
   0x5   :  { %8656 = sst [smem:[#allocation49_spill]] %s8602_s4 }
   0x6   :  { %23 = vsyncpa [#allocation4], 0 }
   0x7   :  { %24 = vsyncpa [#allocation5], 0 }
   0x8   :  { %26 = vsyncpa [#allocation5 + $0x1], 0 }
   0x9   :  { %27 = vsyncpa [#allocation8], 0 }
   0xa   :  { %29 = vsyncpa [#allocation8 + $0x1], 0  ;;  %s6261_s20 = smov 0   ;;  %s6263_s21 = smov 0  }
   0xb   :  { %s6265_s22 = smov 0   ;;  %s6267_s23 = smov 0  }
   0xc   :  { %s6269_s24 = smov 0   ;;  %s6271_s25 = smov 0  }
   0xd LB: > { %8657 = sst [smem:[#allocation12_spill]] %s6159_s24  ;;  %s5218_s10 = sadd.s32 4294967295, %s6163_s25   ;;  %s6163_s25 = sphi %s6271_s25, %s35_s25   ;;  %s6159_s24 = sphi %s6269_s24, %s8737_s24   ;;  %s6155_s23 = sphi %s6267_s23, %s8736_s23   ;;  %s6151_s22 = sphi %s6265_s22, %s8740_s22   ;;  %s6147_s21 = sphi %s6263_s21, %s8739_s21   ;;  %s6143_s20 = sphi %s6261_s20, %s8738_s20  }
   0xe   : > { %s5219_s26 = sadd.s32 4294967294, %s6163_s25   ;;  %s47_s27 = sadd.s32 1, %s6159_s24 }
   0xf   : > { %s357_s28 = sadd.s32 1, %s6151_s22  ;;  %p49_p0 = scmp.ge.s32.totalorder %s47_s27, 2 }
  0x10   : > { %p367_p1 = scmp.ne.s32.totalorder %s6151_s22, %s6147_s21  ;;  %p368_p2 = scmp.eq.s32.totalorder %s5218_s10, 1 }
  0x11   : > { %p373_p3 = scmp.ne.s32.totalorder %s6147_s21, %s6143_s20  ;;  %s8742_s27 = smov (%p49_p0, %s47_s27), 0 }
  0x12   : > { %8658 = sst [smem:[#allocation13_spill]] %s8742_s27  ;;  %p6301_p4 = por %p368_p2, %p367_p1 }
  0x13   : > { %p374_p5 = scmp.eq.s32.totalorder %s5219_s26, 1  ;;  %s352_s30 = ssub.s32 %s6159_s24, %s8742_s27 }
  0x14   : > { %p5220_p6 = scmp.ge.s32.totalorder %s6163_s25, 1  ;;  %p355_p7 = scmp.eq.s32.totalorder %s352_s30, 0 }
  0x15   : > { %p6308_p8 = por %p374_p5, %p373_p3  ;;  %p409_p9 = scmp.lt.s32.totalorder %s6163_s25, 3 }
  0x16   : > { %s6314_s17 = scalar_select %p355_p7, %s6151_s22, %s357_s28  }
  0x17   : > { %p6316_p10 = pnand %p5220_p6, %p409_p9  ;;  %p6320_p11 = scmp.eq.s32.totalorder %s5218_s10, 0 }
  0x18   : > { %8661 = sst [smem:[#allocation14_spill]] %s6314_s17  ;;  %s6165_s26 = smov [#allocation3]  }
  0x19   : > { %p5675_p12 = pneg %p6316_p10  ;;  %s457_s30 = sshll.u32 %s6165_s26, 4  ;;  %s458_s30 = int_to_ptr.vmem [resolvable:$true] %s457_s30 }
  0x1a   : > { %s6038_s28 = scalar_lea.vmem %s458_s30, 4096  ;;  %p6046_p5 = scmp.lt.s32.totalorder %s458_s30, %s458_s30 }
  0x1b   : > { %p5676_p13 = pnand %p6320_p11, %p5675_p12  ;;  %p6039_p1 = scmp.ne.s32.totalorder %s458_s30, %s6038_s28 }
  0x1c   : > { %p6047_p6 = scmp.lt.s32.totalorder %s6038_s28, %s6038_s28 }
  0x1d   : > { %p6029_p0 = pneg %p5676_p13 }
  0x1e   : > { %p6048_p7 = por %p6047_p6, %p6046_p5 }
  0x1f   : > { %p6041_p2 = pnand %p6039_p1, %p6029_p0 }
  0x21   : > { %p6042_p3 = pneg %p6041_p2 }
  0x23   : > { %p6049_p9 = pnand %p6048_p7, %p6042_p3 }
  0x25   : > { %6052 = shalt.err (!%p6049_p9)
}
  0x26   : > { %s6166_s10 = smov 128   ;;  %s6167_s27 = smov 8  }
  0x27   : > { %5678 = dma.hbm_to_vmem [thread:$0]  (!%p5676_p13), %s8611_s13, 4096, %s458_s30, [#allocation4], %s6166_s10, %s6166_s10, %s6167_s27  }
  0x28   : > { %485 = sbr.rel (%p6316_p10) target bundleno = 1524 (0x5f4), region = 76 }
  0x2d   : > { %6130 = dma.done.wait (%p6320_p11), [#allocation4], 4096  }
  0x2e   : > { %6132 = vsyncadd (%p6320_p11), [#allocation4], 4294963200  ;;  %v8617_v1 = vmov 0.0   ;;  %vm6169_vm0 = vmmov 0   ;;  %p542_p12 = scmp.lt.s32.totalorder %s6155_s23, 1  ;;  %s8664_s1 = sld [smem:[#allocation46_spill]] }
  0x2f   : > { %5566 = vmatprep.subr.bf16.mxu0 %v8617_v1  ;;  %5582 = vmatprep.mubr.msk.bf16.mxu0 %vm6169_vm0, %v8617_v1  ;;  %s8665_s0 = sld [smem:[#allocation45_spill]]  ;;  %v5775_v28 = vld [vmem:[%s8603_s5 + $0x170] ss:$8 sps:$4 sm:$0xff]   ;;  %v5777_v29 = vld [vmem:[%s8603_s5 + $0x174] ss:$8 sps:$4 sm:$0xff]   ;;  %vm1024_vm1 = vcmask 1041408  }
  0x30   : > { %5650 = vmatprep.subr.bf16.mxu1 %v8617_v1  ;;  %5618 = vmatprep.mubr.msk.bf16.mxu1 %vm6169_vm0, %v8617_v1  ;;  %s543_s24 = scalar_select %p542_p12, %s6155_s23, 1  ;;  %v5778_v39 = vld [vmem:[%s8603_s5 + $0x70] ss:$8 sps:$4 sm:$0xff]   ;;  %v5780_v40 = vld [vmem:[%s8603_s5 + $0x74] ss:$8 sps:$4 sm:$0xff]   ;;  %vm1994_vm3 = vcmask 1046528  }
  0x31   : > { %s8666_s2 = sld [smem:[#allocation47_spill]]  ;;  %v5781_v45 = vld [vmem:[%s8603_s5 + $0x160] ss:$8 sps:$4 sm:$0xff]   ;;  %v5783_v46 = vld [vmem:[%s8603_s5 + $0x164] ss:$8 sps:$4 sm:$0xff]   ;;  %s8485_s19 = sand.u32 1, %s6147_s21  }
  0x32   : > { %s5666_s26 = smul.u32 132, %s543_s24  ;;  %v5784_v49 = vld [vmem:[%s8603_s5 + $0x60] ss:$8 sps:$4 sm:$0xff]   ;;  %v5786_v50 = vld [vmem:[%s8603_s5 + $0x64] ss:$8 sps:$4 sm:$0xff]   ;;  %s8668_s3 = sld [smem:[#allocation48_spill]] }
  0x33   : > { %v5789_v56 = vld [vmem:[%s8603_s5 + $0x54] ss:$8 sps:$4 sm:$0xff]   ;;  %v5787_v59 = vld [vmem:[%s8603_s5 + $0x50] ss:$8 sps:$4 sm:$0xff]   ;;  %s8669_s4 = sld [smem:[#allocation49_spill]]  ;;  %s5539_s28 = sshll.u32 %s6155_s23, 5 }
  0x34   : > { %v5750_v2 = vld [vmem:[%s8664_s1 + $0x38] sm:$0xff]   ;;  %v5751_v3 = vld [vmem:[%s8664_s1 + $0x30] sm:$0xff]   ;;  %v5752_v4 = vld [vmem:[%s8664_s1 + $0x28] sm:$0xff]   ;;  %vm1828_vm4 = vsmask.f32 7424  ;;  %s5071_s24 = scalar_lea.hbm %s8612_s14, %s5539_s28  ;;  %s6174_s30 = smov [#allocation6]  }
  0x35   : > { %5567 = vmatpush3.bf16.msra.mxu0 %v5750_v2  ;;  %5658 = vmatpush3.bf16.msra.mxu1 %v5750_v2  ;;  %s6360_s17 = scalar_lea.vmem %s8665_s0, %s5666_s26  ;;  %v5753_v5 = vld [vmem:[%s8664_s1 + $0x20] sm:$0xff]   ;;  %v5754_v6 = vld [vmem:[%s8664_s1 + $0x18] sm:$0xff]   ;;  %v5755_v7 = vld [vmem:[%s8664_s1 + $0x10] sm:$0xff]   ;;  %s5225_s26 = sshll.u32 %s8485_s19, 1 }
  0x36   : > { %5568 = vmatprep.subr.bf16.mxu0 %v8617_v1  ;;  %5651 = vmatprep.subr.bf16.mxu1 %v8617_v1  ;;  %v5756_v8 = vld [vmem:[%s8664_s1 + $0x8] sm:$0xff]   ;;  %v5757_v9 = vld [vmem:[%s8664_s1] sm:$0xff]   ;;  %v5768_v13 = vld [vmem:[%s6360_s17 + $0x50] sm:$0xff]   ;;  %s534_s10 = scalar_lea.vmem [#allocation6], %s5225_s26  ;;  %s5052_s0 = scalar_lea.sflag [#allocation5], %s8485_s19 }
  0x37   : > { %v5758_v10 = vld [vmem:[%s6360_s17] sm:$0xff]   ;;  %v5767_v11 = vld [vmem:[%s6360_s17 + $0x48] sm:$0xff]   ;;  %v5760_v14 = vld [vmem:[%s6360_s17 + $0x10] sm:$0xff]   ;;  %s5073_s27 = sshll.u32 %s534_s10, 4  ;;  %s5074_s27 = int_to_ptr.vmem [resolvable:$true] %s5073_s27 }
  0x38   : > { %v5759_v12 = vld [vmem:[%s6360_s17 + $0x8] sm:$0xff]   ;;  %v5769_v15 = vld [vmem:[%s6360_s17 + $0x58] sm:$0xff]   ;;  %v5770_v17 = vld [vmem:[%s6360_s17 + $0x60] sm:$0xff]   ;;  %s6053_s1 = scalar_lea.vmem %s5074_s27, 32 }
  0x39   : > { %5569 = vmatpush3.bf16.msra.mxu0 %v5751_v3  ;;  %5659 = vmatpush3.bf16.msra.mxu1 %v5751_v3  ;;  %v5761_v16 = vld [vmem:[%s6360_s17 + $0x18] sm:$0xff]   ;;  %v5762_v18 = vld [vmem:[%s6360_s17 + $0x20] sm:$0xff]   ;;  %v5771_v19 = vld [vmem:[%s6360_s17 + $0x68] sm:$0xff]   ;;  %p6054_p10 = scmp.ne.s32.totalorder %s5074_s27, %s6053_s1 }
  0x3a   : > { %5570 = vmatprep.subr.bf16.mxu0 %v8617_v1  ;;  %5652 = vmatprep.subr.bf16.mxu1 %v8617_v1  ;;  %v5763_v20 = vld [vmem:[%s6360_s17 + $0x28] sm:$0xff]   ;;  %v5772_v21 = vld [vmem:[%s6360_s17 + $0x70] sm:$0xff]   ;;  %v5773_v23 = vld [vmem:[%s6360_s17 + $0x78] sm:$0xff]  }
  0x3b   : > { %v5764_v22 = vld [vmem:[%s6360_s17 + $0x30] sm:$0xff]   ;;  %v5765_v24 = vld [vmem:[%s6360_s17 + $0x38] sm:$0xff]   ;;  %v5774_v25 = vld [vmem:[%s6360_s17 + $0x80] ss:$0 sps:$4 sm:$0x11]   ;;  %p6055_p11 = pnand %p6054_p10, %p6301_p4 }
  0x3c   : > { %v5766_v26 = vld [vmem:[%s6360_s17 + $0x40] sm:$0xff]  }
  0x3d   : > { %5571 = vmatpush3.bf16.msra.mxu0 %v5752_v4  ;;  %5660 = vmatpush3.bf16.msra.mxu1 %v5752_v4  ;;  %v6438_v27 = vld [vmem:[%s8666_s2] ss:$0 sm:$0xff]  ;;  %p6056_p13 = pneg %p6055_p11  ;;  %s6057_s2 = sshll.u32 %s6174_s30, 4  ;;  %s6058_s2 = int_to_ptr.vmem [resolvable:$false] %s6057_s2 }
  0x3e   : > { %5572 = vmatprep.subr.bf16.mxu0 %v8617_v1  ;;  %5653 = vmatprep.subr.bf16.mxu1 %v8617_v1  ;;  %p6060_p0 = scmp.lt.s32.totalorder %s5074_s27, %s6058_s2 }
  0x41   : > { %5573 = vmatpush3.bf16.msra.mxu0 %v5753_v5  ;;  %5661 = vmatpush3.bf16.msra.mxu1 %v5753_v5  ;;  %v5790_v5 = vld [vmem:[%s8603_s5 + $0x40] ss:$8 sps:$4 sm:$0xff]  }
  0x42   : > { %5574 = vmatprep.subr.bf16.mxu0 %v8617_v1  ;;  %5654 = vmatprep.subr.bf16.mxu1 %v8617_v1 }
  0x45   : > { %5575 = vmatpush3.bf16.msra.mxu0 %v5754_v6  ;;  %5662 = vmatpush3.bf16.msra.mxu1 %v5754_v6  ;;  %v5792_v6 = vld [vmem:[%s8603_s5 + $0x44] ss:$8 sps:$4 sm:$0xff]  }
  0x46   : > { %5576 = vmatprep.subr.bf16.mxu0 %v8617_v1  ;;  %5655 = vmatprep.subr.bf16.mxu1 %v8617_v1 }
  0x49   : > { %5577 = vmatpush3.bf16.msra.mxu0 %v5755_v7  ;;  %5663 = vmatpush3.bf16.msra.mxu1 %v5755_v7 }
  0x4a   : > { %5578 = vmatprep.subr.bf16.mxu0 %v8617_v1  ;;  %5656 = vmatprep.subr.bf16.mxu1 %v8617_v1 }
  0x4d   : > { %5579 = vmatpush3.bf16.msra.mxu0 %v5756_v8  ;;  %5664 = vmatpush3.bf16.msra.mxu1 %v5756_v8 }
  0x4e   : > { %5580 = vmatprep.subr.bf16.mxu0 %v8617_v1  ;;  %5657 = vmatprep.subr.bf16.mxu1 %v8617_v1 }
  0x51   : > { %5581 = vmatpush3.bf16.msra.mxu0 %v5757_v9  ;;  %5665 = vmatpush3.bf16.msra.mxu1 %v5757_v9  ;;  %v5793_v9 = vld [vmem:[%s8603_s5 + $0x150] ss:$8 sps:$4 sm:$0xff]  }
  0x52   : > { %2537 = vmatprep.subr.bf16.mxu0 %v5777_v29  ;;  %2344 = vmatprep.subr.bf16.mxu1 %v5780_v40  ;;  %v5799_v29 = vld [vmem:[%s8603_s5 + $0x20] ss:$8 sps:$4 sm:$0xff]  }
  0x54   : > { %5583 = vmatmul.mubr.bf16.vlgmr.msra.gmra.mxu0 %v5758_v10  ;;  %5619 = vmatmul.mubr.bf16.vlgmr.msra.gmra.mxu1 %v5767_v11  ;;  %v5795_v10 = vld [vmem:[%s8603_s5 + $0x154] ss:$8 sps:$4 sm:$0xff]  }
  0x55   : > { %5586 = vmatprep.mubr.msk.bf16.mxu0 %vm6169_vm0, %v8617_v1  ;;  %5622 = vmatprep.mubr.msk.bf16.mxu1 %vm6169_vm0, %v8617_v1 }
  0x56   : > { %2538 = vmatpush1.bf16.msra.mxu0 %v5775_v28  ;;  %2345 = vmatpush1.bf16.msra.mxu1 %v5778_v39 }
  0x57   : > { %2539 = vmatprep.subr.bf16.mxu0 %v5783_v46  ;;  %2346 = vmatprep.subr.bf16.mxu1 %v5786_v50 }
  0x5a   : > { %2540 = vmatpush1.bf16.msra.mxu0 %v5781_v45  ;;  %2347 = vmatpush1.bf16.msra.mxu1 %v5784_v49 }
  0x5b   : > { %2348 = vmatprep.subr.bf16.mxu1 %v5789_v56  ;;  %2541 = vmatprep.subr.bf16.mxu0 %v5795_v10  ;;  %v5819_v10 = vld [vmem:[%s8603_s5 + $0xe4] ss:$8 sps:$4 sm:$0xff]  }
  0x5c   : > { %5587 = vmatmul.mubr.bf16.gmra.mxu0 %v5759_v12  ;;  %5623 = vmatmul.mubr.bf16.gmra.mxu1 %v5768_v13 }
  0x5d   : > { %5590 = vmatprep.mubr.msk.bf16.mxu0 %vm6169_vm0, %v8617_v1  ;;  %5626 = vmatprep.mubr.msk.bf16.mxu1 %vm6169_vm0, %v8617_v1 }
  0x5e   : > { %2349 = vmatpush1.bf16.msra.mxu1 %v5787_v59  ;;  %2542 = vmatpush1.bf16.msra.mxu0 %v5793_v9 }
  0x5f   : > { %2350 = vmatprep.subr.bf16.mxu1 %v5792_v6 }
  0x62   : > { %2351 = vmatpush1.bf16.msra.mxu1 %v5790_v5 }
  0x64   : > { %5591 = vmatmul.mubr.bf16.gmra.mxu0 %v5760_v14  ;;  %5627 = vmatmul.mubr.bf16.gmra.mxu1 %v5769_v15 }
  0x65   : > { %5594 = vmatprep.mubr.msk.bf16.mxu0 %vm6169_vm0, %v8617_v1  ;;  %5630 = vmatprep.mubr.msk.bf16.mxu1 %vm6169_vm0, %v8617_v1 }
  0x6c   : > { %5595 = vmatmul.mubr.bf16.gmra.mxu0 %v5761_v16  ;;  %5631 = vmatmul.mubr.bf16.gmra.mxu1 %v5770_v17  ;;  %v5798_v17 = vld [vmem:[%s8603_s5 + $0x34] ss:$8 sps:$4 sm:$0xff]  }
  0x6d   : > { %5598 = vmatprep.mubr.msk.bf16.mxu0 %vm6169_vm0, %v8617_v1  ;;  %5634 = vmatprep.mubr.msk.bf16.mxu1 %vm6169_vm0, %v8617_v1 }
  0x6e   : > { %2352 = vmatprep.subr.bf16.mxu1 %v5798_v17 }
  0x74   : > { %5599 = vmatmul.mubr.bf16.gmra.mxu0 %v5762_v18  ;;  %5635 = vmatmul.mubr.bf16.gmra.mxu1 %v5771_v19 }
  0x75   : > { %5602 = vmatprep.mubr.msk.bf16.mxu0 %vm6169_vm0, %v8617_v1  ;;  %5638 = vmatprep.mubr.msk.bf16.mxu1 %vm6169_vm0, %v8617_v1 }
  0x7c   : > { %5603 = vmatmul.mubr.bf16.gmra.mxu0 %v5763_v20  ;;  %5639 = vmatmul.mubr.bf16.gmra.mxu1 %v5772_v21  ;;  %v5796_v20 = vld [vmem:[%s8603_s5 + $0x30] ss:$8 sps:$4 sm:$0xff]  }
  0x7d   : > { %5606 = vmatprep.mubr.msk.bf16.mxu0 %vm6169_vm0, %v8617_v1  ;;  %5642 = vmatprep.mubr.msk.bf16.mxu1 %vm6169_vm0, %v8617_v1 }
  0x7e   : > { %2353 = vmatpush1.bf16.msra.mxu1 %v5796_v20 }
  0x84   : > { %5607 = vmatmul.mubr.bf16.gmra.mxu0 %v5764_v22  ;;  %5643 = vmatmul.mubr.bf16.gmra.mxu1 %v5773_v23 }
  0x85   : > { %5610 = vmatprep.mubr.msk.bf16.mxu0 %vm6169_vm0, %v8617_v1  ;;  %5646 = vmatprep.mubr.msk.bf16.mxu1 %vm6169_vm0, %v8617_v1 }
  0x8c   : > { %5611 = vmatmul.mubr.bf16.gmra.mxu0 %v5765_v24  ;;  %5647 = vmatmul.mubr.bf16.gmra.mxu1 %v5774_v25  ;;  %v5801_v25 = vld [vmem:[%s8603_s5 + $0x24] ss:$8 sps:$4 sm:$0xff]  }
  0x8d   : > { %5614 = vmatprep.mubr.msk.bf16.mxu0 %vm6169_vm0, %v8617_v1  ;;  %2354 = vmatprep.subr.bf16.mxu1 %v5801_v25 }
  0x8e   : > { %2355 = vmatpush1.bf16.msra.mxu1 %v5799_v29  ;;  %v5823_v29 = vld [vmem:[%s8603_s5 + $0xd0] ss:$8 sps:$4 sm:$0xff]  }
  0x94   : > { %5615 = vmatmul.mubr.bf16.gmra.mxu0 %v5766_v26 }
 0x114   : > { %v791_v30 = vpop.f32.mrf.mxu0  ;;  %v6446_v31 = vpop.f32.mrf.mxu1 }
 0x115   : > { %v792_v32 = vadd.f32 %v6438_v27, %v791_v30 }
 0x116   : > { %v5584_v33 = vpop.f32.mrf.mxu0  ;;  %v5620_v34 = vpop.f32.mrf.mxu1 }
 0x117   : > { %v6449_v35 = vmax.f32 %v792_v32, 0.0 }
 0x118   : > { %v794_v36 = vpop.f32.mrf.mxu0  ;;  %v6451_v37 = vpop.f32.mrf.mxu1 }
 0x119   : > { %v795_v38 = vadd.f32 %v6438_v27, %v794_v36  ;;  %960 = vadd.xlane.f32.xlu0 %v6449_v35  ;;  %v1062_v44 = vmul.f32 %v6449_v35, %v6449_v35 }
 0x11a   : > { %v5585_v41 = vpop.f32.mrf.mxu0  ;;  %v5621_v42 = vpop.f32.mrf.mxu1 }
 0x11b   : > { %v6461_v43 = vmax.f32 %v795_v38, 0.0  ;;  %v5807_v41 = vld [vmem:[%s8603_s5 + $0x14] ss:$8 sps:$4 sm:$0xff]   ;;  %v5805_v42 = vld [vmem:[%s8603_s5 + $0x10] ss:$8 sps:$4 sm:$0xff]  }
 0x11c   : > { %v799_v47 = vpop.f32.mrf.mxu0  ;;  %v6471_v48 = vpop.f32.mrf.mxu1  ;;  %2356 = vmatprep.subr.bf16.mxu1 %v5807_v41  ;;  %v5813_v41 = vld [vmem:[%s8603_s5 + $0x134] ss:$8 sps:$4 sm:$0xff]  }
 0x11d   : > { %v800_v51 = vadd.f32 %v6438_v27, %v799_v47  ;;  %1095 = vadd.xlane.f32.xlu0 %v1062_v44  ;;  %v1063_v52 = vmul.f32 %v6461_v43, %v6461_v43  ;;  %2357 = vmatpush1.bf16.msra.mxu1 %v5805_v42 }
 0x11e   : > { %v5588_v53 = vpop.f32.mrf.mxu0  ;;  %v5624_v54 = vpop.f32.mrf.mxu1 }
 0x11f   : > { %v6482_v55 = vmax.f32 %v800_v51, 0.0  ;;  %1097 = vadd.xlane.f32.xlu1 %v1063_v52  ;;  %v5810_v51 = vld [vmem:[%s8603_s5 + $0x4] ss:$8 sps:$4 sm:$0xff]   ;;  %v5808_v53 = vld [vmem:[%s8603_s5] ss:$8 sps:$4 sm:$0xff]  }
 0x120   : > { %v802_v57 = vpop.f32.mrf.mxu0  ;;  %v6487_v58 = vpop.f32.mrf.mxu1  ;;  %2358 = vmatprep.subr.bf16.mxu1 %v5810_v51 }
 0x121   : > { %v803_v60 = vadd.f32 %v6438_v27, %v802_v57  ;;  %962 = vadd.xlane.f32.xlu0 %v6461_v43  ;;  %v1064_v61 = vmul.f32 %v6482_v55, %v6482_v55  ;;  %2359 = vmatpush1.bf16.msra.mxu1 %v5808_v53 }
 0x122   : > { %v5589_v62 = vpop.f32.mrf.mxu0  ;;  %v5625_v63 = vpop.f32.mrf.mxu1 }
 0x123   : > { %964 = vadd.xlane.f32.xlu1 %v6482_v55  ;;  %v6499_v3 = vmax.f32 %v803_v60, 0.0  ;;  %v5816_v63 = vld [vmem:[%s8603_s5 + $0xf4] ss:$8 sps:$4 sm:$0xff]  }
 0x124   : > { %v807_v0 = vpop.f32.mrf.mxu0  ;;  %v6497_v2 = vpop.f32.mrf.mxu1  ;;  %2360 = vmatprep.subr.bf16.mxu1 %v5816_v63  ;;  %v5820_v63 = vld [vmem:[%s8603_s5 + $0x120] ss:$8 sps:$4 sm:$0xff]  }
 0x125   : > { %v808_v4 = vadd.f32 %v6438_v27, %v807_v0  ;;  %1099 = vadd.xlane.f32.xlu0 %v1064_v61  ;;  %v1065_v15 = vmul.f32 %v6499_v3, %v6499_v3  ;;  %v5814_v0 = vld [vmem:[%s8603_s5 + $0xf0] ss:$8 sps:$4 sm:$0xff]  }
 0x126   : > { %v5592_v7 = vpop.f32.mrf.mxu0  ;;  %v5628_v8 = vpop.f32.mrf.mxu1  ;;  %2361 = vmatpush2.bf16.msra.mxu1 %v5814_v0  ;;  %v5831_v0 = vld [vmem:[%s8603_s5 + $0xb4] ss:$8 sps:$4 sm:$0xff]  }
 0x127   : > { %v6514_v11 = vmax.f32 %v808_v4, 0.0  ;;  %966 = vadd.xlane.f32.xlu1 %v6499_v3  ;;  %2362 = vmatprep.subr.bf16.mxu1 %v5819_v10  ;;  %v5829_v10 = vld [vmem:[%s8603_s5 + $0xb0] ss:$8 sps:$4 sm:$0xff]  }
 0x128   : > { %v810_v12 = vpop.f32.mrf.mxu0  ;;  %v6517_v13 = vpop.f32.mrf.mxu1 }
 0x129   : > { %v811_v14 = vadd.f32 %v6438_v27, %v810_v12  ;;  %968 = vadd.xlane.f32.xlu0 %v6514_v11  ;;  %v1066_v16 = vmul.f32 %v6514_v11, %v6514_v11 }
 0x12a   : > { %v5593_v18 = vpop.f32.mrf.mxu0  ;;  %v5629_v19 = vpop.f32.mrf.mxu1 }
 0x12b   : > { %1101 = vadd.xlane.f32.xlu1 %v1065_v15  ;;  %v6533_v23 = vmax.f32 %v811_v14, 0.0  ;;  %v5817_v14 = vld [vmem:[%s8603_s5 + $0xe0] ss:$8 sps:$4 sm:$0xff]  }
 0x12c   : > { %v815_v21 = vpop.f32.mrf.mxu0  ;;  %v6531_v22 = vpop.f32.mrf.mxu1  ;;  %2363 = vmatpush2.bf16.msra.mxu1 %v5817_v14 }
 0x12d   : > { %v816_v24 = vadd.f32 %v6438_v27, %v815_v21  ;;  %1103 = vadd.xlane.f32.xlu0 %v1066_v16  ;;  %v1067_v36 = vmul.f32 %v6533_v23, %v6533_v23 }
 0x12e   : > { %v5596_v26 = vpop.f32.mrf.mxu0  ;;  %v5632_v28 = vpop.f32.mrf.mxu1 }
 0x12f   : > { %v6542_v30 = vmax.f32 %v816_v24, 0.0  ;;  %970 = vadd.xlane.f32.xlu1 %v6533_v23  ;;  %v5804_v24 = vld [vmem:[%s8603_s5 + $0x144] ss:$8 sps:$4 sm:$0xff]   ;;  %v5802_v28 = vld [vmem:[%s8603_s5 + $0x140] ss:$8 sps:$4 sm:$0xff]  }
 0x130   : > { %v818_v32 = vpop.f32.mrf.mxu0  ;;  %v6545_v33 = vpop.f32.mrf.mxu1  ;;  %2543 = vmatprep.subr.bf16.mxu0 %v5804_v24 }
 0x131   : > { %v819_v34 = vadd.f32 %v6438_v27, %v818_v32  ;;  %972 = vadd.xlane.f32.xlu0 %v6542_v30  ;;  %v1068_v38 = vmul.f32 %v6542_v30, %v6542_v30  ;;  %v5825_v32 = vld [vmem:[%s8603_s5 + $0xd4] ss:$8 sps:$4 sm:$0xff]   ;;  %2544 = vmatpush1.bf16.msra.mxu0 %v5802_v28 }
 0x132   : > { %v5597_v39 = vpop.f32.mrf.mxu0  ;;  %v5633_v40 = vpop.f32.mrf.mxu1  ;;  %2364 = vmatprep.subr.bf16.mxu1 %v5825_v32  ;;  %2545 = vmatprep.subr.bf16.mxu0 %v5813_v41  ;;  %v5835_v32 = vld [vmem:[%s8603_s5 + $0xa0] ss:$8 sps:$4 sm:$0xff]  }
 0x133   : > { %1105 = vadd.xlane.f32.xlu1 %v1067_v36  ;;  %v6561_v46 = vmax.f32 %v819_v34, 0.0  ;;  %2365 = vmatpush2.bf16.msra.mxu1 %v5823_v29  ;;  %v5841_v41 = vld [vmem:[%s8603_s5 + $0x100] ss:$8 sps:$4 sm:$0xff]  }
 0x134   : > { %v823_v44 = vpop.f32.mrf.mxu0  ;;  %v6559_v45 = vpop.f32.mrf.mxu1 }
 0x135   : > { %v824_v47 = vadd.f32 %v6438_v27, %v823_v44  ;;  %1107 = vadd.xlane.f32.xlu0 %v1068_v38  ;;  %v1069_v59 = vmul.f32 %v6561_v46, %v6561_v46 }
 0x136   : > { %v5600_v49 = vpop.f32.mrf.mxu0  ;;  %v5636_v50 = vpop.f32.mrf.mxu1 }
 0x137   : > { %v6567_v52 = vmax.f32 %v824_v47, 0.0  ;;  %974 = vadd.xlane.f32.xlu1 %v6561_v46  ;;  %v5811_v47 = vld [vmem:[%s8603_s5 + $0x130] ss:$8 sps:$4 sm:$0xff]   ;;  %v5828_v49 = vld [vmem:[%s8603_s5 + $0xc4] ss:$8 sps:$4 sm:$0xff]  }
 0x138   : > { %v826_v54 = vpop.f32.mrf.mxu0  ;;  %v6573_v56 = vpop.f32.mrf.mxu1  ;;  %2546 = vmatpush1.bf16.msra.mxu0 %v5811_v47  ;;  %2366 = vmatprep.subr.bf16.mxu1 %v5828_v49 }
 0x139   : > { %v827_v57 = vadd.f32 %v6438_v27, %v826_v54  ;;  %976 = vadd.xlane.f32.xlu0 %v6567_v52  ;;  %v1070_v60 = vmul.f32 %v6567_v52, %v6567_v52 }
 0x13a   : > { %v5601_v61 = vpop.f32.mrf.mxu0  ;;  %v5637_v62 = vpop.f32.mrf.mxu1 }
 0x13b   : > { %1109 = vadd.xlane.f32.xlu1 %v1069_v59  ;;  %v6589_v6 = vmax.f32 %v827_v57, 0.0  ;;  %v5826_v59 = vld [vmem:[%s8603_s5 + $0xc0] ss:$8 sps:$4 sm:$0xff]  }
 0x13c   : > { %v831_v4 = vpop.f32.mrf.mxu0  ;;  %v6587_v5 = vpop.f32.mrf.mxu1  ;;  %2367 = vmatpush2.bf16.msra.mxu1 %v5826_v59  ;;  %v8619_v59 = vmov 0  }
 0x13d   : > { %v832_v7 = vadd.f32 %v6438_v27, %v831_v4  ;;  %1111 = vadd.xlane.f32.xlu0 %v1070_v60  ;;  %v1071_v18 = vmul.f32 %v6589_v6, %v6589_v6  ;;  %v5822_v60 = vld [vmem:[%s8603_s5 + $0x124] ss:$8 sps:$4 sm:$0xff]   ;;  %2368 = vmatprep.subr.bf16.mxu1 %v5831_v0 }
 0x13e   : > { %v5604_v8 = vpop.f32.mrf.mxu0  ;;  %v5640_v9 = vpop.f32.mrf.mxu1  ;;  %2547 = vmatprep.subr.bf16.mxu0 %v5822_v60  ;;  %2569 = vmatprep.mubr.bf16.mxu0 %v8619_v59 }
 0x13f   : > { %v6595_v12 = vmax.f32 %v832_v7, 0.0  ;;  %978 = vadd.xlane.f32.xlu1 %v6589_v6  ;;  %2548 = vmatpush1.bf16.msra.mxu0 %v5820_v63 }
 0x140   : > { %v834_v15 = vpop.f32.mrf.mxu0  ;;  %v6601_v16 = vpop.f32.mrf.mxu1  ;;  %2369 = vmatpush2.bf16.msra.mxu1 %v5829_v10  ;;  %5749 = vset.pattern.permute.xlu1 %v8619_v59  ;;  %v872_v10 = vadd.f32 %v6438_v27, %v6471_v48  ;;  %v880_v48 = vadd.f32 %v6438_v27, %v6497_v2  ;;  %v888_v2 = vadd.f32 %v6438_v27, %v6531_v22 }
 0x141   : > { %v835_v17 = vadd.f32 %v6438_v27, %v834_v15  ;;  %980 = vadd.xlane.f32.xlu0 %v6595_v12  ;;  %v1072_v19 = vmul.f32 %v6595_v12, %v6595_v12  ;;  %v5834_v15 = vld [vmem:[%s8603_s5 + $0x114] ss:$8 sps:$4 sm:$0xff]   ;;  %v896_v22 = vadd.f32 %v6438_v27, %v6559_v45  ;;  %v904_v45 = vadd.f32 %v6438_v27, %v6587_v5 }
 0x142   : > { %v5605_v20 = vpop.f32.mrf.mxu0  ;;  %v5641_v21 = vpop.f32.mrf.mxu1  ;;  %2549 = vmatprep.subr.bf16.mxu0 %v5834_v15  ;;  %5748 = vset.pattern.permute.xlu0 %v8619_v59 }
 0x143   : > { %1113 = vadd.xlane.f32.xlu1 %v1071_v18  ;;  %v6623_v34 = vmax.f32 %v835_v17, 0.0  ;;  %v5837_v20 = vld [vmem:[%s8603_s5 + $0xa4] ss:$8 sps:$4 sm:$0xff]  }
 0x144   : > { %v839_v25 = vpop.f32.mrf.mxu0  ;;  %v6612_v26 = vpop.f32.mrf.mxu1  ;;  %2370 = vmatprep.subr.bf16.mxu1 %v5837_v20 }
 0x145   : > { %v840_v36 = vadd.f32 %v6438_v27, %v839_v25  ;;  %1115 = vadd.xlane.f32.xlu0 %v1072_v19  ;;  %v1073_v51 = vmul.f32 %v6623_v34, %v6623_v34  ;;  %v5832_v19 = vld [vmem:[%s8603_s5 + $0x110] ss:$8 sps:$4 sm:$0xff]   ;;  %2371 = vmatpush2.bf16.msra.mxu1 %v5835_v32  ;;  %v912_v5 = vadd.f32 %v6438_v27, %v6612_v26 }
 0x146   : > { %v5608_v38 = vpop.f32.mrf.mxu0  ;;  %v5644_v39 = vpop.f32.mrf.mxu1  ;;  %2550 = vmatpush1.bf16.msra.mxu0 %v5832_v19  ;;  %v6739_v19 = vmax.f32 %v872_v10, 0.0 }
 0x147   : > { %v6626_v40 = vmax.f32 %v840_v36, 0.0  ;;  %982 = vadd.xlane.f32.xlu1 %v6623_v34  ;;  %v5840_v36 = vld [vmem:[%s8603_s5 + $0x94] ss:$8 sps:$4 sm:$0xff]   ;;  %v5843_v38 = vld [vmem:[%s8603_s5 + $0x104] ss:$8 sps:$4 sm:$0xff]  }
 0x148   : > { %v842_v42 = vpop.f32.mrf.mxu0  ;;  %v6632_v44 = vpop.f32.mrf.mxu1  ;;  %2551 = vmatprep.subr.bf16.mxu0 %v5843_v38  ;;  %2372 = vmatprep.subr.bf16.mxu1 %v5840_v36  ;;  %v6767_v36 = vmax.f32 %v888_v2, 0.0 }
 0x149   : > { %v843_v50 = vadd.f32 %v6438_v27, %v842_v42  ;;  %984 = vadd.xlane.f32.xlu0 %v6626_v40  ;;  %v1074_v53 = vmul.f32 %v6626_v40, %v6626_v40  ;;  %v915_v26 = vadd.f32 %v6438_v27, %v6632_v44 }
 0x14a   : > { %v5609_v54 = vpop.f32.mrf.mxu0  ;;  %v5645_v57 = vpop.f32.mrf.mxu1  ;;  %2552 = vmatpush1.bf16.msra.mxu0 %v5841_v41 }
 0x14b   : > { %1117 = vadd.xlane.f32.xlu1 %v1073_v51  ;;  %v6660_v4 = vmax.f32 %v843_v50, 0.0  ;;  %v5838_v50 = vld [vmem:[%s8603_s5 + $0x90] ss:$8 sps:$4 sm:$0xff]   ;;  %v864_v57 = vadd.f32 %v6438_v27, %v6446_v31  ;;  %v5844_v31 = vld [vmem:[%s8603_s5 + $0x80] ss:$8 sps:$4 sm:$0xff]   ;;  %v6823_v10 = vmax.f32 %v915_v26, 0.0 }
 0x14c   : > { %v847_v61 = vpop.f32.mrf.mxu0  ;;  %v6652_v62 = vpop.f32.mrf.mxu1  ;;  %2373 = vmatpush2.bf16.msra.mxu1 %v5838_v50 }
 0x14d   : > { %v848_v7 = vadd.f32 %v6438_v27, %v847_v61  ;;  %1119 = vadd.xlane.f32.xlu0 %v1074_v53  ;;  %v1075_v24 = vmul.f32 %v6660_v4, %v6660_v4  ;;  %v5846_v53 = vld [vmem:[%s8603_s5 + $0x84] ss:$8 sps:$4 sm:$0xff]   ;;  %v1093_v44 = vmul.f32 %v6823_v10, %v6823_v10 }
 0x14e   : > { %v5612_v8 = vpop.f32.mrf.mxu0  ;;  %v5648_v9 = vpop.f32.mrf.mxu1  ;;  %2374 = vmatprep.subr.bf16.mxu1 %v5846_v53 }
 0x14f   : > { %v6666_v14 = vmax.f32 %v848_v7, 0.0  ;;  %986 = vadd.xlane.f32.xlu1 %v6660_v4  ;;  %v6724_v8 = vmax.f32 %v864_v57, 0.0  ;;  %v867_v9 = vadd.f32 %v6438_v27, %v6451_v37  ;;  %v875_v37 = vadd.f32 %v6438_v27, %v6487_v58 }
 0x150   : > { %v850_v17 = vpop.f32.mrf.mxu0  ;;  %v922_v18 = vpop.f32.mrf.mxu1  ;;  %2375 = vmatpush2.bf16.msra.mxu1 %v5844_v31  ;;  %v883_v58 = vadd.f32 %v6438_v27, %v6517_v13  ;;  %v891_v13 = vadd.f32 %v6438_v27, %v6545_v33  ;;  %v899_v33 = vadd.f32 %v6438_v27, %v6573_v56  ;;  %v907_v56 = vadd.f32 %v6438_v27, %v6601_v16 }
 0x151   : > { %v851_v21 = vadd.f32 %v6438_v27, %v850_v17  ;;  %988 = vadd.xlane.f32.xlu0 %v6666_v14  ;;  %v1076_v25 = vmul.f32 %v6666_v14, %v6666_v14  ;;  %3594 = vmatprep.subr.mxu1 %v8617_v1  ;;  %v1080_v17 = vmul.f32 %v6724_v8, %v6724_v8  ;;  %v6737_v18 = vmax.f32 %v867_v9, 0.0 }
 0x152   : > { %v5613_v28 = vpop.f32.mrf.mxu0  ;;  %v5649_v29 = vpop.f32.mrf.mxu1  ;;  %v6765_v32 = vmax.f32 %v883_v58, 0.0  ;;  %v6779_v41 = vmax.f32 %v891_v13, 0.0  ;;  %v6793_v53 = vmax.f32 %v899_v33, 0.0  ;;  %v920_v16 = vadd.f32 %v6438_v27, %v6652_v62 }
 0x153   : > { %1121 = vadd.xlane.f32.xlu1 %v1075_v24  ;;  %v6696_v42 = vmax.f32 %v851_v21, 0.0  ;;  %v1081_v20 = vmul.f32 %v6737_v18, %v6737_v18  ;;  %v1082_v21 = vmul.f32 %v6739_v19, %v6739_v19  ;;  %v6751_v24 = vmax.f32 %v875_v37, 0.0 }
 0x154   : > { %v855_v39 = vpop.f32.mrf.mxu0  ;;  %v1085_v38 = vmul.f32 %v6765_v32, %v6765_v32  ;;  %v1089_v57 = vmul.f32 %v6793_v53, %v6793_v53  ;;  %v6821_v9 = vmax.f32 %v920_v16, 0.0 }
 0x155   : > { %v856_v47 = vadd.f32 %v6438_v27, %v855_v39  ;;  %1123 = vadd.xlane.f32.xlu0 %v1076_v25  ;;  %v1077_v61 = vmul.f32 %v6696_v42, %v6696_v42  ;;  %v6753_v25 = vmax.f32 %v880_v48, 0.0  ;;  %v1083_v28 = vmul.f32 %v6751_v24, %v6751_v24 }
 0x156   : > { %v5616_v49 = vpop.f32.mrf.mxu0  ;;  %v1086_v39 = vmul.f32 %v6767_v36, %v6767_v36  ;;  %v1025_v62 = vsel %vm1024_vm1, %v6821_v9, 0.0 }
 0x157   : > { %v6702_v51 = vmax.f32 %v856_v47, 0.0  ;;  %990 = vadd.xlane.f32.xlu1 %v6696_v42  ;;  %v1084_v29 = vmul.f32 %v6753_v25, %v6753_v25  ;;  %v6781_v47 = vmax.f32 %v896_v22, 0.0  ;;  %v1087_v49 = vmul.f32 %v6779_v41, %v6779_v41 }
 0x158   : > { %v858_v54 = vpop.f32.mrf.mxu0 }
 0x159   : > { %v859_v60 = vadd.f32 %v6438_v27, %v858_v54  ;;  %992 = vadd.xlane.f32.xlu0 %v6702_v51  ;;  %v1078_v63 = vmul.f32 %v6702_v51, %v6702_v51  ;;  %v1088_v50 = vmul.f32 %v6781_v47, %v6781_v47  ;;  %v6795_v54 = vmax.f32 %v904_v45, 0.0 }
 0x15a   : > { %v5617_v0 = vpop.f32.mrf.mxu0  ;;  %v1094_v27 = vmul.f32 %v6821_v9, %v6821_v9 }
 0x15b   : > { %1125 = vadd.xlane.f32.xlu1 %v1077_v61  ;;  %v6722_v7 = vmax.f32 %v859_v60, 0.0  ;;  %v1090_v60 = vmul.f32 %v6795_v54, %v6795_v54  ;;  %v6807_v61 = vmax.f32 %v907_v56, 0.0 }
 0x15d   : > { %1127 = vadd.xlane.f32.xlu0 %v1078_v63  ;;  %v1079_v15 = vmul.f32 %v6722_v7, %v6722_v7  ;;  %v6809_v63 = vmax.f32 %v912_v5, 0.0  ;;  %v1091_v0 = vmul.f32 %v6807_v61, %v6807_v61 }
 0x15f   : > { %994 = vadd.xlane.f32.xlu1 %v6722_v7  ;;  %v1092_v31 = vmul.f32 %v6809_v63, %v6809_v63 }
 0x161   : > { %996 = vadd.xlane.f32.xlu0 %v6724_v8 }
 0x163   : > { %1129 = vadd.xlane.f32.xlu1 %v1079_v15  ;;  %v1159_v15 = vsel %vm1024_vm1, %v1094_v27, 0.0 }
 0x165   : > { %1131 = vadd.xlane.f32.xlu0 %v1080_v17 }
 0x167   : > { %998 = vadd.xlane.f32.xlu1 %v6737_v18 }
 0x169   : > { %1000 = vadd.xlane.f32.xlu0 %v6739_v19 }
 0x16b   : > { %1133 = vadd.xlane.f32.xlu1 %v1081_v20 }
 0x16d   : > { %1135 = vadd.xlane.f32.xlu0 %v1082_v21 }
 0x16f   : > { %1002 = vadd.xlane.f32.xlu1 %v6751_v24 }
 0x171   : > { %1004 = vadd.xlane.f32.xlu0 %v6753_v25 }
 0x173   : > { %1137 = vadd.xlane.f32.xlu1 %v1083_v28 }
 0x175   : > { %1139 = vadd.xlane.f32.xlu0 %v1084_v29 }
 0x177   : > { %1006 = vadd.xlane.f32.xlu1 %v6765_v32 }
 0x179   : > { %1008 = vadd.xlane.f32.xlu0 %v6767_v36 }
 0x17b   : > { %1141 = vadd.xlane.f32.xlu1 %v1085_v38 }
 0x17d   : > { %1143 = vadd.xlane.f32.xlu0 %v1086_v39 }
 0x17f   : > { %1010 = vadd.xlane.f32.xlu1 %v6779_v41 }
 0x181   : > { %1012 = vadd.xlane.f32.xlu0 %v6781_v47 }
 0x183   : > { %1145 = vadd.xlane.f32.xlu1 %v1087_v49 }
 0x185   : > { %1147 = vadd.xlane.f32.xlu0 %v1088_v50 }
 0x187   : > { %1014 = vadd.xlane.f32.xlu1 %v6793_v53 }
 0x189   : > { %1016 = vadd.xlane.f32.xlu0 %v6795_v54 }
 0x18b   : > { %1149 = vadd.xlane.f32.xlu1 %v1089_v57 }
 0x18d   : > { %1151 = vadd.xlane.f32.xlu0 %v1090_v60 }
 0x18f   : > { %1018 = vadd.xlane.f32.xlu1 %v6807_v61 }
 0x191   : > { %1020 = vadd.xlane.f32.xlu0 %v6809_v63 }
 0x193   : > { %1153 = vadd.xlane.f32.xlu1 %v1091_v0 }
 0x195   : > { %1155 = vadd.xlane.f32.xlu0 %v1092_v31 }
 0x197   : > { %1022 = vadd.xlane.f32.xlu1 %v6823_v10 }
 0x199   : > { %1026 = vadd.xlane.f32.xlu0 %v1025_v62 }
 0x19b   : > { %1157 = vadd.xlane.f32.xlu1 %v1093_v44 }
 0x19f   : > { %1160 = vadd.xlane.f32.xlu1 %v1159_v15 }
 0x1a2   : > { %v961_v17 = vpop.xlane.xlu0 %960 }
 0x1a3   : > { %v1029_v37 = vmul.f32 0.0078125, %v961_v17 }
 0x1a5   : > { %v1195_v20 = vmul.f32 %v1029_v37, %v1029_v37 }
 0x1a6   : > { %v1096_v48 = vpop.xlane.xlu0 %1095 }
 0x1a7   : > { %v1162_v21 = vmul.f32 0.0078125, %v1096_v48 }
 0x1a8   : > { %v1098_v58 = vpop.xlane.xlu1 %1097 }
 0x1a9   : > { %v1228_v2 = vsub.f32 %v1162_v21, %v1195_v20  ;;  %v1163_v39 = vmul.f32 0.0078125, %v1098_v58 }
 0x1aa   : > { %v963_v28 = vpop.xlane.xlu0 %962 }
 0x1ab   : > { %v1261_v29 = vmax.f32 %v1228_v2, 0.0  ;;  %v1030_v13 = vmul.f32 0.0078125, %v963_v28 }
 0x1ac   : > { %v965_v22 = vpop.xlane.xlu1 %964 }
 0x1ad   : > { %v1327_v38 = vadd.f32 1e-05, %v1261_v29  ;;  %v1196_v33 = vmul.f32 %v1030_v13, %v1030_v13  ;;  %v6831_v45 = vmul.f32 0.0078125, %v965_v22 }
 0x1ae   : > { %v1100_v49 = vpop.xlane.xlu0 %1099 }
 0x1af   : > { %v1229_v50 = vsub.f32 %v1163_v39, %v1196_v33  ;;  %v1197_v56 = vmul.f32 %v6831_v45, %v6831_v45  ;;  %5895 = vrsqrt.f32 %v1327_v38  ;;  %v1164_v5 = vmul.f32 0.0078125, %v1100_v49 }
 0x1b0   : > { %v967_v57 = vpop.xlane.xlu1 %966  ;;  %v8616_v33 = vlaneseq }
 0x1b1   : > { %v1262_v60 = vmax.f32 %v1229_v50, 0.0  ;;  %v6835_v16 = vmul.f32 0.0078125, %v967_v57  ;;  %v1230_v26 = vsub.f32 %v1164_v5, %v1197_v56 }
 0x1b2   : > { %v969_v0 = vpop.xlane.xlu0 %968 }
 0x1b3   : > { %v1328_v31 = vadd.f32 1e-05, %v1262_v60  ;;  %v6837_v62 = vmul.f32 0.0078125, %v969_v0  ;;  %v1263_v27 = vmax.f32 %v1230_v26, 0.0  ;;  %v1198_v15 = vmul.f32 %v6835_v16, %v6835_v16 }
 0x1b4   : > { %v1102_v44 = vpop.xlane.xlu1 %1101 }
 0x1b5   : > { %5897 = vrsqrt.f32 %v1328_v31  ;;  %v1199_v17 = vmul.f32 %v6837_v62, %v6837_v62  ;;  %v1165_v48 = vmul.f32 0.0078125, %v1102_v44  ;;  %v1329_v20 = vadd.f32 1e-05, %v1263_v27 }
 0x1b6   : > { %v1104_v21 = vpop.xlane.xlu0 %1103  ;;  %v1294_v31 = vsub.f32 %v6449_v35, %v1029_v37 }
 0x1b7   : > { %v1231_v58 = vsub.f32 %v1165_v48, %v1198_v15  ;;  %v1166_v2 = vmul.f32 0.0078125, %v1104_v21  ;;  %5899 = vrsqrt.f32 %v1329_v20  ;;  %v6853_v15 = vshrl.u32 %v8616_v33, 7 }
 0x1b8   : > { %v971_v28 = vpop.xlane.xlu1 %970 }
 0x1b9   : > { %v1264_v29 = vmax.f32 %v1231_v58, 0.0  ;;  %v1232_v22 = vsub.f32 %v1166_v2, %v1199_v17  ;;  %v6843_v38 = vmul.f32 0.0078125, %v971_v28  ;;  %8667 = vst [vmem:[#allocation15_spill] sm:$0xff] %v6853_v15  ;;  %v6858_v58 = vld [vmem:[%s8668_s3] ss:$0 sm:$0xff]  ;;  %v1295_v2 = vsub.f32 %v6461_v43, %v1030_v13 }
 0x1ba   : > { %v973_v39 = vpop.xlane.xlu0 %972  ;;  %vm1538_vm2 = vcmp.gt.s32.totalorder %v6853_v15, 0  ;;  %v6872_v13 = vld [vmem:[%s8669_s4] ss:$0 sm:$0xff] }
 0x1bb   : > { %v1330_v49 = vadd.f32 1e-05, %v1264_v29  ;;  %v1265_v50 = vmax.f32 %v1232_v22, 0.0  ;;  %v6845_v56 = vmul.f32 0.0078125, %v973_v39  ;;  %v1200_v26 = vmul.f32 %v6843_v38, %v6843_v38 }
 0x1bc   : > { %v1106_v5 = vpop.xlane.xlu1 %1105  ;;  %v5896_v57 = vpop.eup %5895 }
 0x1bd   : > { %5901 = vrsqrt.f32 %v1330_v49  ;;  %v1331_v60 = vadd.f32 1e-05, %v1265_v50  ;;  %v1167_v0 = vmul.f32 0.0078125, %v1106_v5  ;;  %v1201_v27 = vmul.f32 %v6845_v56, %v6845_v56 }
 0x1be   : > { %v1108_v44 = vpop.xlane.xlu0 %1107  ;;  %v1393_v20 = vmul.f32 %v5896_v57, %v1294_v31  ;;  %v1296_v57 = vsub.f32 %v6482_v55, %v6831_v45 }
 0x1bf   : > { %v1233_v17 = vsub.f32 %v1167_v0, %v1200_v26  ;;  %v1168_v48 = vmul.f32 0.0078125, %v1108_v44  ;;  %5903 = vrsqrt.f32 %v1331_v60  ;;  %v5256_v44 = vsel %vm1538_vm2, 1.0, %v8617_v1 }
 0x1c0   : > { %v975_v21 = vpop.xlane.xlu1 %974  ;;  %v1432_v5 = vmul.f32 %v6858_v58, %v1393_v20 }
 0x1c1   : > { %v1266_v35 = vmax.f32 %v1233_v17, 0.0  ;;  %v1234_v37 = vsub.f32 %v1168_v48, %v1201_v27  ;;  %v6861_v28 = vmul.f32 0.0078125, %v975_v21 }
 0x1c2   : > { %v5898_v29 = vpop.eup %5897  ;;  %v977_v22 = vpop.xlane.xlu0 %976 }
 0x1c3   : > { %v1394_v39 = vmul.f32 %v5898_v29, %v1295_v2  ;;  %v1332_v49 = vadd.f32 1e-05, %v1266_v35  ;;  %v1267_v50 = vmax.f32 %v1234_v37, 0.0  ;;  %v6867_v60 = vmul.f32 0.0078125, %v977_v22 }
 0x1c4   : > { %v1110_v26 = vpop.xlane.xlu1 %1109  ;;  %v5900_v43 = vpop.eup %5899  ;;  %v1202_v31 = vmul.f32 %v6861_v28, %v6861_v28  ;;  %v1471_v35 = vadd.f32 %v6872_v13, %v1432_v5  ;;  %v1297_v29 = vsub.f32 %v6499_v3, %v6835_v16  ;;  %v1298_v3 = vsub.f32 %v6514_v11, %v6837_v62 }
 0x1c5   : > { %v1433_v0 = vmul.f32 %v6858_v58, %v1394_v39  ;;  %5905 = vrsqrt.f32 %v1332_v49  ;;  %v1169_v27 = vmul.f32 0.0078125, %v1110_v26  ;;  %v1333_v17 = vadd.f32 1e-05, %v1267_v50 }
 0x1c6   : > { %v1203_v55 = vmul.f32 %v6867_v60, %v6867_v60  ;;  %v1112_v45 = vpop.xlane.xlu0 %1111  ;;  %v1395_v20 = vmul.f32 %v5900_v43, %v1296_v57  ;;  %v6171_v26 = vmov 1.0  }
 0x1c7   : > { %v1472_v48 = vadd.f32 %v6872_v13, %v1433_v0  ;;  %v1235_v21 = vsub.f32 %v1169_v27, %v1202_v31  ;;  %v1170_v2 = vmul.f32 0.0078125, %v1112_v45  ;;  %v1794_v50 = vpack.c.bf16 %v6171_v26, %v5256_v44 }
 0x1c8   : > { %v979_v37 = vpop.xlane.xlu1 %978  ;;  %5907 = vrsqrt.f32 %v1333_v17  ;;  %v1434_v57 = vmul.f32 %v6858_v58, %v1395_v20 }
 0x1c9   : > { %v1268_v22 = vmax.f32 %v1235_v21, 0.0  ;;  %v1236_v39 = vsub.f32 %v1170_v2, %v1203_v55  ;;  %v1711_v33 = vpack.c.bf16 %v1472_v48, %v1471_v35  ;;  %v6884_v1 = vmul.f32 0.0078125, %v979_v37 }
 0x1ca   : > { %v5902_v49 = vpop.eup %5901  ;;  %v981_v59 = vpop.xlane.xlu0 %980  ;;  %v1473_v2 = vadd.f32 %v6872_v13, %v1434_v57  ;;  %v1300_v57 = vsub.f32 %v6542_v30, %v6845_v56 }
 0x1cb   : > { %v1396_v43 = vmul.f32 %v5902_v49, %v1297_v29  ;;  %v1334_v0 = vadd.f32 1e-05, %v1268_v22  ;;  %v1269_v31 = vmax.f32 %v1236_v39, 0.0  ;;  %v6887_v5 = vmul.f32 0.0078125, %v981_v59 }
 0x1cc   : > { %v1114_v27 = vpop.xlane.xlu1 %1113  ;;  %v5904_v45 = vpop.eup %5903  ;;  %v6892_v17 = vmul.bf16 %v1794_v50, %v1711_v33  ;;  %v1204_v55 = vmul.f32 %v6884_v1, %v6884_v1  ;;  %v1299_v33 = vsub.f32 %v6533_v23, %v6843_v38 }
 0x1cd   : > { %v1435_v16 = vmul.f32 %v6858_v58, %v1396_v43  ;;  %5909 = vrsqrt.f32 %v1334_v0  ;;  %v1335_v44 = vadd.f32 1e-05, %v1269_v31  ;;  %v1205_v48 = vmul.f32 %v6887_v5, %v6887_v5 }
 0x1ce   : > { %v1171_v20 = vmul.f32 0.0078125, %v1114_v27  ;;  %v1116_v59 = vpop.xlane.xlu0 %1115  ;;  %v1397_v62 = vmul.f32 %v5904_v45, %v1298_v3  ;;  %v1832_v43 = vshll.u32 %v6892_v17, 16  ;;  %v1995_v27 = vrot.slane %v6892_v17, 1 }
 0x1cf   : > { %5911 = vrsqrt.f32 %v1335_v44  ;;  %v1172_v21 = vmul.f32 0.0078125, %v1116_v59  ;;  %v1474_v11 = vadd.f32 %v6872_v13, %v1435_v16 }
 0x1d0   : > { %v1237_v35 = vsub.f32 %v1171_v20, %v1204_v55  ;;  %v983_v37 = vpop.xlane.xlu1 %982  ;;  %v1436_v16 = vmul.f32 %v6858_v58, %v1397_v62  ;;  %v1830_v62 = vshrl.u32 %v6892_v17, 16 }
 0x1d1   : > { %v1238_v29 = vsub.f32 %v1172_v21, %v1205_v48  ;;  %v6902_v22 = vmul.f32 0.0078125, %v983_v37  ;;  %v1712_v39 = vpack.c.bf16 %v1474_v11, %v1473_v2  ;;  %v1834_v21 = vrot.slane %v1832_v43, 1 }
 0x1d2   : > { %v5906_v49 = vpop.eup %5905  ;;  %v1270_v26 = vmax.f32 %v1237_v35, 0.0  ;;  %v985_v50 = vpop.xlane.xlu0 %984 }
 0x1d3   : > { %v1398_v0 = vmul.f32 %v5906_v49, %v1299_v33  ;;  %v1271_v31 = vmax.f32 %v1238_v29, 0.0  ;;  %v6908_v23 = vmul.f32 0.0078125, %v985_v50  ;;  %v6910_v3 = vmul.bf16 1.0|1.0, %v1712_v39 }
 0x1d4   : > { %v1336_v45 = vadd.f32 1e-05, %v1270_v26  ;;  %v1118_v38 = vpop.xlane.xlu1 %1117  ;;  %v1206_v55 = vmul.f32 %v6902_v22, %v6902_v22  ;;  %v1475_v39 = vadd.f32 %v6872_v13, %v1436_v16  ;;  %v1302_v16 = vsub.f32 %v6567_v52, %v6867_v60 }
 0x1d5   : > { %v1337_v44 = vadd.f32 1e-05, %v1271_v31  ;;  %v1173_v48 = vmul.f32 0.0078125, %v1118_v38  ;;  %v1437_v20 = vmul.f32 %v6858_v58, %v1398_v0  ;;  %v1207_v30 = vmul.f32 %v6908_v23, %v6908_v23  ;;  %v5908_v2 = vpop.eup %5907 }
 0x1d6   : > { %5913 = vrsqrt.f32 %v1336_v45  ;;  %v1120_v56 = vpop.xlane.xlu0 %1119  ;;  %v1996_v59 = vrot.slane %v6910_v3, 1  ;;  %v1837_v37 = vshll.u32 %v6910_v3, 16  ;;  %v1399_v45 = vmul.f32 %v5908_v2, %v1300_v57 }
 0x1d7   : > { %v1239_v11 = vsub.f32 %v1173_v48, %v1206_v55  ;;  %v1174_v35 = vmul.f32 0.0078125, %v1120_v56  ;;  %5915 = vrsqrt.f32 %v1337_v44  ;;  %v1476_v49 = vadd.f32 %v6872_v13, %v1437_v20 }
 0x1d8   : > { %v1997_v33 = vsel %vm1994_vm3, %v1995_v27, %v1996_v59  ;;  %v987_v29 = vpop.xlane.xlu1 %986  ;;  %v1839_v43 = vrot.slane %v1837_v37, 1  ;;  %v1301_v38 = vsub.f32 %v6561_v46, %v6861_v28  ;;  %v1835_v55 = vor.u32 %v1834_v21, %v1830_v62 }
 0x1d9   : > { %v1272_v26 = vmax.f32 %v1239_v11, 0.0  ;;  %v1240_v50 = vsub.f32 %v1174_v35, %v1207_v30  ;;  %2570 = vmatmul.mubr.bf16.vlgmr.msra.gmra.mxu0 %v1997_v33  ;;  %v6924_v0 = vmul.f32 0.0078125, %v987_v29  ;;  %v8670_v48 = vmov 0  }
 0x1da   : > { %v5910_v31 = vpop.eup %5909  ;;  %v989_v44 = vpop.xlane.xlu0 %988  ;;  %2579 = vmatprep.mubr.bf16.mxu0 %v8670_v48  ;;  %v1713_v27 = vpack.c.bf16 %v1476_v49, %v1475_v39  ;;  %v1840_v35 = vsel %vm1828_vm4, %v1835_v55, %v1839_v43  ;;  %v1438_v33 = vmul.f32 %v6858_v58, %v1399_v45  ;;  %v1303_v45 = vsub.f32 %v6589_v6, %v6884_v1 }
 0x1db   : > { %v1338_v20 = vadd.f32 1e-05, %v1272_v26  ;;  %v1273_v56 = vmax.f32 %v1240_v50, 0.0  ;;  %v1400_v11 = vmul.f32 %v5910_v31, %v1301_v38  ;;  %v6932_v37 = vmul.f32 0.0078125, %v989_v44  ;;  %2376 = vmatprep.mubr.bf16.mxu1 %v1840_v35 }
 0x1dc   : > { %v5912_v30 = vpop.eup %5911  ;;  %v1122_v57 = vpop.xlane.xlu1 %1121  ;;  %v6934_v2 = vmul.bf16 1.0|1.0, %v1713_v27  ;;  %v1208_v28 = vmul.f32 %v6924_v0, %v6924_v0  ;;  %2377 = vmatmul.mubr.bf16.vlgmr.msra.gmra.mxu1 %v6892_v17  ;;  %v1841_v38 = vshrl.u32 %v6910_v3, 16 }
 0x1dd   : > { %5917 = vrsqrt.f32 %v1338_v20  ;;  %v1339_v46 = vadd.f32 1e-05, %v1273_v56  ;;  %v1175_v21 = vmul.f32 0.0078125, %v1122_v57  ;;  %v1209_v52 = vmul.f32 %v6932_v37, %v6932_v37 }
 0x1de   : > { %v1124_v60 = vpop.xlane.xlu0 %1123  ;;  %v1998_v62 = vrot.slane %v6934_v2, 1  ;;  %v1401_v29 = vmul.f32 %v5912_v30, %v1302_v16  ;;  %v1845_v26 = vshll.u32 %v6934_v2, 16  ;;  %v1439_v55 = vmul.f32 %v6858_v58, %v1400_v11 }
 0x1df   : > { %v1241_v39 = vsub.f32 %v1175_v21, %v1208_v28  ;;  %v1176_v49 = vmul.f32 0.0078125, %v1124_v60  ;;  %5919 = vrsqrt.f32 %v1339_v46  ;;  %v1843_v16 = vor.u32 %v1841_v38, %v1839_v43 }
 0x1e0   : > { %v1999_v50 = vsel %vm1994_vm3, %v1996_v59, %v1998_v62  ;;  %v991_v31 = vpop.xlane.xlu1 %990  ;;  %v1847_v20 = vrot.slane %v1845_v26, 1  ;;  %v1477_v59 = vadd.f32 %v6872_v13, %v1438_v33  ;;  %v1478_v30 = vadd.f32 %v6872_v13, %v1439_v55 }
 0x1e1   : > { %v1274_v44 = vmax.f32 %v1241_v39, 0.0  ;;  %v1242_v17 = vsub.f32 %v1176_v49, %v1209_v52  ;;  %2580 = vmatmul.mubr.bf16.gmra.mxu0 %v1999_v50  ;;  %v6947_v27 = vmul.f32 0.0078125, %v991_v31  ;;  %v1440_v46 = vmul.f32 %v6858_v58, %v1401_v29 }
 0x1e2   : > { %v993_v56 = vpop.xlane.xlu0 %992  ;;  %2589 = vmatprep.mubr.bf16.mxu0 %v8670_v48  ;;  %v1848_v21 = vsel %vm1828_vm4, %v1843_v16, %v1847_v20  ;;  %v1714_v1 = vpack.c.bf16 %v1478_v30, %v1477_v59  ;;  %v1304_v43 = vsub.f32 %v6595_v12, %v6887_v5  ;;  %v1305_v29 = vsub.f32 %v6623_v34, %v6902_v22 }
 0x1e3   : > { %v5914_v35 = vpop.eup %5913  ;;  %v1340_v57 = vadd.f32 1e-05, %v1274_v44  ;;  %v1275_v11 = vmax.f32 %v1242_v17, 0.0  ;;  %v6956_v52 = vmul.f32 0.0078125, %v993_v56  ;;  %v1210_v33 = vmul.f32 %v6947_v27, %v6947_v27  ;;  %2386 = vmatprep.mubr.bf16.mxu1 %v1848_v21 }
 0x1e4   : > { %v1402_v28 = vmul.f32 %v5914_v35, %v1303_v45  ;;  %v1126_v60 = vpop.xlane.xlu1 %1125  ;;  %v5916_v6 = vpop.eup %5915  ;;  %2387 = vmatmul.mubr.bf16.gmra.mxu1 %v6910_v3  ;;  %v6967_v31 = vmul.bf16 1.0|1.0, %v1714_v1  ;;  %v1849_v5 = vshrl.u32 %v6934_v2, 16  ;;  %v1479_v22 = vadd.f32 %v6872_v13, %v1440_v46 }
 0x1e5   : > { %5921 = vrsqrt.f32 %v1340_v57  ;;  %v1177_v39 = vmul.f32 0.0078125, %v1126_v60  ;;  %v1341_v49 = vadd.f32 1e-05, %v1275_v11  ;;  %v1211_v26 = vmul.f32 %v6956_v52, %v6956_v52 }
 0x1e6   : > { %v1128_v50 = vpop.xlane.xlu0 %1127  ;;  %v1441_v55 = vmul.f32 %v6858_v58, %v1402_v28  ;;  %v1403_v44 = vmul.f32 %v5916_v6, %v1304_v43  ;;  %v2000_v17 = vrot.slane %v6967_v31, 1  ;;  %v1853_v34 = vshll.u32 %v6967_v31, 16 }
 0x1e7   : > { %v1243_v38 = vsub.f32 %v1177_v39, %v1210_v33  ;;  %v1178_v12 = vmul.f32 0.0078125, %v1128_v50  ;;  %5923 = vrsqrt.f32 %v1341_v49  ;;  %v1851_v57 = vor.u32 %v1849_v5, %v1847_v20 }
 0x1e8   : > { %v995_v45 = vpop.xlane.xlu1 %994  ;;  %v1480_v59 = vadd.f32 %v6872_v13, %v1441_v55  ;;  %v2001_v35 = vsel %vm1994_vm3, %v1998_v62, %v2000_v17  ;;  %v1855_v11 = vrot.slane %v1853_v34, 1  ;;  %v1306_v46 = vsub.f32 %v6626_v40, %v6908_v23 }
 0x1e9   : > { %v1276_v16 = vmax.f32 %v1243_v38, 0.0  ;;  %v1244_v56 = vsub.f32 %v1178_v12, %v1211_v26  ;;  %v6974_v3 = vmul.f32 0.0078125, %v995_v45  ;;  %2590 = vmatmul.mubr.bf16.gmra.mxu0 %v2001_v35  ;;  %v1307_v26 = vsub.f32 %v6660_v4, %v6924_v0 }
 0x1ea   : > { %v5918_v30 = vpop.eup %5917  ;;  %v997_v28 = vpop.xlane.xlu0 %996  ;;  %v1856_v6 = vsel %vm1828_vm4, %v1851_v57, %v1855_v11  ;;  %2599 = vmatprep.mubr.bf16.mxu0 %v8670_v48  ;;  %v1715_v39 = vpack.c.bf16 %v1480_v59, %v1479_v22  ;;  %v1442_v38 = vmul.f32 %v6858_v58, %v1403_v44  ;;  %v1857_v55 = vshrl.u32 %v6967_v31, 16 }
 0x1eb   : > { %v1404_v21 = vmul.f32 %v5918_v30, %v1305_v29  ;;  %v1342_v60 = vadd.f32 1e-05, %v1276_v16  ;;  %v1277_v1 = vmax.f32 %v1244_v56, 0.0  ;;  %v6981_v43 = vmul.f32 0.0078125, %v997_v28  ;;  %2396 = vmatprep.mubr.bf16.mxu1 %v1856_v6 }
 0x1ec   : > { %v1130_v33 = vpop.xlane.xlu1 %1129  ;;  %v5920_v49 = vpop.eup %5919  ;;  %v1212_v20 = vmul.f32 %v6974_v3, %v6974_v3  ;;  %2397 = vmatmul.mubr.bf16.gmra.mxu1 %v6934_v2  ;;  %v6991_v50 = vmul.bf16 1.0|1.0, %v1715_v39  ;;  %v1859_v35 = vor.u32 %v1857_v55, %v1855_v11 }
 0x1ed   : > { %5925 = vrsqrt.f32 %v1342_v60  ;;  %v1343_v62 = vadd.f32 1e-05, %v1277_v1  ;;  %v1179_v29 = vmul.f32 0.0078125, %v1130_v33  ;;  %v1213_v40 = vmul.f32 %v6981_v43, %v6981_v43 }
 0x1ee   : > { %v1132_v23 = vpop.xlane.xlu0 %1131  ;;  %v1443_v45 = vmul.f32 %v6858_v58, %v1404_v21  ;;  %v1405_v34 = vmul.f32 %v5920_v49, %v1306_v46  ;;  %v2002_v4 = vrot.slane %v6991_v50, 1  ;;  %v1861_v22 = vshll.u32 %v6991_v50, 16 }
 0x1ef   : > { %v1245_v12 = vsub.f32 %v1179_v29, %v1212_v20  ;;  %v1180_v5 = vmul.f32 0.0078125, %v1132_v23  ;;  %5927 = vrsqrt.f32 %v1343_v62  ;;  %v1481_v21 = vadd.f32 %v6872_v13, %v1442_v38 }
 0x1f0   : > { %v999_v0 = vpop.xlane.xlu1 %998  ;;  %v1482_v59 = vadd.f32 %v6872_v13, %v1443_v45  ;;  %v2003_v30 = vsel %vm1994_vm3, %v2000_v17, %v2002_v4  ;;  %v1863_v57 = vrot.slane %v1861_v22, 1  ;;  %v1444_v62 = vmul.f32 %v6858_v58, %v1405_v34 }
 0x1f1   : > { %v1278_v16 = vmax.f32 %v1245_v12, 0.0  ;;  %v1246_v2 = vsub.f32 %v1180_v5, %v1213_v40  ;;  %v6998_v56 = vmul.f32 0.0078125, %v999_v0  ;;  %2600 = vmatmul.mubr.bf16.gmra.mxu0 %v2003_v30  ;;  %v1308_v29 = vsub.f32 %v6666_v14, %v6932_v37 }
 0x1f2   : > { %v5922_v44 = vpop.eup %5921  ;;  %v1001_v28 = vpop.xlane.xlu0 %1000  ;;  %v1864_v6 = vsel %vm1828_vm4, %v1859_v35, %v1863_v57  ;;  %2609 = vmatprep.mubr.bf16.mxu0 %v8670_v48  ;;  %v1716_v49 = vpack.c.bf16 %v1482_v59, %v1481_v21  ;;  %v1865_v45 = vshrl.u32 %v6991_v50, 16 }
 0x1f3   : > { %v1406_v60 = vmul.f32 %v5922_v44, %v1307_v26  ;;  %v1344_v1 = vadd.f32 1e-05, %v1278_v16  ;;  %v1279_v46 = vmax.f32 %v1246_v2, 0.0  ;;  %v7004_v33 = vmul.f32 0.0078125, %v1001_v28  ;;  %2406 = vmatprep.mubr.bf16.mxu1 %v1864_v6 }
 0x1f4   : > { %v1134_v39 = vpop.xlane.xlu1 %1133  ;;  %v1214_v11 = vmul.f32 %v6998_v56, %v6998_v56  ;;  %v1309_v26 = vsub.f32 %v6696_v42, %v6947_v27  ;;  %2407 = vmatmul.mubr.bf16.gmra.mxu1 %v6967_v31  ;;  %v7017_v38 = vmul.bf16 1.0|1.0, %v1716_v49  ;;  %v5924_v12 = vpop.eup %5923  ;;  %v1483_v27 = vadd.f32 %v6872_v13, %v1444_v62 }
 0x1f5   : > { %5929 = vrsqrt.f32 %v1344_v1  ;;  %v1345_v17 = vadd.f32 1e-05, %v1279_v46  ;;  %v1181_v20 = vmul.f32 0.0078125, %v1134_v39  ;;  %v1215_v40 = vmul.f32 %v7004_v33, %v7004_v33 }
 0x1f6   : > { %v1136_v23 = vpop.xlane.xlu0 %1135  ;;  %v1445_v34 = vmul.f32 %v6858_v58, %v1406_v60  ;;  %v2004_v14 = vrot.slane %v7017_v38, 1  ;;  %v1869_v42 = vshll.u32 %v7017_v38, 16  ;;  %v1407_v59 = vmul.f32 %v5924_v12, %v1308_v29 }
 0x1f7   : > { %v1247_v5 = vsub.f32 %v1181_v20, %v1214_v11  ;;  %v1182_v55 = vmul.f32 0.0078125, %v1136_v23  ;;  %5931 = vrsqrt.f32 %v1345_v17  ;;  %v1867_v30 = vor.u32 %v1865_v45, %v1863_v57 }
 0x1f8   : > { %v1003_v37 = vpop.xlane.xlu1 %1002  ;;  %v1484_v16 = vadd.f32 %v6872_v13, %v1445_v34  ;;  %v2005_v44 = vsel %vm1994_vm3, %v2002_v4, %v2004_v14  ;;  %v1871_v35 = vrot.slane %v1869_v42, 1  ;;  %v1310_v46 = vsub.f32 %v6702_v51, %v6956_v52 }
 0x1f9   : > { %v1280_v0 = vmax.f32 %v1247_v5, 0.0  ;;  %v1248_v31 = vsub.f32 %v1182_v55, %v1215_v40  ;;  %v7024_v22 = vmul.f32 0.0078125, %v1003_v37  ;;  %2610 = vmatmul.mubr.bf16.gmra.mxu0 %v2005_v44  ;;  %v1311_v20 = vsub.f32 %v6722_v7, %v6974_v3 }
 0x1fa   : > { %v5926_v2 = vpop.eup %5925  ;;  %v1005_v28 = vpop.xlane.xlu0 %1004  ;;  %v1872_v6 = vsel %vm1828_vm4, %v1867_v30, %v1871_v35  ;;  %2619 = vmatprep.mubr.bf16.mxu0 %v8670_v48  ;;  %v1717_v62 = vpack.c.bf16 %v1484_v16, %v1483_v27  ;;  %v1873_v12 = vshrl.u32 %v7017_v38, 16 }
 0x1fb   : > { %v1408_v21 = vmul.f32 %v5926_v2, %v1309_v26  ;;  %v1346_v60 = vadd.f32 1e-05, %v1280_v0  ;;  %v1281_v1 = vmax.f32 %v1248_v31, 0.0  ;;  %v7031_v39 = vmul.f32 0.0078125, %v1005_v28  ;;  %2416 = vmatprep.mubr.bf16.mxu1 %v1872_v6 }
 0x1fc   : > { %v1138_v49 = vpop.xlane.xlu1 %1137  ;;  %v5928_v17 = vpop.eup %5927  ;;  %v1216_v57 = vmul.f32 %v7024_v22, %v7024_v22  ;;  %2417 = vmatmul.mubr.bf16.gmra.mxu1 %v6991_v50  ;;  %v7041_v29 = vmul.bf16 1.0|1.0, %v1717_v62  ;;  %v1446_v26 = vmul.f32 %v6858_v58, %v1407_v59  ;;  %v1875_v31 = vor.u32 %v1873_v12, %v1871_v35 }
 0x1fd   : > { %5933 = vrsqrt.f32 %v1346_v60  ;;  %v1347_v4 = vadd.f32 1e-05, %v1281_v1  ;;  %v1183_v11 = vmul.f32 0.0078125, %v1138_v49  ;;  %v1217_v51 = vmul.f32 %v7031_v39, %v7031_v39 }
 0x1fe   : > { %v1140_v52 = vpop.xlane.xlu0 %1139  ;;  %v1447_v5 = vmul.f32 %v6858_v58, %v1408_v21  ;;  %v1409_v55 = vmul.f32 %v5928_v17, %v1310_v46  ;;  %v2006_v7 = vrot.slane %v7041_v29, 1  ;;  %v1877_v45 = vshll.u32 %v7041_v29, 16 }
 0x1ff   : > { %v1249_v40 = vsub.f32 %v1183_v11, %v1216_v57  ;;  %v1184_v23 = vmul.f32 0.0078125, %v1140_v52  ;;  %5935 = vrsqrt.f32 %v1347_v4  ;;  %v1485_v59 = vadd.f32 %v6872_v13, %v1446_v26 }
 0x200   : > { %v1007_v3 = vpop.xlane.xlu1 %1006  ;;  %v1486_v42 = vadd.f32 %v6872_v13, %v1447_v5  ;;  %v2007_v0 = vsel %vm1994_vm3, %v2004_v14, %v2006_v7  ;;  %v1879_v16 = vrot.slane %v1877_v45, 1  ;;  %v1448_v6 = vmul.f32 %v6858_v58, %v1409_v55 }
 0x201   : > { %v1282_v34 = vmax.f32 %v1249_v40, 0.0  ;;  %v1250_v50 = vsub.f32 %v1184_v23, %v1217_v51  ;;  %v7048_v37 = vmul.f32 0.0078125, %v1007_v3  ;;  %2620 = vmatmul.mubr.bf16.gmra.mxu0 %v2007_v0  ;;  %v1312_v35 = vsub.f32 %v6724_v8, %v6981_v43 }
 0x202   : > { %v5930_v27 = vpop.eup %5929  ;;  %v1009_v2 = vpop.xlane.xlu0 %1008  ;;  %v1880_v21 = vsel %vm1828_vm4, %v1875_v31, %v1879_v16  ;;  %2629 = vmatprep.mubr.bf16.mxu0 %v8670_v48  ;;  %v1718_v46 = vpack.c.bf16 %v1486_v42, %v1485_v59  ;;  %v1313_v17 = vsub.f32 %v6737_v18, %v6998_v56  ;;  %v1881_v43 = vshrl.u32 %v7041_v29, 16 }
 0x203   : > { %v1410_v44 = vmul.f32 %v5930_v27, %v1311_v20  ;;  %v1348_v30 = vadd.f32 1e-05, %v1282_v34  ;;  %v1283_v28 = vmax.f32 %v1250_v50, 0.0  ;;  %v7054_v60 = vmul.f32 0.0078125, %v1009_v2  ;;  %2426 = vmatprep.mubr.bf16.mxu1 %v1880_v21 }
 0x204   : > { %v1142_v1 = vpop.xlane.xlu1 %1141  ;;  %v5932_v14 = vpop.eup %5931  ;;  %v1218_v49 = vmul.f32 %v7048_v37, %v7048_v37  ;;  %2427 = vmatmul.mubr.bf16.gmra.mxu1 %v7017_v38  ;;  %v7067_v20 = vmul.bf16 1.0|1.0, %v1718_v46  ;;  %v1487_v56 = vadd.f32 %v6872_v13, %v1448_v6  ;;  %v1883_v34 = vor.u32 %v1881_v43, %v1879_v16 }
 0x205   : > { %5937 = vrsqrt.f32 %v1348_v30  ;;  %v1185_v62 = vmul.f32 0.0078125, %v1142_v1  ;;  %v1349_v4 = vadd.f32 1e-05, %v1283_v28  ;;  %v1219_v57 = vmul.f32 %v7054_v60, %v7054_v60 }
 0x206   : > { %v1144_v11 = vpop.xlane.xlu0 %1143  ;;  %v1449_v52 = vmul.f32 %v6858_v58, %v1410_v44  ;;  %v1411_v26 = vmul.f32 %v5932_v14, %v1312_v35  ;;  %v2008_v40 = vrot.slane %v7067_v20, 1  ;;  %v1885_v18 = vshll.u32 %v7067_v20, 16 }
 0x207   : > { %v1251_v51 = vsub.f32 %v1185_v62, %v1218_v49  ;;  %v1186_v8 = vmul.f32 0.0078125, %v1144_v11  ;;  %5939 = vrsqrt.f32 %v1349_v4  ;;  %v1314_v2 = vsub.f32 %v6739_v19, %v7004_v33 }
 0x208   : > { %v1011_v23 = vpop.xlane.xlu1 %1010  ;;  %v1488_v55 = vadd.f32 %v6872_v13, %v1449_v52  ;;  %v2009_v45 = vsel %vm1994_vm3, %v2006_v7, %v2008_v40  ;;  %v1887_v50 = vrot.slane %v1885_v18, 1  ;;  %v1315_v46 = vsub.f32 %v6751_v24, %v7024_v22 }
 0x209   : > { %v1284_v12 = vmax.f32 %v1251_v51, 0.0  ;;  %v1252_v5 = vsub.f32 %v1186_v8, %v1219_v57  ;;  %v7074_v38 = vmul.f32 0.0078125, %v1011_v23  ;;  %2630 = vmatmul.mubr.bf16.gmra.mxu0 %v2009_v45  ;;  %v1450_v14 = vmul.f32 %v6858_v58, %v1411_v26 }
 0x20a   : > { %v5934_v3 = vpop.eup %5933  ;;  %v1013_v42 = vpop.xlane.xlu0 %1012  ;;  %v1888_v59 = vsel %vm1828_vm4, %v1883_v34, %v1887_v50  ;;  %2639 = vmatprep.mubr.bf16.mxu0 %v8670_v48  ;;  %v1719_v28 = vpack.c.bf16 %v1488_v55, %v1487_v56  ;;  %v1889_v62 = vshrl.u32 %v7067_v20, 16 }
 0x20b   : > { %v1412_v27 = vmul.f32 %v5934_v3, %v1313_v17  ;;  %v1350_v0 = vadd.f32 1e-05, %v1284_v12  ;;  %v1285_v31 = vmax.f32 %v1252_v5, 0.0  ;;  %v7081_v44 = vmul.f32 0.0078125, %v1013_v42  ;;  %2436 = vmatprep.mubr.bf16.mxu1 %v1888_v59 }
 0x20c   : > { %v1146_v30 = vpop.xlane.xlu1 %1145  ;;  %v5936_v21 = vpop.eup %5935  ;;  %v1220_v16 = vmul.f32 %v7074_v38, %v7074_v38  ;;  %2437 = vmatmul.mubr.bf16.gmra.mxu1 %v7041_v29  ;;  %v7091_v6 = vmul.bf16 1.0|1.0, %v1719_v28  ;;  %v1891_v23 = vor.u32 %v1889_v62, %v1887_v50  ;;  %v1489_v56 = vadd.f32 %v6872_v13, %v1450_v14 }
 0x20d   : > { %5941 = vrsqrt.f32 %v1350_v0  ;;  %v1351_v7 = vadd.f32 1e-05, %v1285_v31  ;;  %v1187_v1 = vmul.f32 0.0078125, %v1146_v30  ;;  %v1221_v19 = vmul.f32 %v7081_v44, %v7081_v44 }
 0x20e   : > { %v1148_v33 = vpop.xlane.xlu0 %1147  ;;  %v1451_v17 = vmul.f32 %v6858_v58, %v1412_v27  ;;  %v1413_v4 = vmul.f32 %v5936_v21, %v1314_v2  ;;  %v2010_v24 = vrot.slane %v7091_v6, 1  ;;  %v1893_v57 = vshll.u32 %v7091_v6, 16 }
 0x20f   : > { %v1253_v35 = vsub.f32 %v1187_v1, %v1220_v16  ;;  %v1188_v49 = vmul.f32 0.0078125, %v1148_v33  ;;  %5943 = vrsqrt.f32 %v1351_v7  ;;  %v1316_v31 = vsub.f32 %v6753_v25, %v7031_v39 }
 0x210   : > { %v1015_v22 = vpop.xlane.xlu1 %1014  ;;  %v1490_v8 = vadd.f32 %v6872_v13, %v1451_v17  ;;  %v2011_v52 = vsel %vm1994_vm3, %v2008_v40, %v2010_v24  ;;  %v1895_v18 = vrot.slane %v1893_v57, 1  ;;  %v1452_v27 = vmul.f32 %v6858_v58, %v1413_v4 }
 0x211   : > { %v1286_v11 = vmax.f32 %v1253_v35, 0.0  ;;  %v1254_v29 = vsub.f32 %v1188_v49, %v1221_v19  ;;  %v7098_v51 = vmul.f32 0.0078125, %v1015_v22  ;;  %2640 = vmatmul.mubr.bf16.gmra.mxu0 %v2011_v52  ;;  %v1317_v2 = vsub.f32 %v6765_v32, %v7048_v37 }
 0x212   : > { %v5938_v43 = vpop.eup %5937  ;;  %v1017_v26 = vpop.xlane.xlu0 %1016  ;;  %v1896_v45 = vsel %vm1828_vm4, %v1891_v23, %v1895_v18  ;;  %2649 = vmatprep.mubr.bf16.mxu0 %v8670_v48  ;;  %v1720_v42 = vpack.c.bf16 %v1490_v8, %v1489_v56  ;;  %v1897_v1 = vshrl.u32 %v7091_v6, 16  ;;  %v1491_v37 = vadd.f32 %v6872_v13, %v1452_v27 }
 0x213   : > { %v1414_v12 = vmul.f32 %v5938_v43, %v1315_v46  ;;  %v1352_v5 = vadd.f32 1e-05, %v1286_v11  ;;  %v1287_v55 = vmax.f32 %v1254_v29, 0.0  ;;  %v7103_v3 = vmul.f32 0.0078125, %v1017_v26  ;;  %2446 = vmatprep.mubr.bf16.mxu1 %v1896_v45 }
 0x214   : > { %v1150_v34 = vpop.xlane.xlu1 %1149  ;;  %v1222_v50 = vmul.f32 %v7098_v51, %v7098_v51  ;;  %2447 = vmatmul.mubr.bf16.gmra.mxu1 %v7067_v20  ;;  %v7117_v28 = vmul.bf16 1.0|1.0, %v1720_v42  ;;  %v5940_v21 = vpop.eup %5939  ;;  %v1899_v4 = vor.u32 %v1897_v1, %v1895_v18  ;;  %v1318_v8 = vsub.f32 %v6767_v36, %v7054_v60 }
 0x215   : > { %5945 = vrsqrt.f32 %v1352_v5  ;;  %v1353_v40 = vadd.f32 1e-05, %v1287_v55  ;;  %v1189_v0 = vmul.f32 0.0078125, %v1150_v34  ;;  %v1223_v59 = vmul.f32 %v7103_v3, %v7103_v3 }
 0x216   : > { %v1152_v30 = vpop.xlane.xlu0 %1151  ;;  %v1453_v46 = vmul.f32 %v6858_v58, %v1414_v12  ;;  %v2012_v25 = vrot.slane %v7117_v28, 1  ;;  %v1901_v32 = vshll.u32 %v7117_v28, 16  ;;  %v1415_v49 = vmul.f32 %v5940_v21, %v1316_v31 }
 0x217   : > { %v1255_v7 = vsub.f32 %v1189_v0, %v1222_v50  ;;  %v1190_v16 = vmul.f32 0.0078125, %v1152_v30  ;;  %5947 = vrsqrt.f32 %v1353_v40  ;;  %v1319_v5 = vsub.f32 %v6779_v41, %v7074_v38 }
 0x218   : > { %v1019_v39 = vpop.xlane.xlu1 %1018  ;;  %v1492_v14 = vadd.f32 %v6872_v13, %v1453_v46  ;;  %v2013_v62 = vsel %vm1994_vm3, %v2010_v24, %v2012_v25  ;;  %v1903_v22 = vrot.slane %v1901_v32, 1  ;;  %v1454_v45 = vmul.f32 %v6858_v58, %v1415_v49 }
 0x219   : > { %v1288_v19 = vmax.f32 %v1255_v7, 0.0  ;;  %v1256_v20 = vsub.f32 %v1190_v16, %v1223_v59  ;;  %v7124_v33 = vmul.f32 0.0078125, %v1019_v39  ;;  %2650 = vmatmul.mubr.bf16.gmra.mxu0 %v2013_v62  ;;  %v1905_v41 = vshrl.u32 %v7117_v28, 16 }
 0x21a   : > { %v5942_v35 = vpop.eup %5941  ;;  %v1021_v17 = vpop.xlane.xlu0 %1020  ;;  %v1904_v52 = vsel %vm1828_vm4, %v1899_v4, %v1903_v22  ;;  %2659 = vmatprep.mubr.bf16.mxu0 %v8670_v48  ;;  %v1721_v23 = vpack.c.bf16 %v1492_v14, %v1491_v37  ;;  %v1493_v46 = vadd.f32 %v6872_v13, %v1454_v45 }
 0x21b   : > { %v1416_v57 = vmul.f32 %v5942_v35, %v1317_v2  ;;  %v1354_v11 = vadd.f32 1e-05, %v1288_v19  ;;  %v1289_v29 = vmax.f32 %v1256_v20, 0.0  ;;  %v7130_v43 = vmul.f32 0.0078125, %v1021_v17  ;;  %2456 = vmatprep.mubr.bf16.mxu1 %v1904_v52 }
 0x21c   : > { %v1154_v26 = vpop.xlane.xlu1 %1153  ;;  %v5944_v56 = vpop.eup %5943  ;;  %v1224_v18 = vmul.f32 %v7124_v33, %v7124_v33  ;;  %2457 = vmatmul.mubr.bf16.gmra.mxu1 %v7091_v6  ;;  %v7141_v55 = vmul.bf16 1.0|1.0, %v1721_v23  ;;  %v1907_v16 = vor.u32 %v1905_v41, %v1903_v22  ;;  %v1320_v22 = vsub.f32 %v6781_v47, %v7081_v44 }
 0x21d   : > { %5949 = vrsqrt.f32 %v1354_v11  ;;  %v1355_v24 = vadd.f32 1e-05, %v1289_v29  ;;  %v1191_v12 = vmul.f32 0.0078125, %v1154_v26  ;;  %v1225_v36 = vmul.f32 %v7130_v43, %v7130_v43 }
 0x21e   : > { %v1156_v60 = vpop.xlane.xlu0 %1155  ;;  %v1455_v27 = vmul.f32 %v6858_v58, %v1416_v57  ;;  %v1417_v40 = vmul.f32 %v5944_v56, %v1318_v8  ;;  %v2014_v50 = vrot.slane %v7141_v55, 1  ;;  %v1909_v38 = vshll.u32 %v7141_v55, 16 }
 0x21f   : > { %5951 = vrsqrt.f32 %v1355_v24  ;;  %v1257_v34 = vsub.f32 %v1191_v12, %v1224_v18  ;;  %v1192_v42 = vmul.f32 0.0078125, %v1156_v60  ;;  %v1321_v57 = vsub.f32 %v6793_v53, %v7098_v51 }
 0x220   : > { %v1023_v0 = vpop.xlane.xlu1 %1022  ;;  %v1494_v59 = vadd.f32 %v6872_v13, %v1455_v27  ;;  %v2015_v21 = vsel %vm1994_vm3, %v2012_v25, %v2014_v50  ;;  %v1911_v1 = vrot.slane %v1909_v38, 1  ;;  %v1456_v25 = vmul.f32 %v6858_v58, %v1417_v40  ;;  %v7177_v40 = vld [vmem:[%s8668_s3] ss:$0 sm:$0xff]  ;;  %s6059_s3 = scalar_lea.vmem %s6058_s2, 64 }
 0x221   : > { %v1290_v31 = vmax.f32 %v1257_v34, 0.0  ;;  %v1258_v6 = vsub.f32 %v1192_v42, %v1225_v36  ;;  %v7148_v2 = vmul.f32 0.0078125, %v1023_v0  ;;  %2660 = vmatmul.mubr.bf16.gmra.mxu0 %v2015_v21  ;;  %v1913_v24 = vshrl.u32 %v7141_v55, 16  ;;  %p6061_p1 = scmp.lt.s32.totalorder %s6059_s3, %s6053_s1 }
 0x222   : > { %v5946_v30 = vpop.eup %5945  ;;  %v1027_v7 = vpop.xlane.xlu0 %1026  ;;  %v1912_v20 = vsel %vm1828_vm4, %v1907_v16, %v1911_v1  ;;  %2669 = vmatprep.mubr.bf16.mxu0 %v8670_v48  ;;  %v1722_v35 = vpack.c.bf16 %v1494_v59, %v1493_v46  ;;  %v1495_v53 = vadd.f32 %v6872_v13, %v1456_v25 }
 0x223   : > { %v1418_v39 = vmul.f32 %v5946_v30, %v1319_v5  ;;  %v1356_v32 = vadd.f32 1e-05, %v1290_v31  ;;  %v1291_v37 = vmax.f32 %v1258_v6, 0.0  ;;  %v1226_v19 = vmul.f32 %v7148_v2, %v7148_v2  ;;  %2466 = vmatprep.mubr.bf16.mxu1 %v1912_v20  ;;  %p6062_p2 = por %p6061_p1, %p6060_p0 }
 0x224   : > { %v1158_v14 = vpop.xlane.xlu1 %1157  ;;  %v5948_v49 = vpop.eup %5947  ;;  %v7158_v17 = vmul.f32 0.0078125, %v1027_v7  ;;  %2467 = vmatmul.mubr.bf16.gmra.mxu1 %v7117_v28  ;;  %v1822_v11 = vmul.bf16 1.0|1.0, %v1722_v35  ;;  %v1915_v5 = vor.u32 %v1913_v24, %v1911_v1  ;;  %v1323_v7 = vsub.f32 %v6807_v61, %v7124_v33 }
 0x225   : > { %5953 = vrsqrt.f32 %v1356_v32  ;;  %v1357_v62 = vadd.f32 1e-05, %v1291_v37  ;;  %v1193_v4 = vmul.f32 0.0078125, %v1158_v14  ;;  %v1457_v52 = vmul.f32 %v6858_v58, %v1418_v39  ;;  %p6063_p3 = pnand %p6062_p2, %p6056_p13 }
 0x226   : > { %v1227_v29 = vmul.f32 %v7158_v17, %v7158_v17  ;;  %v1419_v26 = vmul.f32 %v5948_v49, %v1320_v22  ;;  %v2016_v23 = vrot.slane %v1822_v11, 1  ;;  %v1917_v18 = vshll.u32 %v1822_v11, 16 }
 0x227   : > { %5955 = vrsqrt.f32 %v1357_v62  ;;  %v1259_v8 = vsub.f32 %v1193_v4, %v1226_v19  ;;  %v1496_v51 = vadd.f32 %v6872_v13, %v1457_v52  ;;  %v1921_v38 = vshrl.u32 %v1822_v11, 16 }
 0x228   : > { %v1161_v56 = vpop.xlane.xlu1 %1160  ;;  %v2017_v12 = vsel %vm1994_vm3, %v2014_v50, %v2016_v23  ;;  %v1919_v36 = vrot.slane %v1917_v18, 1  ;;  %v1458_v13 = vmul.f32 %v7177_v40, %v1419_v26  ;;  %v1322_v50 = vsub.f32 %v6795_v54, %v7103_v3  ;;  %v6026_v54 = vld [vmem:[%s8669_s4] ss:$0 sm:$0xff] }
 0x229   : > { %v1292_v47 = vmax.f32 %v1259_v8, 0.0  ;;  %v1194_v44 = vmul.f32 0.0078125, %v1161_v56  ;;  %2670 = vmatmul.mubr.bf16.gmra.mxu0 %v2017_v12  ;;  %v1723_v34 = vpack.c.bf16 %v1496_v51, %v1495_v53  ;;  %v1324_v33 = vsub.f32 %v6809_v63, %v7130_v43 }
 0x22a   : > { %v5950_v28 = vpop.eup %5949  ;;  %v1920_v27 = vsel %vm1828_vm4, %v1915_v5, %v1919_v36  ;;  %2679 = vmatprep.mubr.bf16.mxu0 %v8670_v48  ;;  %v1497_v3 = vadd.f32 %v6026_v54, %v1458_v13  ;;  %v1537_v26 = vadd.s32 256, %v6853_v15  ;;  %v1325_v63 = vsub.f32 %v6823_v10, %v7148_v2 }
 0x22b   : > { %v1420_v60 = vmul.f32 %v5950_v28, %v1321_v57  ;;  %v1358_v45 = vadd.f32 1e-05, %v1292_v47  ;;  %v1260_v58 = vsub.f32 %v1194_v44, %v1227_v29  ;;  %2476 = vmatprep.mubr.bf16.mxu1 %v1920_v27  ;;  %v1823_v41 = vmul.bf16 1.0|1.0, %v1723_v34 }
 0x22c   : > { %v5952_v42 = vpop.eup %5951  ;;  %2477 = vmatmul.mubr.bf16.gmra.mxu1 %v7141_v55  ;;  %v1923_v55 = vor.u32 %v1921_v38, %v1919_v36  ;;  %v1326_v47 = vsub.f32 %v6821_v9, %v7158_v17  ;;  %vm1640_vm5 = vcmp.lt.s32.totalorder %v1537_v26, 257  ;;  %v7290_v26 = vsub.s32 1, %v6853_v15 }
 0x22d   : > { %5957 = vrsqrt.f32 %v1358_v45  ;;  %v1293_v0 = vmax.f32 %v1260_v58, 0.0  ;;  %v1459_v31 = vmul.f32 %v7177_v40, %v1420_v60  ;;  %v1421_v6 = vmul.f32 %v5952_v42, %v1322_v50 }
 0x22e   : > { %v2018_v30 = vrot.slane %v1823_v41, 1  ;;  %v1925_v21 = vshll.u32 %v1823_v41, 16  ;;  %v1929_v62 = vshrl.u32 %v1823_v41, 16  ;;  %v8671_v58 = vmov 0.0   ;;  %8672 = vst [vmem:[#allocation16_spill] sm:$0xff] %v7290_v26 }
 0x22f   : > { %v1359_v59 = vadd.f32 1e-05, %v1293_v0  ;;  %v1498_v16 = vadd.f32 %v6026_v54, %v1459_v31  ;;  %v1460_v20 = vmul.f32 %v7177_v40, %v1421_v6  ;;  %v5257_v34 = vsel %vm1640_vm5, 1.0, %v8671_v58 }
 0x230   : > { %v2019_v1 = vsel %vm1994_vm3, %v2016_v23, %v2018_v30  ;;  %v1927_v46 = vrot.slane %v1925_v21, 1  ;;  %v1810_v50 = vpack.c.bf16 %v5257_v34, %v5257_v34 }
 0x231   : > { %5959 = vrsqrt.f32 %v1359_v59  ;;  %v1724_v32 = vpack.c.bf16 %v1498_v16, %v1497_v3  ;;  %2680 = vmatmul.mubr.bf16.gmra.mxu0 %v2019_v1  ;;  %v1499_v22 = vadd.f32 %v6026_v54, %v1460_v20  ;;  %v3565_v20 = vld [vmem:[%s8607_s9 + $0x50] sm:$0xff] }
 0x232   : > { %v5954_v39 = vpop.eup %5953  ;;  %v1928_v19 = vsel %vm1828_vm4, %v1923_v55, %v1927_v46  ;;  %2689 = vmatprep.mubr.bf16.mxu0 %v8670_v48  ;;  %v1931_v8 = vor.u32 %v1929_v62, %v1927_v46  ;;  %v3558_v62 = vld [vmem:[%s8607_s9 + $0x18] sm:$0xff] }
 0x233   : > { %v1422_v37 = vmul.f32 %v5954_v39, %v1323_v7  ;;  %2486 = vmatprep.mubr.bf16.mxu1 %v1928_v19  ;;  %v1824_v14 = vmul.bf16 1.0|1.0, %v1724_v32  ;;  %v3570_v39 = vld [vmem:[%s8607_s9 + $0x78] sm:$0xff]  ;;  %v3568_v32 = vld [vmem:[%s8607_s9 + $0x68] sm:$0xff] }
 0x234   : > { %v5956_v61 = vpop.eup %5955  ;;  %2487 = vmatmul.mubr.bf16.gmra.mxu1 %v1822_v11  ;;  %v3566_v19 = vld [vmem:[%s8607_s9 + $0x58] sm:$0xff] }
 0x235   : > { %v1461_v35 = vmul.f32 %v7177_v40, %v1422_v37  ;;  %v1423_v25 = vmul.f32 %v5956_v61, %v1324_v33  ;;  %v2020_v49 = vrot.slane %v1824_v14, 1  ;;  %v1933_v4 = vshll.u32 %v1824_v14, 16  ;;  %3595 = vmatpush1.msra.mxu1 %v3570_v39  ;;  %v3567_v37 = vld [vmem:[%s8607_s9 + $0x60] sm:$0xff]  ;;  %v3564_v61 = vld [vmem:[%s8607_s9 + $0x48] sm:$0xff] }
 0x236   : > { %v1937_v53 = vshrl.u32 %v1824_v14, 16  ;;  %3596 = vmatprep.subr.mxu1 %v8671_v58  ;;  %v3563_v33 = vld [vmem:[%s8607_s9 + $0x40] sm:$0xff] }
 0x237   : > { %v1500_v57 = vadd.f32 %v6026_v54, %v1461_v35  ;;  %v2021_v29 = vsel %vm1994_vm3, %v2018_v30, %v2020_v49  ;;  %v1935_v52 = vrot.slane %v1933_v4, 1  ;;  %v1462_v11 = vmul.f32 %v7177_v40, %v1423_v25  ;;  %v3561_v35 = vld [vmem:[%s8607_s9 + $0x30] sm:$0xff]  ;;  %v3560_v25 = vld [vmem:[%s8607_s9 + $0x28] sm:$0xff] }
 0x238   : > { %v3557_v4 = vld [vmem:[%s8607_s9 + $0x10] sm:$0xff] }
 0x239   : > { %v1725_v43 = vpack.c.bf16 %v1500_v57, %v1499_v22  ;;  %v1936_v56 = vsel %vm1828_vm4, %v1931_v8, %v1935_v52  ;;  %2690 = vmatmul.mubr.bf16.gmra.mxu0 %v2021_v29  ;;  %v1501_v28 = vadd.f32 %v6026_v54, %v1462_v11  ;;  %v1939_v12 = vor.u32 %v1937_v53, %v1935_v52  ;;  %v3556_v22 = vld [vmem:[%s8607_s9 + $0x8] sm:$0xff]  ;;  %v3555_v57 = vld [vmem:[%s8607_s9] sm:$0xff]  ;;  %v3586_v8 = vld [vmem:[%s8607_s9 + $0xf8] sm:$0xff] }
 0x23a   : > { %v5958_v23 = vpop.eup %5957  ;;  %2496 = vmatprep.mubr.bf16.mxu1 %v1936_v56  ;;  %2699 = vmatprep.mubr.bf16.mxu0 %v8670_v48  ;;  %v7281_v29 = vsub.s32 0, %v6853_v15  ;;  %v2092_v52 = vld [vmem:[%s8604_s6] sm:$0x3]  ;;  %v3585_v56 = vld [vmem:[%s8607_s9 + $0xf0] sm:$0xff]  ;;  %v3584_v53 = vld [vmem:[%s8607_s9 + $0xe8] sm:$0xff] }
 0x23b   : > { %v1424_v24 = vmul.f32 %v5958_v23, %v1325_v63  ;;  %v1825_v18 = vmul.bf16 1.0|1.0, %v1725_v43  ;;  %v7300_v11 = vrot.slane %v2092_v52, %v7290_v26 }
 0x23c   : > { %2497 = vmatmul.mubr.bf16.gmra.mxu1 %v1823_v41  ;;  %v7294_v43 = vrot.slane %v2092_v52, %v7281_v29 }
 0x23d   : > { %v2022_v44 = vrot.slane %v1825_v18, 1  ;;  %v1941_v51 = vshll.u32 %v1825_v18, 16  ;;  %v1463_v10 = vmul.f32 %v7177_v40, %v1424_v24  ;;  %v1945_v41 = vshrl.u32 %v1825_v18, 16 }
 0x23e   : > { %v5960_v2 = vpop.eup %5959 }
 0x23f   : > { %v1943_v5 = vrot.slane %v1941_v51, 1  ;;  %v1502_v36 = vadd.f32 %v6026_v54, %v1463_v10  ;;  %v1425_v60 = vmul.f32 %v5960_v2, %v1326_v47  ;;  %v2023_v45 = vsel %vm1994_vm3, %v2020_v49, %v2022_v44  ;;  %v3559_v49 = vld [vmem:[%s8607_s9 + $0x20] sm:$0xff] }
 0x241   : > { %v1944_v9 = vsel %vm1828_vm4, %v1939_v12, %v1943_v5  ;;  %v1726_v17 = vpack.c.bf16 %v1502_v36, %v1501_v28  ;;  %v1464_v42 = vmul.f32 %v7177_v40, %v1425_v60  ;;  %2700 = vmatmul.mubr.bf16.gmra.mxu0 %v2023_v45  ;;  %v1947_v6 = vor.u32 %v1945_v41, %v1943_v5  ;;  %v3583_v12 = vld [vmem:[%s8607_s9 + $0xe0] sm:$0xff]  ;;  %v3582_v5 = vld [vmem:[%s8607_s9 + $0xd8] sm:$0xff] }
 0x242   : > { %2506 = vmatprep.mubr.bf16.mxu1 %v1944_v9  ;;  %2709 = vmatprep.mubr.bf16.mxu0 %v8670_v48 }
 0x243   : > { %v1826_v27 = vmul.bf16 1.0|1.0, %v1726_v17  ;;  %v1503_v13 = vadd.f32 %v6026_v54, %v1464_v42 }
 0x244   : > { %2507 = vmatmul.mubr.bf16.gmra.mxu1 %v1824_v14  ;;  %v3562_v14 = vld [vmem:[%s8607_s9 + $0x38] sm:$0xff] }
 0x245   : > { %v2024_v0 = vrot.slane %v1826_v27, 1  ;;  %v1949_v38 = vshll.u32 %v1826_v27, 16  ;;  %v1727_v31 = vpack.c.bf16 %v1503_v13, %v1503_v13  ;;  %v1953_v40 = vshrl.u32 %v1826_v27, 16 }
 0x247   : > { %v1951_v59 = vrot.slane %v1949_v38, 1  ;;  %v1827_v30 = vmul.bf16 %v1810_v50, %v1727_v31  ;;  %v2025_v21 = vsel %vm1994_vm3, %v2022_v44, %v2024_v0 }
 0x249   : > { %v1952_v7 = vsel %vm1828_vm4, %v1947_v6, %v1951_v59  ;;  %v1957_v3 = vshll.u32 %v1827_v30, 16  ;;  %2710 = vmatmul.mubr.bf16.gmra.mxu0 %v2025_v21  ;;  %v1955_v54 = vor.u32 %v1953_v40, %v1951_v59  ;;  %v2026_v55 = vrot.slane %v1827_v30, 1 }
 0x24a   : > { %2516 = vmatprep.mubr.bf16.mxu1 %v1952_v7  ;;  %2719 = vmatprep.mubr.bf16.mxu0 %v8670_v48  ;;  %v3569_v48 = vld [vmem:[%s8607_s9 + $0x70] sm:$0xff] }
 0x24b   : > { %v1959_v16 = vrot.slane %v1957_v3, 1  ;;  %v2027_v46 = vsel %vm1994_vm3, %v2024_v0, %v2026_v55  ;;  %3597 = vmatpush1.msra.mxu1 %v3569_v48  ;;  %v3581_v0 = vld [vmem:[%s8607_s9 + $0xd0] sm:$0xff]  ;;  %v3580_v3 = vld [vmem:[%s8607_s9 + $0xc8] sm:$0xff]  ;;  %v3578_v48 = vld [vmem:[%s8607_s9 + $0xb8] sm:$0xff] }
 0x24c   : > { %2517 = vmatmul.mubr.bf16.gmra.mxu1 %v1825_v18  ;;  %3598 = vmatprep.subr.mxu1 %v8671_v58 }
 0x24d   : > { %v1960_v1 = vsel %vm1828_vm4, %v1955_v54, %v1959_v16  ;;  %3599 = vmatpush1.msra.mxu1 %v3568_v32  ;;  %v3579_v54 = vld [vmem:[%s8607_s9 + $0xc0] sm:$0xff] }
 0x24e   : > { %2526 = vmatprep.mubr.bf16.mxu1 %v1960_v1  ;;  %3600 = vmatprep.subr.mxu1 %v8671_v58 }
 0x24f   : > { %3601 = vmatpush1.msra.mxu1 %v3567_v37 }
 0x250   : > { %3602 = vmatprep.subr.mxu1 %v8671_v58 }
 0x251   : > { %2720 = vmatmul.mubr.bf16.gmra.mxu0 %v2027_v46  ;;  %3603 = vmatpush1.msra.mxu1 %v3566_v19 }
 0x252   : > { %3604 = vmatprep.subr.mxu1 %v8671_v58 }
 0x253   : > { %3605 = vmatpush1.msra.mxu1 %v3565_v20 }
 0x254   : > { %2527 = vmatmul.mubr.bf16.gmra.mxu1 %v1826_v27  ;;  %3606 = vmatprep.subr.mxu1 %v8671_v58 }
 0x255   : > { %3607 = vmatpush1.msra.mxu1 %v3564_v61 }
 0x256   : > { %3608 = vmatprep.subr.mxu1 %v8671_v58 }
 0x257   : > { %3609 = vmatpush1.msra.mxu1 %v3563_v33 }
 0x258   : > { %3610 = vmatprep.subr.mxu1 %v8671_v58 }
 0x259   : > { %3611 = vmatpush1.msra.mxu1 %v3562_v14 }
 0x25a   : > { %3612 = vmatprep.subr.mxu1 %v8671_v58 }
 0x25b   : > { %3613 = vmatpush1.msra.mxu1 %v3561_v35 }
 0x25c   : > { %3614 = vmatprep.subr.mxu1 %v8671_v58 }
 0x25d   : > { %3615 = vmatpush1.msra.mxu1 %v3560_v25 }
 0x25e   : > { %3616 = vmatprep.subr.mxu1 %v8671_v58 }
 0x25f   : > { %3617 = vmatpush1.msra.mxu1 %v3559_v49 }
 0x260   : > { %3618 = vmatprep.subr.mxu1 %v8671_v58 }
 0x261   : > { %3619 = vmatpush1.msra.mxu1 %v3558_v62 }
 0x262   : > { %3620 = vmatprep.subr.mxu1 %v8671_v58 }
 0x263   : > { %3621 = vmatpush1.msra.mxu1 %v3557_v4 }
 0x264   : > { %3622 = vmatprep.subr.mxu1 %v8671_v58 }
 0x265   : > { %3623 = vmatpush1.msra.mxu1 %v3556_v22 }
 0x266   : > { %3624 = vmatprep.subr.mxu1 %v8671_v58 }
 0x267   : > { %3625 = vmatpush1.msra.mxu1 %v3555_v57 }
 0x268   : > { %3626 = vmatprep.subr.mxu1 %v8671_v58 }
 0x269   : > { %3627 = vmatpush2.msra.mxu1 %v3586_v8 }
 0x26a   : > { %3628 = vmatprep.subr.mxu1 %v8671_v58 }
 0x26b   : > { %3629 = vmatpush2.msra.mxu1 %v3585_v56 }
 0x26c   : > { %3630 = vmatprep.subr.mxu1 %v8671_v58 }
 0x26d   : > { %3631 = vmatpush2.msra.mxu1 %v3584_v53 }
 0x26e   : > { %3632 = vmatprep.subr.mxu1 %v8671_v58 }
 0x26f   : > { %3633 = vmatpush2.msra.mxu1 %v3583_v12 }
 0x270   : > { %3634 = vmatprep.subr.mxu1 %v8671_v58 }
 0x271   : > { %3635 = vmatpush2.msra.mxu1 %v3582_v5 }
 0x272   : > { %3636 = vmatprep.subr.mxu1 %v8671_v58 }
 0x273   : > { %3637 = vmatpush2.msra.mxu1 %v3581_v0 }
 0x274   : > { %3638 = vmatprep.subr.mxu1 %v8671_v58 }
 0x275   : > { %3639 = vmatpush2.msra.mxu1 %v3580_v3 }
 0x276   : > { %3640 = vmatprep.subr.mxu1 %v8671_v58 }
 0x277   : > { %3641 = vmatpush2.msra.mxu1 %v3579_v54 }
 0x278   : > { %3642 = vmatprep.subr.mxu1 %v8671_v58 }
 0x279   : > { %3643 = vmatpush2.msra.mxu1 %v3578_v48 }
 0x27a   : > { %3644 = vmatprep.subr.mxu1 %v8671_v58 }
 0x299   : > { %v2571_v63 = vpop.f32.mrf.mxu0 }
 0x29b   : > { %v2573_v23 = vpop.f32.mrf.mxu0 }
 0x29c   : > { %v2378_v18 = vpop.f32.mrf.mxu1 }
 0x29d   : > { %v2575_v24 = vpop.f32.mrf.mxu0  ;;  %v2379_v47 = vadd.f32 %v2378_v18, %v7294_v43 }
 0x29e   : > { %v2380_v51 = vpop.f32.mrf.mxu1 }
 0x29f   : > { %v2577_v44 = vpop.f32.mrf.mxu0  ;;  %v2572_v10 = vadd.f32 %v2571_v63, %v2379_v47  ;;  %v2381_v2 = vadd.f32 %v2380_v51, %v7300_v11 }
 0x2a0   : > { %v2382_v36 = vpop.f32.mrf.mxu1 }
 0x2a1   : > { %v2581_v28 = vpop.f32.mrf.mxu0  ;;  %v2574_v60 = vadd.f32 %v2573_v23, %v2381_v2  ;;  %v2383_v45 = vadd.f32 %v2382_v36, %v7294_v43  ;;  %v7317_v9 = vmax.f32 %v2572_v10, 0.0 }
 0x2a2   : > { %v2384_v17 = vpop.f32.mrf.mxu1 }
 0x2a3   : > { %v2583_v34 = vpop.f32.mrf.mxu0  ;;  %v7319_v42 = vmax.f32 %v2574_v60, 0.0  ;;  %v2576_v27 = vadd.f32 %v2575_v24, %v2383_v45  ;;  %v2385_v13 = vadd.f32 %v2384_v17, %v7300_v11  ;;  %v2925_v7 = vmul.f32 %v7317_v9, %v7317_v9 }
 0x2a4   : > { %v2388_v41 = vpop.f32.mrf.mxu1 }
 0x2a5   : > { %v2585_v50 = vpop.f32.mrf.mxu0  ;;  %v2578_v38 = vadd.f32 %v2577_v44, %v2385_v13  ;;  %v2389_v31 = vadd.f32 %v2388_v41, %v7294_v43  ;;  %v2796_v59 = vadd.f32 %v7319_v42, %v7317_v9  ;;  %v7330_v30 = vmax.f32 %v2576_v27, 0.0 }
 0x2a6   : > { %v2390_v21 = vpop.f32.mrf.mxu1  ;;  %v2926_v40 = vmul.f32 %v7319_v42, %v7319_v42 }
 0x2a7   : > { %v2587_v6 = vpop.f32.mrf.mxu0  ;;  %v7342_v16 = vmax.f32 %v2578_v38, 0.0  ;;  %v2582_v1 = vadd.f32 %v2581_v28, %v2389_v31  ;;  %v2391_v55 = vadd.f32 %v2390_v21, %v7300_v11  ;;  %2797 = vadd.xlane.f32.xlu0 %v2796_v59  ;;  %v2927_v14 = vmul.f32 %v7330_v30, %v7330_v30 }
 0x2a8   : > { %v2392_v46 = vpop.f32.mrf.mxu1  ;;  %v2989_v39 = vadd.f32 %v2926_v40, %v2925_v7 }
 0x2a9   : > { %v2584_v32 = vadd.f32 %v2583_v34, %v2391_v55  ;;  %v2393_v37 = vadd.f32 %v2392_v46, %v7294_v43  ;;  %v2591_v19 = vpop.f32.mrf.mxu0  ;;  %v2799_v20 = vadd.f32 %v7342_v16, %v7330_v30  ;;  %v7352_v61 = vmax.f32 %v2582_v1, 0.0 }
 0x2aa   : > { %2990 = vadd.xlane.f32.xlu1 %v2989_v39  ;;  %v2394_v33 = vpop.f32.mrf.mxu1  ;;  %v2928_v35 = vmul.f32 %v7342_v16, %v7342_v16 }
 0x2ab   : > { %v7359_v25 = vmax.f32 %v2584_v32, 0.0  ;;  %v2586_v49 = vadd.f32 %v2585_v50, %v2393_v37  ;;  %v2395_v62 = vadd.f32 %v2394_v33, %v7300_v11  ;;  %v2593_v4 = vpop.f32.mrf.mxu0  ;;  %2800 = vadd.xlane.f32.xlu0 %v2799_v20  ;;  %v2929_v18 = vmul.f32 %v7352_v61, %v7352_v61 }
 0x2ac   : > { %v2398_v22 = vpop.f32.mrf.mxu1  ;;  %v2992_v57 = vadd.f32 %v2928_v35, %v2927_v14 }
 0x2ad   : > { %v2588_v8 = vadd.f32 %v2587_v6, %v2395_v62  ;;  %v2399_v52 = vadd.f32 %v2398_v22, %v7294_v43  ;;  %v2595_v63 = vpop.f32.mrf.mxu0  ;;  %v2802_v23 = vadd.f32 %v7359_v25, %v7352_v61  ;;  %v7366_v56 = vmax.f32 %v2586_v49, 0.0 }
 0x2ae   : > { %2993 = vadd.xlane.f32.xlu1 %v2992_v57  ;;  %v2400_v24 = vpop.f32.mrf.mxu1  ;;  %v2930_v47 = vmul.f32 %v7359_v25, %v7359_v25 }
 0x2af   : > { %v7372_v44 = vmax.f32 %v2588_v8, 0.0  ;;  %v2592_v53 = vadd.f32 %v2591_v19, %v2399_v52  ;;  %v2401_v51 = vadd.f32 %v2400_v24, %v7300_v11  ;;  %v2597_v10 = vpop.f32.mrf.mxu0  ;;  %2803 = vadd.xlane.f32.xlu0 %v2802_v23  ;;  %v2931_v17 = vmul.f32 %v7366_v56, %v7366_v56  ;;  %v3577_v24 = vld [vmem:[%s8607_s9 + $0xb0] sm:$0xff] }
 0x2b0   : > { %v2402_v2 = vpop.f32.mrf.mxu1  ;;  %v2995_v28 = vadd.f32 %v2930_v47, %v2929_v18  ;;  %3645 = vmatpush2.msra.mxu1 %v3577_v24 }
 0x2b1   : > { %v2594_v12 = vadd.f32 %v2593_v4, %v2401_v51  ;;  %v2403_v5 = vadd.f32 %v2402_v2, %v7294_v43  ;;  %v2601_v36 = vpop.f32.mrf.mxu0  ;;  %v2805_v60 = vadd.f32 %v7372_v44, %v7366_v56  ;;  %v7378_v45 = vmax.f32 %v2592_v53, 0.0  ;;  %3646 = vmatprep.subr.mxu1 %v8671_v58 }
 0x2b2   : > { %2996 = vadd.xlane.f32.xlu1 %v2995_v28  ;;  %v2404_v34 = vpop.f32.mrf.mxu1  ;;  %v2932_v27 = vmul.f32 %v7372_v44, %v7372_v44 }
 0x2b3   : > { %v7384_v13 = vmax.f32 %v2594_v12, 0.0  ;;  %v2596_v50 = vadd.f32 %v2595_v63, %v2403_v5  ;;  %v2405_v0 = vadd.f32 %v2404_v34, %v7300_v11  ;;  %v2603_v41 = vpop.f32.mrf.mxu0  ;;  %2806 = vadd.xlane.f32.xlu0 %v2805_v60  ;;  %v2933_v54 = vmul.f32 %v7378_v45, %v7378_v45 }
 0x2b4   : > { %v2408_v38 = vpop.f32.mrf.mxu1  ;;  %v2998_v31 = vadd.f32 %v2932_v27, %v2931_v17 }
 0x2b5   : > { %v2598_v6 = vadd.f32 %v2597_v10, %v2405_v0  ;;  %v2409_v59 = vadd.f32 %v2408_v38, %v7294_v43  ;;  %v2605_v21 = vpop.f32.mrf.mxu0  ;;  %v2808_v7 = vadd.f32 %v7384_v13, %v7378_v45  ;;  %v7390_v40 = vmax.f32 %v2596_v50, 0.0  ;;  %v3576_v50 = vld [vmem:[%s8607_s9 + $0xa8] sm:$0xff] }
 0x2b6   : > { %2999 = vadd.xlane.f32.xlu1 %v2998_v31  ;;  %v2410_v3 = vpop.f32.mrf.mxu1  ;;  %v2934_v1 = vmul.f32 %v7384_v13, %v7384_v13  ;;  %3647 = vmatpush2.msra.mxu1 %v3576_v50 }
 0x2b7   : > { %v7396_v55 = vmax.f32 %v2598_v6, 0.0  ;;  %v2602_v46 = vadd.f32 %v2601_v36, %v2409_v59  ;;  %v2411_v39 = vadd.f32 %v2410_v3, %v7300_v11  ;;  %v2607_v48 = vpop.f32.mrf.mxu0  ;;  %2809 = vadd.xlane.f32.xlu0 %v2808_v7  ;;  %v2935_v62 = vmul.f32 %v7390_v40, %v7390_v40  ;;  %3648 = vmatprep.subr.mxu1 %v8671_v58 }
 0x2b8   : > { %v2412_v32 = vpop.f32.mrf.mxu1  ;;  %v3001_v37 = vadd.f32 %v2934_v1, %v2933_v54 }
 0x2b9   : > { %v2604_v19 = vadd.f32 %v2603_v41, %v2411_v39  ;;  %v2413_v20 = vadd.f32 %v2412_v32, %v7294_v43  ;;  %v2611_v33 = vpop.f32.mrf.mxu0  ;;  %v2811_v14 = vadd.f32 %v7396_v55, %v7390_v40  ;;  %v7402_v35 = vmax.f32 %v2602_v46, 0.0  ;;  %v3575_v32 = vld [vmem:[%s8607_s9 + $0xa0] sm:$0xff] }
 0x2ba   : > { %3002 = vadd.xlane.f32.xlu1 %v3001_v37  ;;  %v2414_v49 = vpop.f32.mrf.mxu1  ;;  %v2936_v4 = vmul.f32 %v7396_v55, %v7396_v55  ;;  %3649 = vmatpush2.msra.mxu1 %v3575_v32 }
 0x2bb   : > { %v7408_v22 = vmax.f32 %v2604_v19, 0.0  ;;  %v2606_v57 = vadd.f32 %v2605_v21, %v2413_v20  ;;  %v2415_v8 = vadd.f32 %v2414_v49, %v7300_v11  ;;  %v2613_v52 = vpop.f32.mrf.mxu0  ;;  %2812 = vadd.xlane.f32.xlu0 %v2811_v14  ;;  %v2937_v28 = vmul.f32 %v7402_v35, %v7402_v35  ;;  %3650 = vmatprep.subr.mxu1 %v8671_v58 }
 0x2bc   : > { %v2418_v63 = vpop.f32.mrf.mxu1  ;;  %v3004_v23 = vadd.f32 %v2936_v4, %v2935_v62 }
 0x2bd   : > { %v2608_v18 = vadd.f32 %v2607_v48, %v2415_v8  ;;  %v2419_v47 = vadd.f32 %v2418_v63, %v7294_v43  ;;  %v2615_v53 = vpop.f32.mrf.mxu0  ;;  %v2814_v51 = vadd.f32 %v7408_v22, %v7402_v35  ;;  %v7417_v10 = vmax.f32 %v2606_v57, 0.0 }
 0x2be   : > { %3005 = vadd.xlane.f32.xlu1 %v3004_v23  ;;  %v2420_v2 = vpop.f32.mrf.mxu1  ;;  %v2938_v12 = vmul.f32 %v7408_v22, %v7408_v22 }
 0x2bf   : > { %v7424_v5 = vmax.f32 %v2608_v18, 0.0  ;;  %v2612_v36 = vadd.f32 %v2611_v33, %v2419_v47  ;;  %v2421_v60 = vadd.f32 %v2420_v2, %v7300_v11  ;;  %v2617_v34 = vpop.f32.mrf.mxu0  ;;  %2815 = vadd.xlane.f32.xlu0 %v2814_v51  ;;  %v2939_v21 = vmul.f32 %v7417_v10, %v7417_v10  ;;  %v3574_v18 = vld [vmem:[%s8607_s9 + $0x98] sm:$0xff] }
 0x2c0   : > { %v2422_v17 = vpop.f32.mrf.mxu1  ;;  %v3007_v27 = vadd.f32 %v2938_v12, %v2937_v28  ;;  %3651 = vmatpush2.msra.mxu1 %v3574_v18 }
 0x2c1   : > { %v2614_v0 = vadd.f32 %v2613_v52, %v2421_v60  ;;  %v2423_v41 = vadd.f32 %v2422_v17, %v7294_v43  ;;  %v2621_v38 = vpop.f32.mrf.mxu0  ;;  %v2817_v31 = vadd.f32 %v7424_v5, %v7417_v10  ;;  %v7433_v6 = vmax.f32 %v2612_v36, 0.0  ;;  %3652 = vmatprep.subr.mxu1 %v8671_v58 }
 0x2c2   : > { %3008 = vadd.xlane.f32.xlu1 %v3007_v27  ;;  %v2424_v59 = vpop.f32.mrf.mxu1  ;;  %v2940_v7 = vmul.f32 %v7424_v5, %v7424_v5 }
 0x2c3   : > { %v7440_v3 = vmax.f32 %v2614_v0, 0.0  ;;  %v2616_v54 = vadd.f32 %v2615_v53, %v2423_v41  ;;  %v2425_v1 = vadd.f32 %v2424_v59, %v7300_v11  ;;  %v2623_v46 = vpop.f32.mrf.mxu0  ;;  %2818 = vadd.xlane.f32.xlu0 %v2817_v31  ;;  %v2941_v62 = vmul.f32 %v7433_v6, %v7433_v6 }
 0x2c4   : > { %v2428_v39 = vpop.f32.mrf.mxu1  ;;  %v3010_v48 = vadd.f32 %v2940_v7, %v2939_v21 }
 0x2c5   : > { %v2618_v37 = vadd.f32 %v2617_v34, %v2425_v1  ;;  %v2429_v19 = vadd.f32 %v2428_v39, %v7294_v43  ;;  %v2625_v20 = vpop.f32.mrf.mxu0  ;;  %v2820_v33 = vadd.f32 %v7440_v3, %v7433_v6  ;;  %v7449_v14 = vmax.f32 %v2616_v54, 0.0 }
 0x2c6   : > { %3011 = vadd.xlane.f32.xlu1 %v3010_v48  ;;  %v2430_v49 = vpop.f32.mrf.mxu1  ;;  %v2942_v4 = vmul.f32 %v7440_v3, %v7440_v3  ;;  %v3572_v48 = vld [vmem:[%s8607_s9 + $0x88] sm:$0xff] }
 0x2c7   : > { %v7456_v57 = vmax.f32 %v2618_v37, 0.0  ;;  %v2622_v8 = vadd.f32 %v2621_v38, %v2429_v19  ;;  %v2431_v52 = vadd.f32 %v2430_v49, %v7300_v11  ;;  %v2627_v63 = vpop.f32.mrf.mxu0  ;;  %2821 = vadd.xlane.f32.xlu0 %v2820_v33  ;;  %v2943_v36 = vmul.f32 %v7449_v14, %v7449_v14  ;;  %v3573_v38 = vld [vmem:[%s8607_s9 + $0x90] sm:$0xff] }
 0x2c8   : > { %v2432_v23 = vpop.f32.mrf.mxu1  ;;  %v3013_v24 = vadd.f32 %v2942_v4, %v2941_v62  ;;  %3653 = vmatpush2.msra.mxu1 %v3573_v38  ;;  %v3571_v62 = vld [vmem:[%s8607_s9 + $0x80] sm:$0xff] }
 0x2c9   : > { %v2624_v47 = vadd.f32 %v2623_v46, %v2431_v52  ;;  %v2433_v53 = vadd.f32 %v2432_v23, %v7294_v43  ;;  %v2631_v51 = vpop.f32.mrf.mxu0  ;;  %v2823_v2 = vadd.f32 %v7456_v57, %v7449_v14  ;;  %v7465_v28 = vmax.f32 %v2622_v8, 0.0  ;;  %3654 = vmatprep.subr.mxu1 %v8671_v58 }
 0x2ca   : > { %3014 = vadd.xlane.f32.xlu1 %v3013_v24  ;;  %v2434_v12 = vpop.f32.mrf.mxu1  ;;  %v2944_v60 = vmul.f32 %v7456_v57, %v7456_v57  ;;  %3655 = vmatpush2.msra.mxu1 %v3572_v48 }
 0x2cb   : > { %v7472_v34 = vmax.f32 %v2624_v47, 0.0  ;;  %v2626_v17 = vadd.f32 %v2625_v20, %v2433_v53  ;;  %v2435_v27 = vadd.f32 %v2434_v12, %v7300_v11  ;;  %v2633_v50 = vpop.f32.mrf.mxu0  ;;  %2824 = vadd.xlane.f32.xlu0 %v2823_v2  ;;  %v2945_v46 = vmul.f32 %v7465_v28, %v7465_v28  ;;  %3656 = vmatprep.subr.mxu1 %v8671_v58 }
 0x2cc   : > { %v2438_v0 = vpop.f32.mrf.mxu1  ;;  %v3016_v41 = vadd.f32 %v2944_v60, %v2943_v36  ;;  %3657 = vmatpush2.msra.mxu1 %v3571_v62 }
 0x2cd   : > { %v2628_v31 = vadd.f32 %v2627_v63, %v2435_v27  ;;  %v2439_v59 = vadd.f32 %v2438_v0, %v7294_v43  ;;  %v2635_v21 = vpop.f32.mrf.mxu0  ;;  %v2826_v7 = vadd.f32 %v7472_v34, %v7465_v28  ;;  %v7481_v54 = vmax.f32 %v2626_v17, 0.0 }
 0x2ce   : > { %3017 = vadd.xlane.f32.xlu1 %v3016_v41  ;;  %v2440_v1 = vpop.f32.mrf.mxu1  ;;  %v2946_v39 = vmul.f32 %v7472_v34, %v7472_v34 }
 0x2cf   : > { %v7491_v32 = vmax.f32 %v2628_v31, 0.0  ;;  %v2632_v37 = vadd.f32 %v2631_v51, %v2439_v59  ;;  %v2441_v19 = vadd.f32 %v2440_v1, %v7300_v11  ;;  %v2637_v20 = vpop.f32.mrf.mxu0  ;;  %2827 = vadd.xlane.f32.xlu0 %v2826_v7  ;;  %v2947_v18 = vmul.f32 %v7481_v54, %v7481_v54 }
 0x2d0   : > { %v2442_v33 = vpop.f32.mrf.mxu1  ;;  %v3019_v49 = vadd.f32 %v2946_v39, %v2945_v46 }
 0x2d1   : > { %v2634_v4 = vadd.f32 %v2633_v50, %v2441_v19  ;;  %v2443_v8 = vadd.f32 %v2442_v33, %v7294_v43  ;;  %v2641_v52 = vpop.f32.mrf.mxu0  ;;  %v2829_v63 = vadd.f32 %v7491_v32, %v7481_v54  ;;  %v7501_v23 = vmax.f32 %v2632_v37, 0.0 }
 0x2d2   : > { %3020 = vadd.xlane.f32.xlu1 %v3019_v49  ;;  %v2444_v24 = vpop.f32.mrf.mxu1  ;;  %v2948_v58 = vmul.f32 %v7491_v32, %v7491_v32 }
 0x2d3   : > { %v7507_v47 = vmax.f32 %v2634_v4, 0.0  ;;  %v2636_v53 = vadd.f32 %v2635_v21, %v2443_v8  ;;  %v2445_v51 = vadd.f32 %v2444_v24, %v7300_v11  ;;  %v2643_v2 = vpop.f32.mrf.mxu0  ;;  %2830 = vadd.xlane.f32.xlu0 %v2829_v63  ;;  %v2949_v38 = vmul.f32 %v7501_v23, %v7501_v23 }
 0x2d4   : > { %v2448_v12 = vpop.f32.mrf.mxu1  ;;  %v3022_v36 = vadd.f32 %v2948_v58, %v2947_v18 }
 0x2d5   : > { %v2638_v60 = vadd.f32 %v2637_v20, %v2445_v51  ;;  %v2449_v17 = vadd.f32 %v2448_v12, %v7294_v43  ;;  %v2645_v27 = vpop.f32.mrf.mxu0  ;;  %v2832_v50 = vadd.f32 %v7507_v47, %v7501_v23  ;;  %v7513_v0 = vmax.f32 %v2636_v53, 0.0 }
 0x2d6   : > { %3023 = vadd.xlane.f32.xlu1 %v3022_v36  ;;  %v2450_v41 = vpop.f32.mrf.mxu1  ;;  %v2950_v31 = vmul.f32 %v7507_v47, %v7507_v47 }
 0x2d7   : > { %v7519_v59 = vmax.f32 %v2638_v60, 0.0  ;;  %v2642_v21 = vadd.f32 %v2641_v52, %v2449_v17  ;;  %v2451_v7 = vadd.f32 %v2450_v41, %v7300_v11  ;;  %v2647_v1 = vpop.f32.mrf.mxu0  ;;  %2833 = vadd.xlane.f32.xlu0 %v2832_v50  ;;  %v2951_v62 = vmul.f32 %v7513_v0, %v7513_v0 }
 0x2d8   : > { %v2452_v46 = vpop.f32.mrf.mxu1  ;;  %v3025_v39 = vadd.f32 %v2950_v31, %v2949_v38 }
 0x2d9   : > { %v2644_v48 = vadd.f32 %v2643_v2, %v2451_v7  ;;  %v2453_v37 = vadd.f32 %v2452_v46, %v7294_v43  ;;  %v2651_v19 = vpop.f32.mrf.mxu0  ;;  %v2835_v20 = vadd.f32 %v7519_v59, %v7513_v0  ;;  %v7525_v33 = vmax.f32 %v2642_v21, 0.0 }
 0x2da   : > { %3026 = vadd.xlane.f32.xlu1 %v3025_v39  ;;  %v2454_v49 = vpop.f32.mrf.mxu1  ;;  %v2952_v4 = vmul.f32 %v7519_v59, %v7519_v59 }
 0x2db   : > { %v7531_v8 = vmax.f32 %v2644_v48, 0.0  ;;  %v2646_v52 = vadd.f32 %v2645_v27, %v2453_v37  ;;  %v2455_v63 = vadd.f32 %v2454_v49, %v7300_v11  ;;  %v2653_v24 = vpop.f32.mrf.mxu0  ;;  %2836 = vadd.xlane.f32.xlu0 %v2835_v20  ;;  %v2953_v17 = vmul.f32 %v7525_v33, %v7525_v33 }
 0x2dc   : > { %v2458_v18 = vpop.f32.mrf.mxu1  ;;  %v3028_v58 = vadd.f32 %v2952_v4, %v2951_v62 }
 0x2dd   : > { %v2648_v53 = vadd.f32 %v2647_v1, %v2455_v63  ;;  %v2459_v51 = vadd.f32 %v2458_v18, %v7294_v43  ;;  %v2655_v2 = vpop.f32.mrf.mxu0  ;;  %v2838_v12 = vadd.f32 %v7531_v8, %v7525_v33  ;;  %v7537_v36 = vmax.f32 %v2646_v52, 0.0 }
 0x2de   : > { %3029 = vadd.xlane.f32.xlu1 %v3028_v58  ;;  %v2460_v60 = vpop.f32.mrf.mxu1  ;;  %v2954_v27 = vmul.f32 %v7531_v8, %v7531_v8 }
 0x2df   : > { %v7543_v50 = vmax.f32 %v2648_v53, 0.0  ;;  %v2652_v41 = vadd.f32 %v2651_v19, %v2459_v51  ;;  %v2461_v38 = vadd.f32 %v2460_v60, %v7300_v11  ;;  %v2657_v31 = vpop.f32.mrf.mxu0  ;;  %2839 = vadd.xlane.f32.xlu0 %v2838_v12  ;;  %v2955_v19 = vmul.f32 %v7537_v36, %v7537_v36 }
 0x2e0   : > { %v2462_v21 = vpop.f32.mrf.mxu1  ;;  %v3031_v7 = vadd.f32 %v2954_v27, %v2953_v17 }
 0x2e1   : > { %v2654_v1 = vadd.f32 %v2653_v24, %v2461_v38  ;;  %v2463_v46 = vadd.f32 %v2462_v21, %v7294_v43  ;;  %v2661_v39 = vpop.f32.mrf.mxu0  ;;  %v2841_v48 = vadd.f32 %v7543_v50, %v7537_v36  ;;  %v7549_v37 = vmax.f32 %v2652_v41, 0.0 }
 0x2e2   : > { %3032 = vadd.xlane.f32.xlu1 %v3031_v7  ;;  %v2464_v20 = vpop.f32.mrf.mxu1  ;;  %v2956_v49 = vmul.f32 %v7543_v50, %v7543_v50 }
 0x2e3   : > { %v7555_v62 = vmax.f32 %v2654_v1, 0.0  ;;  %v2656_v4 = vadd.f32 %v2655_v2, %v2463_v46  ;;  %v2465_v52 = vadd.f32 %v2464_v20, %v7300_v11  ;;  %v2663_v63 = vpop.f32.mrf.mxu0  ;;  %2842 = vadd.xlane.f32.xlu0 %v2841_v48  ;;  %v2957_v2 = vmul.f32 %v7549_v37, %v7549_v37 }
 0x2e4   : > { %v2468_v24 = vpop.f32.mrf.mxu1  ;;  %v3034_v18 = vadd.f32 %v2956_v49, %v2955_v19 }
 0x2e5   : > { %v2658_v58 = vadd.f32 %v2657_v31, %v2465_v52  ;;  %v2469_v53 = vadd.f32 %v2468_v24, %v7294_v43  ;;  %v2665_v51 = vpop.f32.mrf.mxu0  ;;  %v2844_v12 = vadd.f32 %v7555_v62, %v7549_v37  ;;  %v7561_v60 = vmax.f32 %v2656_v4, 0.0 }
 0x2e6   : > { %3035 = vadd.xlane.f32.xlu1 %v3034_v18  ;;  %v2470_v17 = vpop.f32.mrf.mxu1  ;;  %v2958_v27 = vmul.f32 %v7555_v62, %v7555_v62 }
 0x2e7   : > { %v7567_v41 = vmax.f32 %v2658_v58, 0.0  ;;  %v2662_v38 = vadd.f32 %v2661_v39, %v2469_v53  ;;  %v2471_v31 = vadd.f32 %v2470_v17, %v7300_v11  ;;  %v2667_v21 = vpop.f32.mrf.mxu0  ;;  %2845 = vadd.xlane.f32.xlu0 %v2844_v12  ;;  %v2959_v39 = vmul.f32 %v7561_v60, %v7561_v60 }
 0x2e8   : > { %v2472_v7 = vpop.f32.mrf.mxu1  ;;  %v3037_v1 = vadd.f32 %v2958_v27, %v2957_v2 }
 0x2e9   : > { %v2664_v46 = vadd.f32 %v2663_v63, %v2471_v31  ;;  %v2473_v48 = vadd.f32 %v2472_v7, %v7294_v43  ;;  %v2671_v20 = vpop.f32.mrf.mxu0  ;;  %v2847_v19 = vadd.f32 %v7567_v41, %v7561_v60  ;;  %v7573_v49 = vmax.f32 %v2662_v38, 0.0 }
 0x2ea   : > { %3038 = vadd.xlane.f32.xlu1 %v3037_v1  ;;  %v2474_v4 = vpop.f32.mrf.mxu1  ;;  %v2960_v52 = vmul.f32 %v7567_v41, %v7567_v41 }
 0x2eb   : > { %8673 = vst [vmem:[#allocation17_spill] sm:$0xff] %v7573_v49  ;;  %v7579_v24 = vmax.f32 %v2664_v46, 0.0  ;;  %v2666_v18 = vadd.f32 %v2665_v51, %v2473_v48  ;;  %v2475_v63 = vadd.f32 %v2474_v4, %v7300_v11  ;;  %v2673_v58 = vpop.f32.mrf.mxu0  ;;  %2848 = vadd.xlane.f32.xlu0 %v2847_v19  ;;  %v2961_v51 = vmul.f32 %v7573_v49, %v7573_v49 }
 0x2ec   : > { %v2478_v53 = vpop.f32.mrf.mxu1  ;;  %v3040_v12 = vadd.f32 %v2960_v52, %v2959_v39 }
 0x2ed   : > { %8674 = vst [vmem:[#allocation18_spill] sm:$0xff] %v7579_v24  ;;  %v2668_v17 = vadd.f32 %v2667_v21, %v2475_v63  ;;  %v2479_v2 = vadd.f32 %v2478_v53, %v7294_v43  ;;  %v2675_v27 = vpop.f32.mrf.mxu0  ;;  %v2850_v38 = vadd.f32 %v7579_v24, %v7573_v49  ;;  %v7585_v31 = vmax.f32 %v2666_v18, 0.0 }
 0x2ee   : > { %3041 = vadd.xlane.f32.xlu1 %v3040_v12  ;;  %v2480_v7 = vpop.f32.mrf.mxu1  ;;  %v2962_v1 = vmul.f32 %v7579_v24, %v7579_v24 }
 0x2ef   : > { %8675 = vst [vmem:[#allocation19_spill] sm:$0xff] %v7585_v31  ;;  %v7591_v46 = vmax.f32 %v2668_v17, 0.0  ;;  %v2672_v48 = vadd.f32 %v2671_v20, %v2479_v2  ;;  %v2481_v21 = vadd.f32 %v2480_v7, %v7300_v11  ;;  %v2677_v19 = vpop.f32.mrf.mxu0  ;;  %2851 = vadd.xlane.f32.xlu0 %v2850_v38  ;;  %v2963_v20 = vmul.f32 %v7585_v31, %v7585_v31 }
 0x2f0   : > { %v2482_v4 = vpop.f32.mrf.mxu1  ;;  %v3043_v39 = vadd.f32 %v2962_v1, %v2961_v51 }
 0x2f1   : > { %8676 = vst [vmem:[#allocation20_spill] sm:$0xff] %v7591_v46  ;;  %v2674_v52 = vadd.f32 %v2673_v58, %v2481_v21  ;;  %v2483_v18 = vadd.f32 %v2482_v4, %v7294_v43  ;;  %v2681_v63 = vpop.f32.mrf.mxu0  ;;  %v2853_v53 = vadd.f32 %v7591_v46, %v7585_v31  ;;  %v7597_v12 = vmax.f32 %v2672_v48, 0.0 }
 0x2f2   : > { %3044 = vadd.xlane.f32.xlu1 %v3043_v39  ;;  %v2484_v15 = vpop.f32.mrf.mxu1  ;;  %v2964_v17 = vmul.f32 %v7591_v46, %v7591_v46 }
 0x2f3   : > { %8677 = vst [vmem:[#allocation21_spill] sm:$0xff] %v7597_v12  ;;  %v7603_v2 = vmax.f32 %v2674_v52, 0.0  ;;  %v2676_v38 = vadd.f32 %v2675_v27, %v2483_v18  ;;  %v2485_v58 = vadd.f32 %v2484_v15, %v7300_v11  ;;  %v2683_v7 = vpop.f32.mrf.mxu0  ;;  %2854 = vadd.xlane.f32.xlu0 %v2853_v53  ;;  %v2965_v27 = vmul.f32 %v7597_v12, %v7597_v12 }
 0x2f4   : > { %v2488_v51 = vpop.f32.mrf.mxu1  ;;  %v3046_v1 = vadd.f32 %v2964_v17, %v2963_v20 }
 0x2f5   : > { %8678 = vst [vmem:[#allocation22_spill] sm:$0xff] %v7603_v2  ;;  %v2678_v21 = vadd.f32 %v2677_v19, %v2485_v58  ;;  %v2489_v48 = vadd.f32 %v2488_v51, %v7294_v43  ;;  %v2685_v4 = vpop.f32.mrf.mxu0  ;;  %v2856_v39 = vadd.f32 %v7603_v2, %v7597_v12  ;;  %v7609_v31 = vmax.f32 %v2676_v38, 0.0 }
 0x2f6   : > { %3047 = vadd.xlane.f32.xlu1 %v3046_v1  ;;  %v2490_v46 = vpop.f32.mrf.mxu1  ;;  %v2966_v15 = vmul.f32 %v7603_v2, %v7603_v2 }
 0x2f7   : > { %8679 = vst [vmem:[#allocation23_spill] sm:$0xff] %v7609_v31  ;;  %v7615_v52 = vmax.f32 %v2678_v21, 0.0  ;;  %v2682_v18 = vadd.f32 %v2681_v63, %v2489_v48  ;;  %v2491_v19 = vadd.f32 %v2490_v46, %v7300_v11  ;;  %v2687_v53 = vpop.f32.mrf.mxu0  ;;  %2857 = vadd.xlane.f32.xlu0 %v2856_v39  ;;  %v2967_v63 = vmul.f32 %v7609_v31, %v7609_v31 }
 0x2f8   : > { %v2492_v20 = vpop.f32.mrf.mxu1  ;;  %v3049_v17 = vadd.f32 %v2966_v15, %v2965_v27 }
 0x2f9   : > { %8680 = vst [vmem:[#allocation24_spill] sm:$0xff] %v7615_v52  ;;  %v2684_v58 = vadd.f32 %v2683_v7, %v2491_v19  ;;  %v2493_v38 = vadd.f32 %v2492_v20, %v7294_v43  ;;  %v2691_v51 = vpop.f32.mrf.mxu0  ;;  %v2859_v1 = vadd.f32 %v7615_v52, %v7609_v31  ;;  %v7621_v12 = vmax.f32 %v2682_v18, 0.0 }
 0x2fa   : > { %3050 = vadd.xlane.f32.xlu1 %v3049_v17  ;;  %v2494_v2 = vpop.f32.mrf.mxu1  ;;  %v2968_v46 = vmul.f32 %v7615_v52, %v7615_v52 }
 0x2fb   : > { %8681 = vst [vmem:[#allocation25_spill] sm:$0xff] %v7621_v12  ;;  %v7627_v21 = vmax.f32 %v2684_v58, 0.0  ;;  %v2686_v48 = vadd.f32 %v2685_v4, %v2493_v38  ;;  %v2495_v7 = vadd.f32 %v2494_v2, %v7300_v11  ;;  %v2693_v39 = vpop.f32.mrf.mxu0  ;;  %2860 = vadd.xlane.f32.xlu0 %v2859_v1  ;;  %v2969_v4 = vmul.f32 %v7621_v12, %v7621_v12 }
 0x2fc   : > { %v2498_v27 = vpop.f32.mrf.mxu1  ;;  %v3052_v15 = vadd.f32 %v2968_v46, %v2967_v63 }
 0x2fd   : > { %8682 = vst [vmem:[#allocation26_spill] sm:$0xff] %v7627_v21  ;;  %v2688_v19 = vadd.f32 %v2687_v53, %v2495_v7  ;;  %v2499_v18 = vadd.f32 %v2498_v27, %v7294_v43  ;;  %v2695_v20 = vpop.f32.mrf.mxu0  ;;  %v2862_v17 = vadd.f32 %v7627_v21, %v7621_v12  ;;  %v7633_v31 = vmax.f32 %v2686_v48, 0.0 }
 0x2fe   : > { %3053 = vadd.xlane.f32.xlu1 %v3052_v15  ;;  %v2500_v52 = vpop.f32.mrf.mxu1  ;;  %v2970_v2 = vmul.f32 %v7627_v21, %v7627_v21 }
 0x2ff   : > { %8683 = vst [vmem:[#allocation27_spill] sm:$0xff] %v7633_v31  ;;  %v7639_v58 = vmax.f32 %v2688_v19, 0.0  ;;  %v2692_v38 = vadd.f32 %v2691_v51, %v2499_v18  ;;  %v2501_v53 = vadd.f32 %v2500_v52, %v7300_v11  ;;  %v2697_v1 = vpop.f32.mrf.mxu0  ;;  %2863 = vadd.xlane.f32.xlu0 %v2862_v17  ;;  %v2971_v51 = vmul.f32 %v7633_v31, %v7633_v31 }
 0x300   : > { %v2502_v63 = vpop.f32.mrf.mxu1  ;;  %v3055_v46 = vadd.f32 %v2970_v2, %v2969_v4 }
 0x301   : > { %8684 = vst [vmem:[#allocation28_spill] sm:$0xff] %v7639_v58  ;;  %v2694_v7 = vadd.f32 %v2693_v39, %v2501_v53  ;;  %v2503_v48 = vadd.f32 %v2502_v63, %v7294_v43  ;;  %v2701_v27 = vpop.f32.mrf.mxu0  ;;  %v2865_v15 = vadd.f32 %v7639_v58, %v7633_v31  ;;  %v7645_v12 = vmax.f32 %v2692_v38, 0.0 }
 0x302   : > { %3056 = vadd.xlane.f32.xlu1 %v3055_v46  ;;  %v2504_v21 = vpop.f32.mrf.mxu1  ;;  %v2972_v52 = vmul.f32 %v7639_v58, %v7639_v58 }
 0x303   : > { %8685 = vst [vmem:[#allocation29_spill] sm:$0xff] %v7645_v12  ;;  %v7651_v19 = vmax.f32 %v2694_v7, 0.0  ;;  %v2696_v18 = vadd.f32 %v2695_v20, %v2503_v48  ;;  %v2505_v39 = vadd.f32 %v2504_v21, %v7300_v11  ;;  %v2703_v17 = vpop.f32.mrf.mxu0  ;;  %2866 = vadd.xlane.f32.xlu0 %v2865_v15  ;;  %v2973_v20 = vmul.f32 %v7645_v12, %v7645_v12 }
 0x304   : > { %v2508_v4 = vpop.f32.mrf.mxu1  ;;  %v3058_v2 = vadd.f32 %v2972_v52, %v2971_v51 }
 0x305   : > { %8686 = vst [vmem:[#allocation30_spill] sm:$0xff] %v7651_v19  ;;  %v2698_v53 = vadd.f32 %v2697_v1, %v2505_v39  ;;  %v2509_v38 = vadd.f32 %v2508_v4, %v7294_v43  ;;  %v2705_v63 = vpop.f32.mrf.mxu0  ;;  %v2868_v46 = vadd.f32 %v7651_v19, %v7645_v12  ;;  %v7657_v31 = vmax.f32 %v2696_v18, 0.0 }
 0x306   : > { %3059 = vadd.xlane.f32.xlu1 %v3058_v2  ;;  %v2510_v58 = vpop.f32.mrf.mxu1  ;;  %v2974_v21 = vmul.f32 %v7651_v19, %v7651_v19 }
 0x307   : > { %8687 = vst [vmem:[#allocation31_spill] sm:$0xff] %v7657_v31  ;;  %v7663_v7 = vmax.f32 %v2698_v53, 0.0  ;;  %v2702_v48 = vadd.f32 %v2701_v27, %v2509_v38  ;;  %v2511_v1 = vadd.f32 %v2510_v58, %v7300_v11  ;;  %v2707_v15 = vpop.f32.mrf.mxu0  ;;  %2869 = vadd.xlane.f32.xlu0 %v2868_v46  ;;  %v2975_v27 = vmul.f32 %v7657_v31, %v7657_v31 }
 0x308   : > { %v2512_v51 = vpop.f32.mrf.mxu1  ;;  %v3061_v52 = vadd.f32 %v2974_v21, %v2973_v20 }
 0x309   : > { %8688 = vst [vmem:[#allocation32_spill] sm:$0xff] %v7663_v7  ;;  %v2704_v39 = vadd.f32 %v2703_v17, %v2511_v1  ;;  %v2513_v18 = vadd.f32 %v2512_v51, %v7294_v43  ;;  %v2711_v4 = vpop.f32.mrf.mxu0  ;;  %v2871_v2 = vadd.f32 %v7663_v7, %v7657_v31  ;;  %v7669_v12 = vmax.f32 %v2702_v48, 0.0 }
 0x30a   : > { %3062 = vadd.xlane.f32.xlu1 %v3061_v52  ;;  %v2514_v19 = vpop.f32.mrf.mxu1  ;;  %v2976_v58 = vmul.f32 %v7663_v7, %v7663_v7 }
 0x30b   : > { %8689 = vst [vmem:[#allocation33_spill] sm:$0xff] %v7669_v12  ;;  %v7675_v53 = vmax.f32 %v2704_v39, 0.0  ;;  %v2706_v38 = vadd.f32 %v2705_v63, %v2513_v18  ;;  %v2515_v17 = vadd.f32 %v2514_v19, %v7300_v11  ;;  %v2713_v46 = vpop.f32.mrf.mxu0  ;;  %2872 = vadd.xlane.f32.xlu0 %v2871_v2  ;;  %v2977_v63 = vmul.f32 %v7669_v12, %v7669_v12 }
 0x30c   : > { %v2518_v20 = vpop.f32.mrf.mxu1  ;;  %v3064_v21 = vadd.f32 %v2976_v58, %v2975_v27 }
 0x30d   : > { %8690 = vst [vmem:[#allocation34_spill] sm:$0xff] %v7675_v53  ;;  %v2708_v1 = vadd.f32 %v2707_v15, %v2515_v17  ;;  %v2519_v48 = vadd.f32 %v2518_v20, %v7294_v43  ;;  %v2715_v51 = vpop.f32.mrf.mxu0  ;;  %v2874_v52 = vadd.f32 %v7675_v53, %v7669_v12  ;;  %v7681_v31 = vmax.f32 %v2706_v38, 0.0 }
 0x30e   : > { %3065 = vadd.xlane.f32.xlu1 %v3064_v21  ;;  %v2520_v7 = vpop.f32.mrf.mxu1  ;;  %v2978_v19 = vmul.f32 %v7675_v53, %v7675_v53 }
 0x30f   : > { %8691 = vst [vmem:[#allocation35_spill] sm:$0xff] %v7681_v31  ;;  %v7687_v39 = vmax.f32 %v2708_v1, 0.0  ;;  %v2712_v18 = vadd.f32 %v2711_v4, %v2519_v48  ;;  %v2521_v15 = vadd.f32 %v2520_v7, %v7300_v11  ;;  %v2717_v2 = vpop.f32.mrf.mxu0  ;;  %2875 = vadd.xlane.f32.xlu0 %v2874_v52  ;;  %v2979_v4 = vmul.f32 %v7681_v31, %v7681_v31 }
 0x310   : > { %v2522_v27 = vpop.f32.mrf.mxu1  ;;  %v3067_v58 = vadd.f32 %v2978_v19, %v2977_v63 }
 0x311   : > { %8692 = vst [vmem:[#allocation36_spill] sm:$0xff] %v7687_v39  ;;  %v2714_v17 = vadd.f32 %v2713_v46, %v2521_v15  ;;  %v2523_v38 = vadd.f32 %v2522_v27, %v7294_v43  ;;  %v2721_v20 = vpop.f32.mrf.mxu0  ;;  %v2877_v21 = vadd.f32 %v7687_v39, %v7681_v31  ;;  %v7693_v12 = vmax.f32 %v2712_v18, 0.0 }
 0x312   : > { %3068 = vadd.xlane.f32.xlu1 %v3067_v58  ;;  %v2524_v53 = vpop.f32.mrf.mxu1  ;;  %v2980_v7 = vmul.f32 %v7687_v39, %v7687_v39 }
 0x313   : > { %8693 = vst [vmem:[#allocation37_spill] sm:$0xff] %v7693_v12  ;;  %v7699_v1 = vmax.f32 %v2714_v17, 0.0  ;;  %v2716_v48 = vadd.f32 %v2715_v51, %v2523_v38  ;;  %v2525_v46 = vadd.f32 %v2524_v53, %v7300_v11  ;;  %2878 = vadd.xlane.f32.xlu0 %v2877_v21  ;;  %v2723_v52 = vpop.f32.mrf.mxu0  ;;  %v2981_v17 = vmul.f32 %v7693_v12, %v7693_v12 }
 0x314   : > { %v2528_v63 = vpop.f32.mrf.mxu1  ;;  %v3070_v19 = vadd.f32 %v2980_v7, %v2979_v4 }
 0x315   : > { %8694 = vst [vmem:[#allocation38_spill] sm:$0xff] %v7699_v1  ;;  %v2718_v15 = vadd.f32 %v2717_v2, %v2525_v46  ;;  %v2529_v18 = vadd.f32 %v2528_v63, %v7294_v43  ;;  %v2880_v27 = vadd.f32 %v7699_v1, %v7693_v12  ;;  %v7705_v58 = vmax.f32 %v2716_v48, 0.0  ;;  %v2725_v21 = vpop.f32.mrf.mxu0 }
 0x316   : > { %3071 = vadd.xlane.f32.xlu1 %v3070_v19  ;;  %v2530_v31 = vpop.f32.mrf.mxu1  ;;  %v2982_v53 = vmul.f32 %v7699_v1, %v7699_v1 }
 0x317   : > { %8695 = vst [vmem:[#allocation39_spill] sm:$0xff] %v7705_v58  ;;  %v7711_v51 = vmax.f32 %v2718_v15, 0.0  ;;  %v2722_v38 = vadd.f32 %v2721_v20, %v2529_v18  ;;  %v2531_v2 = vadd.f32 %v2530_v31, %v7300_v11  ;;  %2881 = vadd.xlane.f32.xlu0 %v2880_v27  ;;  %v2983_v15 = vmul.f32 %v7705_v58, %v7705_v58 }
 0x318   : > { %v2532_v4 = vpop.f32.mrf.mxu1  ;;  %v3073_v7 = vadd.f32 %v2982_v53, %v2981_v17 }
 0x319   : > { %8696 = vst [vmem:[#allocation40_spill] sm:$0xff] %v7711_v51  ;;  %v7714_v46 = vmax.f32 %v2722_v38, 0.0  ;;  %v2724_v48 = vadd.f32 %v2723_v52, %v2531_v2  ;;  %v2533_v63 = vadd.f32 %v2532_v4, %v7294_v43  ;;  %v2883_v19 = vadd.f32 %v7711_v51, %v7705_v58  ;;  %v2727_v52 = vpop.f32.mrf.mxu0 }
 0x31a   : > { %3074 = vadd.xlane.f32.xlu1 %v3073_v7  ;;  %v2534_v12 = vpop.f32.mrf.mxu1  ;;  %v2984_v31 = vmul.f32 %v7711_v51, %v7711_v51 }
 0x31b   : > { %8697 = vst [vmem:[#allocation41_spill] sm:$0xff] %v7714_v46  ;;  %v7723_v20 = vmax.f32 %v2724_v48, 0.0  ;;  %v2726_v18 = vadd.f32 %v2725_v21, %v2533_v63  ;;  %v2535_v27 = vadd.f32 %v2534_v12, %v7300_v11  ;;  %2884 = vadd.xlane.f32.xlu0 %v2883_v19  ;;  %v2985_v43 = vmul.f32 %v7714_v46, %v7714_v46 }
 0x31c   : > { %v3076_v17 = vadd.f32 %v2984_v31, %v2983_v15 }
 0x31d   : > { %8698 = vst [vmem:[#allocation42_spill] sm:$0xff] %v7723_v20  ;;  %v7728_v53 = vmax.f32 %v2726_v18, 0.0  ;;  %v2728_v38 = vadd.f32 %v2727_v52, %v2535_v27  ;;  %v2886_v2 = vadd.f32 %v7723_v20, %v7714_v46  ;;  %v2986_v4 = vmul.f32 %v7723_v20, %v7723_v20 }
 0x31e   : > { %3077 = vadd.xlane.f32.xlu1 %v3076_v17 }
 0x31f   : > { %8699 = vst [vmem:[#allocation43_spill] sm:$0xff] %v7728_v53  ;;  %v7734_v7 = vmax.f32 %v2728_v38, 0.0  ;;  %2887 = vadd.xlane.f32.xlu0 %v2886_v2  ;;  %v3079_v11 = vadd.f32 %v2986_v4, %v2985_v43  ;;  %v2987_v21 = vmul.f32 %v7728_v53, %v7728_v53 }
 0x321   : > { %8700 = vst [vmem:[#allocation44_spill] sm:$0xff] %v7734_v7  ;;  %v2889_v12 = vadd.f32 %v7734_v7, %v7728_v53  ;;  %v2988_v48 = vmul.f32 %v7734_v7, %v7734_v7 }
 0x322   : > { %3080 = vadd.xlane.f32.xlu1 %v3079_v11 }
 0x323   : > { %2890 = vadd.xlane.f32.xlu0 %v2889_v12  ;;  %v3082_v63 = vadd.f32 %v2988_v48, %v2987_v21 }
 0x326   : > { %3083 = vadd.xlane.f32.xlu1 %v3082_v63 }
 0x330   : > { %v2798_v19 = vpop.xlane.xlu0 %2797 }
 0x331   : > { %v2893_v15 = vmul.f32 0.00390625, %v2798_v19 }
 0x333   : > { %v3117_v31 = vmul.f32 %v2893_v15, %v2893_v15  ;;  %v2991_v18 = vpop.xlane.xlu1 %2990 }
 0x334   : > { %v3085_v27 = vmul.f32 0.00390625, %v2991_v18  ;;  %v2801_v52 = vpop.xlane.xlu0 %2800 }
 0x335   : > { %v7742_v17 = vmul.f32 0.00390625, %v2801_v52 }
 0x336   : > { %v3149_v43 = vsub.f32 %v3085_v27, %v3117_v31 }
 0x337   : > { %v3118_v38 = vmul.f32 %v7742_v17, %v7742_v17  ;;  %v2994_v2 = vpop.xlane.xlu1 %2993 }
 0x338   : > { %v3181_v4 = vmax.f32 %v3149_v43, 0.0  ;;  %v3086_v53 = vmul.f32 0.00390625, %v2994_v2  ;;  %v2804_v7 = vpop.xlane.xlu0 %2803 }
 0x339   : > { %v7746_v11 = vmul.f32 0.00390625, %v2804_v7 }
 0x33a   : > { %v3277_v12 = vadd.f32 1e-05, %v3181_v4  ;;  %v3150_v21 = vsub.f32 %v3086_v53, %v3118_v38 }
 0x33b   : > { %v3119_v48 = vmul.f32 %v7746_v11, %v7746_v11  ;;  %v2997_v63 = vpop.xlane.xlu1 %2996 }
 0x33c   : > { %5961 = vrsqrt.f32 %v3277_v12  ;;  %v3182_v19 = vmax.f32 %v3150_v21, 0.0  ;;  %v3087_v18 = vmul.f32 0.00390625, %v2997_v63  ;;  %v2807_v52 = vpop.xlane.xlu0 %2806 }
 0x33d   : > { %v7750_v31 = vmul.f32 0.00390625, %v2807_v52 }
 0x33e   : > { %v3278_v27 = vadd.f32 1e-05, %v3182_v19  ;;  %v3151_v20 = vsub.f32 %v3087_v18, %v3119_v48  ;;  %v2794_v48 = vld [vmem:[%s8605_s7] sm:$0x3] }
 0x33f   : > { %v3000_v46 = vpop.xlane.xlu1 %2999  ;;  %v3120_v43 = vmul.f32 %v7750_v31, %v7750_v31  ;;  %v7774_v1 = vrot.slane %v2794_v48, %v7281_v29 }
 0x340   : > { %5963 = vrsqrt.f32 %v3278_v27  ;;  %v3183_v7 = vmax.f32 %v3151_v20, 0.0  ;;  %v3088_v2 = vmul.f32 0.00390625, %v3000_v46  ;;  %v2810_v53 = vpop.xlane.xlu0 %2809  ;;  %v2795_v46 = vld [vmem:[%s8606_s8] sm:$0x3] }
 0x341   : > { %v7754_v38 = vmul.f32 0.00390625, %v2810_v53  ;;  %v7782_v24 = vrot.slane %v2795_v46, %v7281_v29 }
 0x342   : > { %v3279_v4 = vadd.f32 1e-05, %v3183_v7  ;;  %v3152_v51 = vsub.f32 %v3088_v2, %v3120_v43  ;;  %v7767_v43 = vrot.slane %v2794_v48, %v7290_v26  ;;  %v3213_v7 = vsub.f32 %v7317_v9, %v2893_v15 }
 0x343   : > { %v3003_v12 = vpop.xlane.xlu1 %3002  ;;  %v3121_v21 = vmul.f32 %v7754_v38, %v7754_v38 }
 0x344   : > { %5965 = vrsqrt.f32 %v3279_v4  ;;  %v3184_v63 = vmax.f32 %v3152_v51, 0.0  ;;  %v3089_v19 = vmul.f32 0.00390625, %v3003_v12  ;;  %v2813_v18 = vpop.xlane.xlu0 %2812  ;;  %v3214_v51 = vsub.f32 %v7319_v42, %v2893_v15 }
 0x345   : > { %v7761_v52 = vmul.f32 0.00390625, %v2813_v18  ;;  %v3216_v42 = vsub.f32 %v7342_v16, %v7742_v17 }
 0x346   : > { %v3280_v20 = vadd.f32 1e-05, %v3184_v63  ;;  %v3153_v27 = vsub.f32 %v3089_v19, %v3121_v21  ;;  %v7777_v21 = vrot.slane %v2795_v46, %v7290_v26 }
 0x347   : > { %v3006_v2 = vpop.xlane.xlu1 %3005  ;;  %v3122_v53 = vmul.f32 %v7761_v52, %v7761_v52 }
 0x348   : > { %5967 = vrsqrt.f32 %v3280_v20  ;;  %v3185_v4 = vmax.f32 %v3153_v27, 0.0  ;;  %v3090_v12 = vmul.f32 0.00390625, %v3006_v2  ;;  %v2816_v18 = vpop.xlane.xlu0 %2815 }
 0x349   : > { %v5962_v58 = vpop.eup %5961  ;;  %v7779_v63 = vmul.f32 0.00390625, %v2816_v18 }
 0x34a   : > { %v3281_v9 = vadd.f32 1e-05, %v3185_v4  ;;  %v3154_v19 = vsub.f32 %v3090_v12, %v3122_v53  ;;  %v3342_v39 = vmul.f32 %v5962_v58, %v3214_v51  ;;  %v3341_v49 = vmul.f32 %v5962_v58, %v3213_v7 }
 0x34b   : > { %v3009_v15 = vpop.xlane.xlu1 %3008  ;;  %v3123_v48 = vmul.f32 %v7779_v63, %v7779_v63  ;;  %v3215_v12 = vsub.f32 %v7330_v30, %v7742_v17 }
 0x34c   : > { %5969 = vrsqrt.f32 %v3281_v9  ;;  %v3186_v20 = vmax.f32 %v3154_v19, 0.0  ;;  %v3091_v27 = vmul.f32 0.00390625, %v3009_v15  ;;  %v2819_v2 = vpop.xlane.xlu0 %2818  ;;  %v3417_v18 = vmul.f32 %v7767_v43, %v3342_v39 }
 0x34d   : > { %v5964_v4 = vpop.eup %5963  ;;  %v7789_v53 = vmul.f32 0.00390625, %v2819_v2  ;;  %v3416_v58 = vmul.f32 %v7774_v1, %v3341_v49  ;;  %v3218_v9 = vsub.f32 %v7359_v25, %v7746_v11 }
 0x34e   : > { %v3282_v46 = vadd.f32 1e-05, %v3186_v20  ;;  %v3155_v7 = vsub.f32 %v3091_v27, %v3123_v48  ;;  %v3492_v51 = vadd.f32 %v7777_v21, %v3417_v18  ;;  %v3344_v16 = vmul.f32 %v5964_v4, %v3216_v42 }
 0x34f   : > { %v3012_v19 = vpop.xlane.xlu1 %3011  ;;  %v3124_v39 = vmul.f32 %v7789_v53, %v7789_v53  ;;  %v3491_v15 = vadd.f32 %v7782_v24, %v3416_v58  ;;  %v3343_v30 = vmul.f32 %v5964_v4, %v3215_v12  ;;  %v3217_v58 = vsub.f32 %v7352_v61, %v7746_v11 }
 0x350   : > { %5971 = vrsqrt.f32 %v3282_v46  ;;  %v3187_v2 = vmax.f32 %v3155_v7, 0.0  ;;  %v3092_v49 = vmul.f32 0.00390625, %v3012_v19  ;;  %3658 = vmatprep.mubr.f32.mxu1 %v3492_v51  ;;  %v2822_v48 = vpop.xlane.xlu0 %2821  ;;  %v3419_v20 = vmul.f32 %v7767_v43, %v3344_v16 }
 0x351   : > { %v5966_v42 = vpop.eup %5965  ;;  %3659 = vmatmul.mubr.f32.vlgmr.msra.gmra.mxu1 %v3491_v15  ;;  %v7801_v27 = vmul.f32 0.00390625, %v2822_v48  ;;  %v3220_v46 = vsub.f32 %v7372_v44, %v7750_v31  ;;  %v3418_v16 = vmul.f32 %v7774_v1, %v3343_v30  ;;  %v3222_v30 = vsub.f32 %v7384_v13, %v7754_v38 }
 0x352   : > { %v3283_v17 = vadd.f32 1e-05, %v3187_v2  ;;  %v3156_v25 = vsub.f32 %v3092_v49, %v3124_v39  ;;  %v3494_v18 = vadd.f32 %v7777_v21, %v3419_v20  ;;  %v3346_v26 = vmul.f32 %v5966_v42, %v3218_v9 }
 0x353   : > { %v3015_v7 = vpop.xlane.xlu1 %3014  ;;  %v3125_v51 = vmul.f32 %v7801_v27, %v7801_v27  ;;  %v3493_v15 = vadd.f32 %v7782_v24, %v3418_v16  ;;  %v3345_v11 = vmul.f32 %v5966_v42, %v3217_v58  ;;  %v3219_v20 = vsub.f32 %v7366_v56, %v7750_v31 }
 0x354   : > { %5973 = vrsqrt.f32 %v3283_v17  ;;  %v3188_v19 = vmax.f32 %v3156_v25, 0.0  ;;  %v3093_v4 = vmul.f32 0.00390625, %v3015_v7  ;;  %3663 = vmatprep.mubr.f32.mxu1 %v3494_v18  ;;  %v2825_v12 = vpop.xlane.xlu0 %2824  ;;  %v3421_v39 = vmul.f32 %v7767_v43, %v3346_v26 }
 0x355   : > { %v5968_v9 = vpop.eup %5967  ;;  %v7813_v61 = vmul.f32 0.00390625, %v2825_v12  ;;  %3664 = vmatmul.mubr.f32.gmra.mxu1 %v3493_v15  ;;  %v3420_v25 = vmul.f32 %v7774_v1, %v3345_v11  ;;  %v3221_v12 = vsub.f32 %v7378_v45, %v7754_v38 }
 0x356   : > { %v3284_v44 = vadd.f32 1e-05, %v3188_v19  ;;  %v3157_v2 = vsub.f32 %v3093_v4, %v3125_v51  ;;  %v3496_v49 = vadd.f32 %v7777_v21, %v3421_v39  ;;  %v3348_v48 = vmul.f32 %v5968_v9, %v3220_v46 }
 0x357   : > { %v3018_v17 = vpop.xlane.xlu1 %3017  ;;  %v3126_v26 = vmul.f32 %v7813_v61, %v7813_v61  ;;  %v3495_v56 = vadd.f32 %v7782_v24, %v3420_v25  ;;  %v3347_v13 = vmul.f32 %v5968_v9, %v3219_v20  ;;  %v3224_v39 = vsub.f32 %v7396_v55, %v7761_v52 }
 0x358   : > { %5975 = vrsqrt.f32 %v3284_v44  ;;  %v3189_v42 = vmax.f32 %v3157_v2, 0.0  ;;  %v3094_v18 = vmul.f32 0.00390625, %v3018_v17  ;;  %3668 = vmatprep.mubr.f32.mxu1 %v3496_v49  ;;  %v2828_v58 = vpop.xlane.xlu0 %2827  ;;  %v3423_v46 = vmul.f32 %v7767_v43, %v3348_v48 }
 0x359   : > { %v5970_v7 = vpop.eup %5969  ;;  %v7825_v31 = vmul.f32 0.00390625, %v2828_v58  ;;  %3669 = vmatmul.mubr.f32.gmra.mxu1 %v3495_v56  ;;  %v3422_v44 = vmul.f32 %v7774_v1, %v3347_v13 }
 0x35a   : > { %v3285_v51 = vadd.f32 1e-05, %v3189_v42  ;;  %v3158_v16 = vsub.f32 %v3094_v18, %v3126_v26  ;;  %v3498_v19 = vadd.f32 %v7777_v21, %v3423_v46  ;;  %v3350_v4 = vmul.f32 %v5970_v7, %v3222_v30 }
 0x35b   : > { %v3021_v15 = vpop.xlane.xlu1 %3020  ;;  %v3127_v11 = vmul.f32 %v7825_v31, %v7825_v31  ;;  %v3497_v45 = vadd.f32 %v7782_v24, %v3422_v44  ;;  %v3349_v55 = vmul.f32 %v5970_v7, %v3221_v12  ;;  %v3223_v42 = vsub.f32 %v7390_v40, %v7761_v52 }
 0x35c   : > { %5977 = vrsqrt.f32 %v3285_v51  ;;  %v3190_v9 = vmax.f32 %v3158_v16, 0.0  ;;  %v3095_v2 = vmul.f32 0.00390625, %v3021_v15  ;;  %3673 = vmatprep.mubr.f32.mxu1 %v3498_v19  ;;  %v2831_v49 = vpop.xlane.xlu0 %2830  ;;  %v3425_v48 = vmul.f32 %v7767_v43, %v3350_v4 }
 0x35d   : > { %v5972_v20 = vpop.eup %5971  ;;  %v7837_v38 = vmul.f32 0.00390625, %v2831_v49  ;;  %v3226_v18 = vsub.f32 %v7408_v22, %v7779_v63  ;;  %3674 = vmatmul.mubr.f32.gmra.mxu1 %v3497_v45  ;;  %v3424_v56 = vmul.f32 %v7774_v1, %v3349_v55  ;;  %v3228_v44 = vsub.f32 %v7424_v5, %v7789_v53 }
 0x35e   : > { %v3286_v30 = vadd.f32 1e-05, %v3190_v9  ;;  %v3159_v17 = vsub.f32 %v3095_v2, %v3127_v11  ;;  %v3500_v26 = vadd.f32 %v7777_v21, %v3425_v48  ;;  %v3352_v25 = vmul.f32 %v5972_v20, %v3224_v39 }
 0x35f   : > { %v3024_v58 = vpop.xlane.xlu1 %3023  ;;  %v3128_v46 = vmul.f32 %v7837_v38, %v7837_v38  ;;  %v3499_v40 = vadd.f32 %v7782_v24, %v3424_v56  ;;  %v3351_v22 = vmul.f32 %v5972_v20, %v3223_v42  ;;  %v3225_v11 = vsub.f32 %v7402_v35, %v7779_v63 }
 0x360   : > { %5979 = vrsqrt.f32 %v3286_v30  ;;  %v3191_v7 = vmax.f32 %v3159_v17, 0.0  ;;  %v3096_v13 = vmul.f32 0.00390625, %v3024_v58  ;;  %3678 = vmatprep.mubr.f32.mxu1 %v3500_v26  ;;  %v2834_v51 = vpop.xlane.xlu0 %2833  ;;  %v3427_v16 = vmul.f32 %v7767_v43, %v3352_v25 }
 0x361   : > { %v5974_v19 = vpop.eup %5973  ;;  %v7849_v52 = vmul.f32 0.00390625, %v2834_v51  ;;  %3679 = vmatmul.mubr.f32.gmra.mxu1 %v3499_v40  ;;  %v3426_v49 = vmul.f32 %v7774_v1, %v3351_v22  ;;  %v3230_v58 = vsub.f32 %v7440_v3, %v7801_v27 }
 0x362   : > { %v3287_v4 = vadd.f32 1e-05, %v3191_v7  ;;  %v3160_v12 = vsub.f32 %v3096_v13, %v3128_v46  ;;  %v3502_v39 = vadd.f32 %v7777_v21, %v3427_v16  ;;  %v3354_v15 = vmul.f32 %v5974_v19, %v3226_v18 }
 0x363   : > { %v3027_v9 = vpop.xlane.xlu1 %3026  ;;  %v3129_v2 = vmul.f32 %v7849_v52, %v7849_v52  ;;  %v3501_v35 = vadd.f32 %v7782_v24, %v3426_v49  ;;  %v3353_v5 = vmul.f32 %v5974_v19, %v3225_v11  ;;  %v3227_v18 = vsub.f32 %v7417_v10, %v7789_v53 }
 0x364   : > { %5981 = vrsqrt.f32 %v3287_v4  ;;  %v3192_v48 = vmax.f32 %v3160_v12, 0.0  ;;  %v3097_v20 = vmul.f32 0.00390625, %v3027_v9  ;;  %3683 = vmatprep.mubr.f32.mxu1 %v3502_v39  ;;  %v2837_v45 = vpop.xlane.xlu0 %2836  ;;  %v3429_v55 = vmul.f32 %v7767_v43, %v3354_v15 }
 0x365   : > { %v5976_v30 = vpop.eup %5975  ;;  %v7861_v63 = vmul.f32 0.00390625, %v2837_v45  ;;  %3684 = vmatmul.mubr.f32.gmra.mxu1 %v3501_v35  ;;  %v3428_v7 = vmul.f32 %v7774_v1, %v3353_v5  ;;  %v3229_v15 = vsub.f32 %v7433_v6, %v7801_v27  ;;  %v3232_v11 = vsub.f32 %v7456_v57, %v7813_v61 }
 0x366   : > { %v3288_v17 = vadd.f32 1e-05, %v3192_v48  ;;  %v3161_v26 = vsub.f32 %v3097_v20, %v3129_v2  ;;  %v3504_v25 = vadd.f32 %v7777_v21, %v3429_v55  ;;  %v3356_v42 = vmul.f32 %v5976_v30, %v3228_v44 }
 0x367   : > { %v3030_v46 = vpop.xlane.xlu1 %3029  ;;  %v3130_v56 = vmul.f32 %v7861_v63, %v7861_v63  ;;  %v3503_v10 = vadd.f32 %v7782_v24, %v3428_v7  ;;  %v3355_v3 = vmul.f32 %v5976_v30, %v3227_v18 }
 0x368   : > { %5983 = vrsqrt.f32 %v3288_v17  ;;  %v3193_v13 = vmax.f32 %v3161_v26, 0.0  ;;  %v3098_v51 = vmul.f32 0.00390625, %v3030_v46  ;;  %3688 = vmatprep.mubr.f32.mxu1 %v3504_v25  ;;  %v2840_v16 = vpop.xlane.xlu0 %2839  ;;  %v3431_v19 = vmul.f32 %v7767_v43, %v3356_v42 }
 0x369   : > { %v5978_v40 = vpop.eup %5977  ;;  %v7873_v53 = vmul.f32 0.00390625, %v2840_v16  ;;  %3689 = vmatmul.mubr.f32.gmra.mxu1 %v3503_v10  ;;  %v3430_v2 = vmul.f32 %v7774_v1, %v3355_v3  ;;  %v3231_v26 = vsub.f32 %v7449_v14, %v7813_v61  ;;  %v3234_v25 = vsub.f32 %v7472_v34, %v7825_v31 }
 0x36a   : > { %v3289_v22 = vadd.f32 1e-05, %v3193_v13  ;;  %v3162_v4 = vsub.f32 %v3098_v51, %v3130_v56  ;;  %v3506_v12 = vadd.f32 %v7777_v21, %v3431_v19  ;;  %v3358_v39 = vmul.f32 %v5978_v40, %v3230_v58 }
 0x36b   : > { %v3033_v44 = vpop.xlane.xlu1 %3032  ;;  %v3131_v9 = vmul.f32 %v7873_v53, %v7873_v53  ;;  %v3505_v6 = vadd.f32 %v7782_v24, %v3430_v2  ;;  %v3357_v57 = vmul.f32 %v5978_v40, %v3229_v15  ;;  %v3233_v3 = vsub.f32 %v7465_v28, %v7825_v31 }
 0x36c   : > { %5985 = vrsqrt.f32 %v3289_v22  ;;  %v3194_v49 = vmax.f32 %v3162_v4, 0.0  ;;  %v3099_v48 = vmul.f32 0.00390625, %v3033_v44  ;;  %3693 = vmatprep.mubr.f32.mxu1 %v3506_v12  ;;  %v2843_v20 = vpop.xlane.xlu0 %2842  ;;  %v3433_v45 = vmul.f32 %v7767_v43, %v3358_v39 }
 0x36d   : > { %v5980_v55 = vpop.eup %5979  ;;  %v7885_v27 = vmul.f32 0.00390625, %v2843_v20  ;;  %3694 = vmatmul.mubr.f32.gmra.mxu1 %v3505_v6  ;;  %v3432_v58 = vmul.f32 %v7774_v1, %v3357_v57  ;;  %v3236_v22 = vsub.f32 %v7491_v32, %v7837_v38  ;;  %v3238_v6 = vsub.f32 %v7507_v47, %v7849_v52 }
 0x36e   : > { %v3290_v30 = vadd.f32 1e-05, %v3194_v49  ;;  %v3163_v35 = vsub.f32 %v3099_v48, %v3131_v9  ;;  %v3508_v5 = vadd.f32 %v7777_v21, %v3433_v45  ;;  %v3360_v17 = vmul.f32 %v5980_v55, %v3232_v11 }
 0x36f   : > { %v3036_v42 = vpop.xlane.xlu1 %3035  ;;  %v3132_v18 = vmul.f32 %v7885_v27, %v7885_v27  ;;  %v3507_v14 = vadd.f32 %v7782_v24, %v3432_v58  ;;  %v3359_v34 = vmul.f32 %v5980_v55, %v3231_v26  ;;  %v3235_v55 = vsub.f32 %v7481_v54, %v7837_v38 }
 0x370   : > { %5987 = vrsqrt.f32 %v3290_v30  ;;  %v3195_v46 = vmax.f32 %v3163_v35, 0.0  ;;  %v3100_v56 = vmul.f32 0.00390625, %v3036_v42  ;;  %3698 = vmatprep.mubr.f32.mxu1 %v3508_v5  ;;  %v2846_v7 = vpop.xlane.xlu0 %2845  ;;  %v3435_v13 = vmul.f32 %v7767_v43, %v3360_v17 }
 0x371   : > { %v5982_v51 = vpop.eup %5981  ;;  %v7897_v61 = vmul.f32 0.00390625, %v2846_v7  ;;  %3699 = vmatmul.mubr.f32.gmra.mxu1 %v3507_v14  ;;  %v3434_v39 = vmul.f32 %v7774_v1, %v3359_v34  ;;  %v3237_v7 = vsub.f32 %v7501_v23, %v7849_v52 }
 0x372   : > { %v3291_v16 = vadd.f32 1e-05, %v3195_v46  ;;  %v3164_v19 = vsub.f32 %v3100_v56, %v3132_v18  ;;  %v3510_v40 = vadd.f32 %v7777_v21, %v3435_v13  ;;  %v3362_v10 = vmul.f32 %v5982_v51, %v3234_v25 }
 0x373   : > { %v3039_v4 = vpop.xlane.xlu1 %3038  ;;  %v3133_v12 = vmul.f32 %v7897_v61, %v7897_v61  ;;  %v3509_v28 = vadd.f32 %v7782_v24, %v3434_v39  ;;  %v3361_v32 = vmul.f32 %v5982_v51, %v3233_v3  ;;  %v3240_v13 = vsub.f32 %v7519_v59, %v7861_v63 }
 0x374   : > { %5989 = vrsqrt.f32 %v3291_v16  ;;  %v3196_v15 = vmax.f32 %v3164_v19, 0.0  ;;  %v3101_v11 = vmul.f32 0.00390625, %v3039_v4  ;;  %3703 = vmatprep.mubr.f32.mxu1 %v3510_v40  ;;  %v2849_v44 = vpop.xlane.xlu0 %2848  ;;  %v3437_v9 = vmul.f32 %v7767_v43, %v3362_v10 }
 0x375   : > { %v5984_v2 = vpop.eup %5983  ;;  %v7909_v31 = vmul.f32 0.00390625, %v2849_v44  ;;  %3704 = vmatmul.mubr.f32.gmra.mxu1 %v3509_v28  ;;  %v3436_v35 = vmul.f32 %v7774_v1, %v3361_v32 }
 0x376   : > { %v3292_v49 = vadd.f32 1e-05, %v3196_v15  ;;  %v3165_v48 = vsub.f32 %v3101_v11, %v3133_v12  ;;  %v3512_v20 = vadd.f32 %v7777_v21, %v3437_v9  ;;  %v3364_v45 = vmul.f32 %v5984_v2, %v3236_v22 }
 0x377   : > { %v3042_v57 = vpop.xlane.xlu1 %3041  ;;  %v3134_v30 = vmul.f32 %v7909_v31, %v7909_v31  ;;  %v3511_v54 = vadd.f32 %v7782_v24, %v3436_v35  ;;  %v3363_v47 = vmul.f32 %v5984_v2, %v3235_v55  ;;  %v3239_v15 = vsub.f32 %v7513_v0, %v7861_v63 }
 0x378   : > { %5991 = vrsqrt.f32 %v3292_v49  ;;  %v3197_v5 = vmax.f32 %v3165_v48, 0.0  ;;  %v3102_v17 = vmul.f32 0.00390625, %v3042_v57  ;;  %3708 = vmatprep.mubr.f32.mxu1 %v3512_v20  ;;  %v2852_v26 = vpop.xlane.xlu0 %2851  ;;  %v3439_v25 = vmul.f32 %v7767_v43, %v3364_v45 }
 0x379   : > { %v5986_v42 = vpop.eup %5985  ;;  %v7921_v38 = vmul.f32 0.00390625, %v2852_v26  ;;  %3709 = vmatmul.mubr.f32.gmra.mxu1 %v3511_v54  ;;  %v3438_v34 = vmul.f32 %v7774_v1, %v3363_v47  ;;  %v3242_v11 = vsub.f32 %v7531_v8, %v7873_v53  ;;  %v3244_v35 = vsub.f32 %v7543_v50, %v7885_v27 }
 0x37a   : > { %v3293_v18 = vadd.f32 1e-05, %v3197_v5  ;;  %v3166_v58 = vsub.f32 %v3102_v17, %v3134_v30  ;;  %v3514_v46 = vadd.f32 %v7777_v21, %v3439_v25  ;;  %v3366_v56 = vmul.f32 %v5986_v42, %v3238_v6 }
 0x37b   : > { %v3045_v51 = vpop.xlane.xlu1 %3044  ;;  %v3135_v14 = vmul.f32 %v7921_v38, %v7921_v38  ;;  %v3513_v23 = vadd.f32 %v7782_v24, %v3438_v34  ;;  %v3365_v59 = vmul.f32 %v5986_v42, %v3237_v7  ;;  %v3241_v30 = vsub.f32 %v7525_v33, %v7873_v53 }
 0x37c   : > { %5993 = vrsqrt.f32 %v3293_v18  ;;  %v3198_v16 = vmax.f32 %v3166_v58, 0.0  ;;  %v3103_v19 = vmul.f32 0.00390625, %v3045_v51  ;;  %3713 = vmatprep.mubr.f32.mxu1 %v3514_v46  ;;  %v2855_v40 = vpop.xlane.xlu0 %2854  ;;  %v3441_v10 = vmul.f32 %v7767_v43, %v3366_v56 }
 0x37d   : > { %v5988_v3 = vpop.eup %5987  ;;  %v7933_v52 = vmul.f32 0.00390625, %v2855_v40  ;;  %3714 = vmatmul.mubr.f32.gmra.mxu1 %v3513_v23  ;;  %v3440_v2 = vmul.f32 %v7774_v1, %v3365_v59  ;;  %v3246_v51 = vsub.f32 %v7555_v62, %v7897_v61 }
 0x37e   : > { %v3294_v22 = vadd.f32 1e-05, %v3198_v16  ;;  %v3167_v4 = vsub.f32 %v3103_v19, %v3135_v14  ;;  %v3516_v12 = vadd.f32 %v7777_v21, %v3441_v10  ;;  %v3368_v39 = vmul.f32 %v5988_v3, %v3240_v13 }
 0x37f   : > { %v3048_v44 = vpop.xlane.xlu1 %3047  ;;  %v3136_v9 = vmul.f32 %v7933_v52, %v7933_v52  ;;  %v3515_v0 = vadd.f32 %v7782_v24, %v3440_v2  ;;  %v3367_v8 = vmul.f32 %v5988_v3, %v3239_v15  ;;  %v3243_v13 = vsub.f32 %v7537_v36, %v7885_v27 }
 0x380   : > { %5995 = vrsqrt.f32 %v3294_v22  ;;  %v3199_v28 = vmax.f32 %v3167_v4, 0.0  ;;  %v3104_v32 = vmul.f32 0.00390625, %v3048_v44  ;;  %3718 = vmatprep.mubr.f32.mxu1 %v3516_v12  ;;  %v2858_v49 = vpop.xlane.xlu0 %2857  ;;  %v3443_v48 = vmul.f32 %v7767_v43, %v3368_v39 }
 0x381   : > { %v5990_v20 = vpop.eup %5989  ;;  %v7945_v63 = vmul.f32 0.00390625, %v2858_v49  ;;  %3719 = vmatmul.mubr.f32.gmra.mxu1 %v3515_v0  ;;  %v3442_v26 = vmul.f32 %v7774_v1, %v3367_v8  ;;  %v3245_v39 = vsub.f32 %v7549_v37, %v7897_v61  ;;  %v3248_v15 = vsub.f32 %v7567_v41, %v7909_v31 }
 0x382   : > { %v3295_v45 = vadd.f32 1e-05, %v3199_v28  ;;  %v3168_v55 = vsub.f32 %v3104_v32, %v3136_v9  ;;  %v3518_v6 = vadd.f32 %v7777_v21, %v3443_v48  ;;  %v3370_v57 = vmul.f32 %v5990_v20, %v3242_v11 }
 0x383   : > { %v3051_v5 = vpop.xlane.xlu1 %3050  ;;  %v3137_v17 = vmul.f32 %v7945_v63, %v7945_v63  ;;  %v3517_v33 = vadd.f32 %v7782_v24, %v3442_v26  ;;  %v3369_v50 = vmul.f32 %v5990_v20, %v3241_v30 }
 0x384   : > { %5997 = vrsqrt.f32 %v3295_v45  ;;  %v3200_v25 = vmax.f32 %v3168_v55, 0.0  ;;  %v3105_v42 = vmul.f32 0.00390625, %v3051_v5  ;;  %3723 = vmatprep.mubr.f32.mxu1 %v3518_v6  ;;  %v2861_v54 = vpop.xlane.xlu0 %2860  ;;  %v3445_v47 = vmul.f32 %v7767_v43, %v3370_v57  ;;  %v8701_v6 = vld [vmem:[#allocation18_spill] sm:$0xff] }
 0x385   : > { %v5992_v18 = vpop.eup %5991  ;;  %v7957_v53 = vmul.f32 0.00390625, %v2861_v54  ;;  %3724 = vmatmul.mubr.f32.gmra.mxu1 %v3517_v33  ;;  %v3444_v16 = vmul.f32 %v7774_v1, %v3369_v50  ;;  %v3247_v55 = vsub.f32 %v7561_v60, %v7909_v31  ;;  %v3250_v57 = vsub.f32 %v8701_v6, %v7921_v38 }
 0x386   : > { %v3296_v58 = vadd.f32 1e-05, %v3200_v25  ;;  %v3169_v46 = vsub.f32 %v3105_v42, %v3137_v17  ;;  %v3520_v56 = vadd.f32 %v7777_v21, %v3445_v47  ;;  %v3372_v7 = vmul.f32 %v5992_v18, %v3244_v35 }
 0x387   : > { %v3054_v14 = vpop.xlane.xlu1 %3053  ;;  %v3138_v34 = vmul.f32 %v7957_v53, %v7957_v53  ;;  %v3519_v36 = vadd.f32 %v7782_v24, %v3444_v16  ;;  %v3371_v62 = vmul.f32 %v5992_v18, %v3243_v13 }
 0x388   : > { %5999 = vrsqrt.f32 %v3296_v58  ;;  %v3201_v19 = vmax.f32 %v3169_v46, 0.0  ;;  %v3106_v40 = vmul.f32 0.00390625, %v3054_v14  ;;  %3728 = vmatprep.mubr.f32.mxu1 %v3520_v56  ;;  %v2864_v10 = vpop.xlane.xlu0 %2863  ;;  %v3447_v3 = vmul.f32 %v7767_v43, %v3372_v7  ;;  %v8702_v46 = vld [vmem:[#allocation17_spill] sm:$0xff]  ;;  %v8703_v7 = vld [vmem:[#allocation20_spill] sm:$0xff] }
 0x389   : > { %v5994_v23 = vpop.eup %5993  ;;  %v7969_v27 = vmul.f32 0.00390625, %v2864_v10  ;;  %3729 = vmatmul.mubr.f32.gmra.mxu1 %v3519_v36  ;;  %v3446_v9 = vmul.f32 %v7774_v1, %v3371_v62  ;;  %v3249_v56 = vsub.f32 %v8702_v46, %v7921_v38  ;;  %v3252_v13 = vsub.f32 %v8703_v7, %v7933_v52 }
 0x38a   : > { %v3297_v59 = vadd.f32 1e-05, %v3201_v19  ;;  %v3170_v22 = vsub.f32 %v3106_v40, %v3138_v34  ;;  %v3522_v4 = vadd.f32 %v7777_v21, %v3447_v3  ;;  %v3374_v12 = vmul.f32 %v5994_v23, %v3246_v51 }
 0x38b   : > { %v3057_v11 = vpop.xlane.xlu1 %3056  ;;  %v3139_v44 = vmul.f32 %v7969_v27, %v7969_v27  ;;  %v3521_v37 = vadd.f32 %v7782_v24, %v3446_v9  ;;  %v3373_v41 = vmul.f32 %v5994_v23, %v3245_v39 }
 0x38c   : > { %6001 = vrsqrt.f32 %v3297_v59  ;;  %v3202_v2 = vmax.f32 %v3170_v22, 0.0  ;;  %v3107_v28 = vmul.f32 0.00390625, %v3057_v11  ;;  %3733 = vmatprep.mubr.f32.mxu1 %v3522_v4  ;;  %v2867_v32 = vpop.xlane.xlu0 %2866  ;;  %v3449_v49 = vmul.f32 %v7767_v43, %v3374_v12  ;;  %v8704_v12 = vld [vmem:[#allocation19_spill] sm:$0xff] }
 0x38d   : > { %v5996_v48 = vpop.eup %5995  ;;  %v7981_v61 = vmul.f32 0.00390625, %v2867_v32  ;;  %3734 = vmatmul.mubr.f32.gmra.mxu1 %v3521_v37  ;;  %v3448_v5 = vmul.f32 %v7774_v1, %v3373_v41  ;;  %v3251_v39 = vsub.f32 %v8704_v12, %v7933_v52  ;;  %v5850_v12 = vld [vmem:[#allocation3 + $0x60] ss:$8 sps:$4 sm:$0xff]  }
 0x38e   : > { %v3298_v20 = vadd.f32 1e-05, %v3202_v2  ;;  %v3171_v0 = vsub.f32 %v3107_v28, %v3139_v44  ;;  %v3524_v8 = vadd.f32 %v7777_v21, %v3449_v49  ;;  %v3376_v45 = vmul.f32 %v5996_v48, %v3248_v15  ;;  %v8705_v15 = vld [vmem:[#allocation22_spill] sm:$0xff] }
 0x38f   : > { %v3060_v30 = vpop.xlane.xlu1 %3059  ;;  %v3140_v35 = vmul.f32 %v7981_v61, %v7981_v61  ;;  %v3523_v60 = vadd.f32 %v7782_v24, %v3448_v5  ;;  %v3375_v47 = vmul.f32 %v5996_v48, %v3247_v55  ;;  %v3254_v11 = vsub.f32 %v8705_v15, %v7945_v63  ;;  %v8707_v5 = vld [vmem:[#allocation24_spill] sm:$0xff] }
 0x390   : > { %6003 = vrsqrt.f32 %v3298_v20  ;;  %v3203_v17 = vmax.f32 %v3171_v0, 0.0  ;;  %v3108_v26 = vmul.f32 0.00390625, %v3060_v30  ;;  %3738 = vmatprep.mubr.f32.mxu1 %v3524_v8  ;;  %v2870_v25 = vpop.xlane.xlu0 %2869  ;;  %v3451_v42 = vmul.f32 %v7767_v43, %v3376_v45  ;;  %v5847_v0 = vld [vmem:[#allocation3 + $0x70] ss:$8 sps:$4 sm:$0xff]   ;;  %v5849_v8 = vld [vmem:[#allocation3 + $0x74] ss:$8 sps:$4 sm:$0xff]  }
 0x391   : > { %v5998_v54 = vpop.eup %5997  ;;  %v7993_v31 = vmul.f32 0.00390625, %v2870_v25  ;;  %3739 = vmatmul.mubr.f32.gmra.mxu1 %v3523_v60  ;;  %v3450_v34 = vmul.f32 %v7774_v1, %v3375_v47  ;;  %v8706_v30 = vld [vmem:[#allocation21_spill] sm:$0xff]  ;;  %4634 = vmatprep.subr.bf16.mxu0 %v5849_v8 }
 0x392   : > { %v3299_v18 = vadd.f32 1e-05, %v3203_v17  ;;  %v3172_v33 = vsub.f32 %v3108_v26, %v3140_v35  ;;  %v3526_v50 = vadd.f32 %v7777_v21, %v3451_v42  ;;  %v3378_v58 = vmul.f32 %v5998_v54, %v3250_v57  ;;  %4635 = vmatpush1.bf16.msra.mxu0 %v5847_v0 }
 0x393   : > { %v3063_v51 = vpop.xlane.xlu1 %3062  ;;  %v3141_v14 = vmul.f32 %v7993_v31, %v7993_v31  ;;  %v3525_v38 = vadd.f32 %v7782_v24, %v3450_v34  ;;  %v3377_v36 = vmul.f32 %v5998_v54, %v3249_v56  ;;  %v3253_v35 = vsub.f32 %v8706_v30, %v7945_v63  ;;  %v8709_v34 = vld [vmem:[#allocation26_spill] sm:$0xff] }
 0x394   : > { %6005 = vrsqrt.f32 %v3299_v18  ;;  %v3204_v16 = vmax.f32 %v3172_v33, 0.0  ;;  %v3109_v19 = vmul.f32 0.00390625, %v3063_v51  ;;  %3743 = vmatprep.mubr.f32.mxu1 %v3526_v50  ;;  %v2873_v40 = vpop.xlane.xlu0 %2872  ;;  %v3453_v10 = vmul.f32 %v7767_v43, %v3378_v58  ;;  %v8708_v51 = vld [vmem:[#allocation23_spill] sm:$0xff] }
 0x395   : > { %v6000_v3 = vpop.eup %5999  ;;  %v8005_v23 = vmul.f32 0.00390625, %v2873_v40  ;;  %3744 = vmatmul.mubr.f32.gmra.mxu1 %v3525_v38  ;;  %v3452_v2 = vmul.f32 %v7774_v1, %v3377_v36  ;;  %v3256_v17 = vsub.f32 %v8707_v5, %v7957_v53 }
 0x396   : > { %v3300_v62 = vadd.f32 1e-05, %v3204_v16  ;;  %v3173_v59 = vsub.f32 %v3109_v19, %v3141_v14  ;;  %v3528_v22 = vadd.f32 %v7777_v21, %v3453_v10  ;;  %v3380_v4 = vmul.f32 %v6000_v3, %v3252_v13 }
 0x397   : > { %v3066_v44 = vpop.xlane.xlu1 %3065  ;;  %v3142_v9 = vmul.f32 %v8005_v23, %v8005_v23  ;;  %v3527_v52 = vadd.f32 %v7782_v24, %v3452_v2  ;;  %v3379_v20 = vmul.f32 %v6000_v3, %v3251_v39  ;;  %v3255_v14 = vsub.f32 %v8708_v51, %v7957_v53  ;;  %v5852_v39 = vld [vmem:[#allocation3 + $0x64] ss:$8 sps:$4 sm:$0xff]   ;;  %v8710_v2 = vld [vmem:[#allocation25_spill] sm:$0xff] }
 0x398   : > { %6007 = vrsqrt.f32 %v3300_v62  ;;  %v3205_v28 = vmax.f32 %v3173_v59, 0.0  ;;  %v3110_v32 = vmul.f32 0.00390625, %v3066_v44  ;;  %3748 = vmatprep.mubr.f32.mxu1 %v3528_v22  ;;  %v2876_v49 = vpop.xlane.xlu0 %2875  ;;  %v3455_v48 = vmul.f32 %v7767_v43, %v3380_v4  ;;  %4636 = vmatprep.subr.bf16.mxu0 %v5852_v39  ;;  %v5853_v51 = vld [vmem:[#allocation3 + $0x50] ss:$8 sps:$4 sm:$0xff]  }
 0x399   : > { %v6002_v37 = vpop.eup %6001  ;;  %v8017_v41 = vmul.f32 0.00390625, %v2876_v49  ;;  %3749 = vmatmul.mubr.f32.gmra.mxu1 %v3527_v52  ;;  %v3454_v42 = vmul.f32 %v7774_v1, %v3379_v20  ;;  %v3258_v16 = vsub.f32 %v8709_v34, %v7969_v27  ;;  %4637 = vmatpush1.bf16.msra.mxu0 %v5850_v12 }
 0x39a   : > { %v3301_v45 = vadd.f32 1e-05, %v3205_v28  ;;  %v3174_v55 = vsub.f32 %v3110_v32, %v3142_v9  ;;  %v3530_v6 = vadd.f32 %v7777_v21, %v3455_v48  ;;  %v3382_v57 = vmul.f32 %v6002_v37, %v3254_v11  ;;  %v8711_v32 = vld [vmem:[#allocation28_spill] sm:$0xff] }
 0x39b   : > { %v3069_v26 = vpop.xlane.xlu1 %3068  ;;  %v3143_v25 = vmul.f32 %v8017_v41, %v8017_v41  ;;  %v3529_v63 = vadd.f32 %v7782_v24, %v3454_v42  ;;  %v3381_v58 = vmul.f32 %v6002_v37, %v3253_v35  ;;  %v3257_v28 = vsub.f32 %v8710_v2, %v7969_v27  ;;  %v8713_v42 = vld [vmem:[#allocation30_spill] sm:$0xff] }
 0x39c   : > { %6009 = vrsqrt.f32 %v3301_v45  ;;  %v3206_v54 = vmax.f32 %v3174_v55, 0.0  ;;  %v3111_v60 = vmul.f32 0.00390625, %v3069_v26  ;;  %3753 = vmatprep.mubr.f32.mxu1 %v3530_v6  ;;  %v2879_v47 = vpop.xlane.xlu0 %2878  ;;  %v3457_v18 = vmul.f32 %v7767_v43, %v3382_v57  ;;  %v8712_v26 = vld [vmem:[#allocation27_spill] sm:$0xff] }
 0x39d   : > { %v6004_v33 = vpop.eup %6003  ;;  %v8029_v50 = vmul.f32 0.00390625, %v2879_v47  ;;  %3754 = vmatmul.mubr.f32.gmra.mxu1 %v3529_v63  ;;  %v3456_v10 = vmul.f32 %v7774_v1, %v3381_v58  ;;  %v3260_v49 = vsub.f32 %v8711_v32, %v7981_v61 }
 0x39e   : > { %v3302_v46 = vadd.f32 1e-05, %v3206_v54  ;;  %v3175_v56 = vsub.f32 %v3111_v60, %v3143_v25  ;;  %v3532_v7 = vadd.f32 %v7777_v21, %v3457_v18  ;;  %v3384_v13 = vmul.f32 %v6004_v33, %v3256_v17 }
 0x39f   : > { %v3072_v19 = vpop.xlane.xlu1 %3071  ;;  %v3144_v40 = vmul.f32 %v8029_v50, %v8029_v50  ;;  %v3531_v53 = vadd.f32 %v7782_v24, %v3456_v10  ;;  %v3383_v4 = vmul.f32 %v6004_v33, %v3255_v14  ;;  %v3259_v25 = vsub.f32 %v8712_v26, %v7981_v61  ;;  %v5855_v14 = vld [vmem:[#allocation3 + $0x54] ss:$8 sps:$4 sm:$0xff]   ;;  %v5856_v26 = vld [vmem:[#allocation3 + $0x40] ss:$8 sps:$4 sm:$0xff]  }
 0x3a0   : > { %6011 = vrsqrt.f32 %v3302_v46  ;;  %v3207_v3 = vmax.f32 %v3175_v56, 0.0  ;;  %v3112_v38 = vmul.f32 0.00390625, %v3072_v19  ;;  %3758 = vmatprep.mubr.f32.mxu1 %v3532_v7  ;;  %v2882_v36 = vpop.xlane.xlu0 %2881  ;;  %v3459_v62 = vmul.f32 %v7767_v43, %v3384_v13  ;;  %v8714_v10 = vld [vmem:[#allocation29_spill] sm:$0xff]  ;;  %4638 = vmatprep.subr.bf16.mxu0 %v5855_v14 }
 0x3a1   : > { %v6006_v59 = vpop.eup %6005  ;;  %v8041_v22 = vmul.f32 0.00390625, %v2882_v36  ;;  %3759 = vmatmul.mubr.f32.gmra.mxu1 %v3531_v53  ;;  %v3458_v52 = vmul.f32 %v7774_v1, %v3383_v4  ;;  %v3262_v54 = vsub.f32 %v8713_v42, %v7993_v31  ;;  %4639 = vmatpush1.bf16.msra.mxu0 %v5853_v51 }
 0x3a2   : > { %v3303_v15 = vadd.f32 1e-05, %v3207_v3  ;;  %v3176_v11 = vsub.f32 %v3112_v38, %v3144_v40  ;;  %v3534_v44 = vadd.f32 %v7777_v21, %v3459_v62  ;;  %v3386_v9 = vmul.f32 %v6006_v59, %v3258_v16  ;;  %v8715_v38 = vld [vmem:[#allocation32_spill] sm:$0xff] }
 0x3a3   : > { %v3075_v48 = vpop.xlane.xlu1 %3074  ;;  %v3145_v37 = vmul.f32 %v8041_v22, %v8041_v22  ;;  %v3533_v27 = vadd.f32 %v7782_v24, %v3458_v52  ;;  %v3385_v57 = vmul.f32 %v6006_v59, %v3257_v28  ;;  %v3261_v3 = vsub.f32 %v8714_v10, %v7993_v31  ;;  %v8717_v52 = vld [vmem:[#allocation34_spill] sm:$0xff]  ;;  %v8721_v10 = vld [vmem:[#allocation37_spill] sm:$0xff] }
 0x3a4   : > { %6013 = vrsqrt.f32 %v3303_v15  ;;  %v3208_v20 = vmax.f32 %v3176_v11, 0.0  ;;  %v3113_v0 = vmul.f32 0.00390625, %v3075_v48  ;;  %3763 = vmatprep.mubr.f32.mxu1 %v3534_v44  ;;  %v2885_v8 = vpop.xlane.xlu0 %2884  ;;  %v3461_v45 = vmul.f32 %v7767_v43, %v3386_v9  ;;  %v8716_v48 = vld [vmem:[#allocation31_spill] sm:$0xff] }
 0x3a5   : > { %v6008_v55 = vpop.eup %6007  ;;  %v8053_v6 = vmul.f32 0.00390625, %v2885_v8  ;;  %3764 = vmatmul.mubr.f32.gmra.mxu1 %v3533_v27  ;;  %v3460_v18 = vmul.f32 %v7774_v1, %v3385_v57  ;;  %v3264_v36 = vsub.f32 %v8715_v38, %v8005_v23  ;;  %v8722_v38 = vld [vmem:[#allocation38_spill] sm:$0xff] }
 0x3a6   : > { %v3304_v30 = vadd.f32 1e-05, %v3208_v20  ;;  %v3177_v35 = vsub.f32 %v3113_v0, %v3145_v37  ;;  %v3536_v5 = vadd.f32 %v7777_v21, %v3461_v45  ;;  %v3388_v17 = vmul.f32 %v6008_v55, %v3260_v49 }
 0x3a7   : > { %v3078_v60 = vpop.xlane.xlu1 %3077  ;;  %v3146_v47 = vmul.f32 %v8053_v6, %v8053_v6  ;;  %v3535_v61 = vadd.f32 %v7782_v24, %v3460_v18  ;;  %v3387_v13 = vmul.f32 %v6008_v55, %v3259_v25  ;;  %v3263_v37 = vsub.f32 %v8716_v48, %v8005_v23  ;;  %v5858_v25 = vld [vmem:[#allocation3 + $0x44] ss:$8 sps:$4 sm:$0xff]  }
 0x3a8   : > { %6015 = vrsqrt.f32 %v3304_v30  ;;  %v3209_v33 = vmax.f32 %v3177_v35, 0.0  ;;  %v3114_v63 = vmul.f32 0.00390625, %v3078_v60  ;;  %3768 = vmatprep.mubr.f32.mxu1 %v3536_v5  ;;  %v2888_v58 = vpop.xlane.xlu0 %2887  ;;  %v3463_v46 = vmul.f32 %v7767_v43, %v3388_v17  ;;  %v8718_v35 = vld [vmem:[#allocation33_spill] sm:$0xff]  ;;  %v8719_v18 = vld [vmem:[#allocation35_spill] sm:$0xff]  ;;  %4640 = vmatprep.subr.bf16.mxu0 %v5858_v25 }
 0x3a9   : > { %v6010_v56 = vpop.eup %6009  ;;  %v8065_v7 = vmul.f32 0.00390625, %v2888_v58  ;;  %3769 = vmatmul.mubr.f32.gmra.mxu1 %v3535_v61  ;;  %v3462_v53 = vmul.f32 %v7774_v1, %v3387_v13  ;;  %v3266_v20 = vsub.f32 %v8717_v52, %v8017_v41  ;;  %v3265_v23 = vsub.f32 %v8718_v35, %v8017_v41  ;;  %v8720_v41 = vld [vmem:[#allocation36_spill] sm:$0xff]  ;;  %4641 = vmatpush1.bf16.msra.mxu0 %v5856_v26  ;;  %v5862_v35 = vld [vmem:[#allocation3 + $0x20] ss:$8 sps:$4 sm:$0xff]  }
 0x3aa   : > { %v3305_v34 = vadd.f32 1e-05, %v3209_v33  ;;  %v3178_v16 = vsub.f32 %v3114_v63, %v3146_v47  ;;  %v3538_v19 = vadd.f32 %v7777_v21, %v3463_v46  ;;  %v3390_v40 = vmul.f32 %v6010_v56, %v3262_v54  ;;  %v8727_v25 = vld [vmem:[#allocation43_spill] sm:$0xff] }
 0x3ab   : > { %v3081_v62 = vpop.xlane.xlu1 %3080  ;;  %v3147_v59 = vmul.f32 %v8065_v7, %v8065_v7  ;;  %v3537_v31 = vadd.f32 %v7782_v24, %v3462_v53  ;;  %v3389_v9 = vmul.f32 %v6010_v56, %v3261_v3  ;;  %v3267_v33 = vsub.f32 %v8719_v18, %v8029_v50 }
 0x3ac   : > { %6017 = vrsqrt.f32 %v3305_v34  ;;  %v3210_v4 = vmax.f32 %v3178_v16, 0.0  ;;  %v3115_v12 = vmul.f32 0.00390625, %v3081_v62  ;;  %3773 = vmatprep.mubr.f32.mxu1 %v3538_v19  ;;  %v2891_v39 = vpop.xlane.xlu0 %2890  ;;  %v3465_v15 = vmul.f32 %v7767_v43, %v3390_v40 }
 0x3ad   : > { %v6012_v11 = vpop.eup %6011  ;;  %v8077_v44 = vmul.f32 0.00390625, %v2891_v39  ;;  %3774 = vmatmul.mubr.f32.gmra.mxu1 %v3537_v31  ;;  %v3464_v45 = vmul.f32 %v7774_v1, %v3389_v9  ;;  %v3268_v46 = vsub.f32 %v8720_v41, %v8029_v50  ;;  %v3269_v3 = vsub.f32 %v8721_v10, %v8041_v22  ;;  %v8723_v31 = vld [vmem:[#allocation39_spill] sm:$0xff]  ;;  %v5879_v10 = vld [vmem:[#allocation3 + $0xd4] ss:$8 sps:$4 sm:$0xff]  }
 0x3ae   : > { %v3306_v2 = vadd.f32 1e-05, %v3210_v4  ;;  %v3179_v28 = vsub.f32 %v3115_v12, %v3147_v59  ;;  %v3540_v32 = vadd.f32 %v7777_v21, %v3465_v15  ;;  %v3392_v49 = vmul.f32 %v6012_v11, %v3264_v36  ;;  %v5859_v4 = vld [vmem:[#allocation3 + $0x30] ss:$8 sps:$4 sm:$0xff]   ;;  %v5861_v12 = vld [vmem:[#allocation3 + $0x34] ss:$8 sps:$4 sm:$0xff]  }
 0x3af   : > { %v3084_v0 = vpop.xlane.xlu1 %3083  ;;  %v3148_v8 = vmul.f32 %v8077_v44, %v8077_v44  ;;  %v3539_v5 = vadd.f32 %v7782_v24, %v3464_v45  ;;  %v3391_v17 = vmul.f32 %v6012_v11, %v3263_v37  ;;  %v3270_v36 = vsub.f32 %v8722_v38, %v8041_v22  ;;  %4642 = vmatprep.subr.bf16.mxu0 %v5861_v12  ;;  %v8724_v22 = vld [vmem:[#allocation40_spill] sm:$0xff]  ;;  %v5885_v38 = vld [vmem:[#allocation3 + $0xb4] ss:$8 sps:$4 sm:$0xff]  }
 0x3b0   : > { %6019 = vrsqrt.f32 %v3306_v2  ;;  %v3211_v55 = vmax.f32 %v3179_v28, 0.0  ;;  %v3116_v27 = vmul.f32 0.00390625, %v3084_v0  ;;  %3778 = vmatprep.mubr.f32.mxu1 %v3540_v32  ;;  %v3467_v57 = vmul.f32 %v7767_v43, %v3392_v49  ;;  %4643 = vmatpush1.bf16.msra.mxu0 %v5859_v4  ;;  %v8138_v4 = vld [vmem:[#allocation2] ss:$0 sm:$0xff] }
 0x3b1   : > { %v6014_v30 = vpop.eup %6013  ;;  %3779 = vmatmul.mubr.f32.gmra.mxu1 %v3539_v5  ;;  %v3466_v63 = vmul.f32 %v7774_v1, %v3391_v17  ;;  %v3271_v9 = vsub.f32 %v8723_v31, %v8053_v6  ;;  %v3272_v28 = vsub.f32 %v8724_v22, %v8053_v6 }
 0x3b2   : > { %v3307_v42 = vadd.f32 1e-05, %v3211_v55  ;;  %v3180_v54 = vsub.f32 %v3116_v27, %v3148_v8  ;;  %v3542_v60 = vadd.f32 %v7777_v21, %v3467_v57  ;;  %v3394_v47 = vmul.f32 %v6014_v30, %v3266_v20  ;;  %v8725_v8 = vld [vmem:[#allocation41_spill] sm:$0xff]  ;;  %v8726_v55 = vld [vmem:[#allocation42_spill] sm:$0xff] }
 0x3b3   : > { %v3393_v58 = vmul.f32 %v6014_v30, %v3265_v23  ;;  %v3541_v51 = vadd.f32 %v7782_v24, %v3466_v63  ;;  %v3273_v45 = vsub.f32 %v8725_v8, %v8065_v7  ;;  %v3274_v6 = vsub.f32 %v8726_v55, %v8065_v7  ;;  %v5864_v23 = vld [vmem:[#allocation3 + $0x24] ss:$8 sps:$4 sm:$0xff]  }
 0x3b4   : > { %6021 = vrsqrt.f32 %v3307_v42  ;;  %v3212_v56 = vmax.f32 %v3180_v54, 0.0  ;;  %3783 = vmatprep.mubr.f32.mxu1 %v3542_v60  ;;  %v3469_v61 = vmul.f32 %v7767_v43, %v3394_v47  ;;  %v3275_v42 = vsub.f32 %v8727_v25, %v8077_v44  ;;  %4644 = vmatprep.subr.bf16.mxu0 %v5864_v23  ;;  %v8728_v7 = vld [vmem:[#allocation44_spill] sm:$0xff] }
 0x3b5   : > { %v6016_v13 = vpop.eup %6015  ;;  %v3468_v14 = vmul.f32 %v7774_v1, %v3393_v58  ;;  %3784 = vmatmul.mubr.f32.gmra.mxu1 %v3541_v51  ;;  %v3276_v60 = vsub.f32 %v8728_v7, %v8077_v44  ;;  %4645 = vmatpush1.bf16.msra.mxu0 %v5862_v35  ;;  %v5865_v44 = vld [vmem:[#allocation3 + $0x10] ss:$8 sps:$4 sm:$0xff]  }
 0x3b6   : > { %v3308_v34 = vadd.f32 1e-05, %v3212_v56  ;;  %v3544_v16 = vadd.f32 %v7777_v21, %v3469_v61  ;;  %v3396_v19 = vmul.f32 %v6016_v13, %v3268_v46  ;;  %v3395_v40 = vmul.f32 %v6016_v13, %v3267_v33  ;;  %v5867_v13 = vld [vmem:[#allocation3 + $0x14] ss:$8 sps:$4 sm:$0xff]  }
 0x3b7   : > { %v3543_v50 = vadd.f32 %v7782_v24, %v3468_v14  ;;  %4646 = vmatprep.subr.bf16.mxu0 %v5867_v13 }
 0x3b8   : > { %6023 = vrsqrt.f32 %v3308_v34  ;;  %3788 = vmatprep.mubr.f32.mxu1 %v3544_v16  ;;  %v3471_v62 = vmul.f32 %v7767_v43, %v3396_v19  ;;  %v3470_v59 = vmul.f32 %v7774_v1, %v3395_v40  ;;  %v5868_v34 = vld [vmem:[#allocation3] ss:$8 sps:$4 sm:$0xff]   ;;  %v5870_v16 = vld [vmem:[#allocation3 + $0x4] ss:$8 sps:$4 sm:$0xff]   ;;  %v5871_v19 = vld [vmem:[#allocation3 + $0xf0] ss:$8 sps:$4 sm:$0xff]  }
 0x3b9   : > { %v6018_v53 = vpop.eup %6017  ;;  %3789 = vmatmul.mubr.f32.gmra.mxu1 %v3543_v50  ;;  %4647 = vmatpush1.bf16.msra.mxu0 %v5865_v44  ;;  %v5873_v40 = vld [vmem:[#allocation3 + $0xf4] ss:$8 sps:$4 sm:$0xff]   ;;  %v5883_v50 = vld [vmem:[#allocation3 + $0xb0] ss:$8 sps:$4 sm:$0xff]  }
 0x3ba   : > { %v3546_v39 = vadd.f32 %v7777_v21, %v3471_v62  ;;  %v3398_v15 = vmul.f32 %v6018_v53, %v3270_v36  ;;  %v3397_v11 = vmul.f32 %v6018_v53, %v3269_v3  ;;  %v3545_v2 = vadd.f32 %v7782_v24, %v3470_v59  ;;  %4648 = vmatprep.subr.bf16.mxu0 %v5870_v16  ;;  %v5882_v3 = vld [vmem:[#allocation3 + $0xc4] ss:$8 sps:$4 sm:$0xff]   ;;  %v5886_v36 = vld [vmem:[#allocation3 + $0xa0] ss:$8 sps:$4 sm:$0xff]   ;;  %v5889_v59 = vld [vmem:[#allocation3 + $0x90] ss:$8 sps:$4 sm:$0xff]  }
 0x3bb   : > { %v5888_v62 = vld [vmem:[#allocation3 + $0xa4] ss:$8 sps:$4 sm:$0xff]   ;;  %v5891_v53 = vld [vmem:[#allocation3 + $0x94] ss:$8 sps:$4 sm:$0xff]  }
 0x3bc   : > { %3793 = vmatprep.mubr.f32.mxu1 %v3546_v39  ;;  %v3473_v32 = vmul.f32 %v7767_v43, %v3398_v15  ;;  %v3472_v49 = vmul.f32 %v7774_v1, %v3397_v11  ;;  %v5892_v39 = vld [vmem:[#allocation3 + $0x80] ss:$8 sps:$4 sm:$0xff]   ;;  %v5894_v15 = vld [vmem:[#allocation3 + $0x84] ss:$8 sps:$4 sm:$0xff]  }
 0x3bd   : > { %v6020_v48 = vpop.eup %6019  ;;  %3794 = vmatmul.mubr.f32.gmra.mxu1 %v3545_v2  ;;  %4649 = vmatpush1.bf16.msra.mxu0 %v5868_v34 }
 0x3be   : > { %v3548_v37 = vadd.f32 %v7777_v21, %v3473_v32  ;;  %v3400_v52 = vmul.f32 %v6020_v48, %v3272_v28  ;;  %v3399_v20 = vmul.f32 %v6020_v48, %v3271_v9  ;;  %v3547_v0 = vadd.f32 %v7782_v24, %v3472_v49  ;;  %4650 = vmatprep.subr.bf16.mxu0 %v5873_v40 }
 0x3c0   : > { %3798 = vmatprep.mubr.f32.mxu1 %v3548_v37  ;;  %v3475_v27 = vmul.f32 %v7767_v43, %v3400_v52  ;;  %v3474_v57 = vmul.f32 %v7774_v1, %v3399_v20 }
 0x3c1   : > { %v6022_v30 = vpop.eup %6021  ;;  %3799 = vmatmul.mubr.f32.gmra.mxu1 %v3547_v0  ;;  %4651 = vmatpush2.bf16.msra.mxu0 %v5871_v19 }
 0x3c2   : > { %v3550_v5 = vadd.f32 %v7777_v21, %v3475_v27  ;;  %v3402_v17 = vmul.f32 %v6022_v30, %v3274_v6  ;;  %v3401_v26 = vmul.f32 %v6022_v30, %v3273_v45  ;;  %v3549_v54 = vadd.f32 %v7782_v24, %v3474_v57 }
 0x3c4   : > { %3803 = vmatprep.mubr.f32.mxu1 %v3550_v5  ;;  %v3477_v47 = vmul.f32 %v7767_v43, %v3402_v17  ;;  %v3476_v18 = vmul.f32 %v7774_v1, %v3401_v26 }
 0x3c5   : > { %v6024_v33 = vpop.eup %6023  ;;  %3804 = vmatmul.mubr.f32.gmra.mxu1 %v3549_v54 }
 0x3c6   : > { %v3552_v63 = vadd.f32 %v7777_v21, %v3477_v47  ;;  %v3404_v58 = vmul.f32 %v6024_v33, %v3276_v60  ;;  %v3403_v41 = vmul.f32 %v6024_v33, %v3275_v42  ;;  %v3551_v46 = vadd.f32 %v7782_v24, %v3476_v18 }
 0x3c8   : > { %3808 = vmatprep.mubr.f32.mxu1 %v3552_v63  ;;  %v3479_v56 = vmul.f32 %v7767_v43, %v3404_v58  ;;  %v3478_v61 = vmul.f32 %v7774_v1, %v3403_v41  ;;  %v5874_v1 = vld [vmem:[#allocation3 + $0xe0] ss:$8 sps:$4 sm:$0xff]   ;;  %v5876_v43 = vld [vmem:[#allocation3 + $0xe4] ss:$8 sps:$4 sm:$0xff]  }
 0x3c9   : > { %3809 = vmatmul.mubr.f32.gmra.mxu1 %v3551_v46  ;;  %4652 = vmatprep.subr.bf16.mxu0 %v5876_v43 }
 0x3ca   : > { %v3554_v51 = vadd.f32 %v7777_v21, %v3479_v56  ;;  %v3553_v14 = vadd.f32 %v7782_v24, %v3478_v61  ;;  %4653 = vmatpush2.bf16.msra.mxu0 %v5874_v1  ;;  %v5877_v21 = vld [vmem:[#allocation3 + $0xd0] ss:$8 sps:$4 sm:$0xff]   ;;  %v5880_v24 = vld [vmem:[#allocation3 + $0xc0] ss:$8 sps:$4 sm:$0xff]  }
 0x3cb   : > { %4654 = vmatprep.subr.bf16.mxu0 %v5879_v10 }
 0x3cc   : > { %3813 = vmatprep.mubr.f32.mxu1 %v3554_v51 }
 0x3cd   : > { %3814 = vmatmul.mubr.f32.gmra.mxu1 %v3553_v14 }
 0x3ce   : > { %4655 = vmatpush2.bf16.msra.mxu0 %v5877_v21 }
 0x3cf   : > { %4656 = vmatprep.subr.bf16.mxu0 %v5882_v3 }
 0x3d2   : > { %4657 = vmatpush2.bf16.msra.mxu0 %v5880_v24 }
 0x3d3   : > { %4658 = vmatprep.subr.bf16.mxu0 %v5885_v38 }
 0x3d6   : > { %4659 = vmatpush2.bf16.msra.mxu0 %v5883_v50 }
 0x3d7   : > { %4660 = vmatprep.subr.bf16.mxu0 %v5888_v62 }
 0x3da   : > { %4661 = vmatpush2.bf16.msra.mxu0 %v5886_v36 }
 0x3db   : > { %4662 = vmatprep.subr.bf16.mxu0 %v5891_v53 }
 0x3de   : > { %4663 = vmatpush2.bf16.msra.mxu0 %v5889_v59 }
 0x3df   : > { %4664 = vmatprep.subr.bf16.mxu0 %v5894_v15 }
 0x3e2   : > { %4665 = vmatpush2.bf16.msra.mxu0 %v5892_v39 }
 0x411   : > { %v3660_v12 = vpop.f32.mrf.mxu1 }
 0x412   : > { %v8141_v11 = vadd.f32 %v8138_v4, %v3660_v12 }
 0x413   : > { %v3662_v31 = vpop.f32.mrf.mxu1 }
 0x414   : > { %3909 = vperm.xlu0 %5748, %v8141_v11  }
 0x415   : > { %v3665_v9 = vpop.f32.mrf.mxu1 }
 0x416   : > { %v8145_v2 = vadd.f32 %v8138_v4, %v3665_v9 }
 0x417   : > { %v3667_v22 = vpop.f32.mrf.mxu1 }
 0x418   : > { %3914 = vperm.xlu1 %5749, %v8145_v2  }
 0x419   : > { %v3670_v28 = vpop.f32.mrf.mxu1 }
 0x41a   : > { %v8149_v32 = vadd.f32 %v8138_v4, %v3670_v28 }
 0x41b   : > { %v3672_v49 = vpop.f32.mrf.mxu1 }
 0x41c   : > { %3919 = vperm.xlu1 %5749, %v8149_v32  }
 0x41d   : > { %v3675_v48 = vpop.f32.mrf.mxu1 }
 0x41e   : > { %v8153_v37 = vadd.f32 %v8138_v4, %v3675_v48 }
 0x41f   : > { %v3677_v52 = vpop.f32.mrf.mxu1 }
 0x420   : > { %3924 = vperm.xlu1 %5749, %v8153_v37  }
 0x421   : > { %v3680_v20 = vpop.f32.mrf.mxu1 }
 0x422   : > { %v8157_v0 = vadd.f32 %v8138_v4, %v3680_v20 }
 0x423   : > { %v3682_v8 = vpop.f32.mrf.mxu1 }
 0x424   : > { %3929 = vperm.xlu1 %5749, %v8157_v0  }
 0x425   : > { %v3685_v45 = vpop.f32.mrf.mxu1 }
 0x426   : > { %v8161_v55 = vadd.f32 %v8138_v4, %v3685_v45 }
 0x427   : > { %v3687_v6 = vpop.f32.mrf.mxu1 }
 0x428   : > { %3934 = vperm.xlu1 %5749, %v8161_v55  }
 0x429   : > { %v3690_v27 = vpop.f32.mrf.mxu1 }
 0x42a   : > { %v8165_v57 = vadd.f32 %v8138_v4, %v3690_v27 }
 0x42b   : > { %v3692_v30 = vpop.f32.mrf.mxu1 }
 0x42c   : > { %3939 = vperm.xlu1 %5749, %v8165_v57  }
 0x42d   : > { %v3695_v35 = vpop.f32.mrf.mxu1 }
 0x42e   : > { %v8169_v23 = vadd.f32 %v8138_v4, %v3695_v35 }
 0x42f   : > { %v3697_v5 = vpop.f32.mrf.mxu1 }
 0x430   : > { %3944 = vperm.xlu1 %5749, %v8169_v23  }
 0x431   : > { %v3700_v17 = vpop.f32.mrf.mxu1 }
 0x432   : > { %v8173_v26 = vadd.f32 %v8138_v4, %v3700_v17 }
 0x433   : > { %v3702_v25 = vpop.f32.mrf.mxu1 }
 0x434   : > { %3949 = vperm.xlu1 %5749, %v8173_v26  }
 0x435   : > { %v3705_v42 = vpop.f32.mrf.mxu1 }
 0x436   : > { %v8177_v54 = vadd.f32 %v8138_v4, %v3705_v42 }
 0x437   : > { %v3707_v7 = vpop.f32.mrf.mxu1 }
 0x438   : > { %3954 = vperm.xlu0 %5748, %v8177_v54  }
 0x439   : > { %v3710_v60 = vpop.f32.mrf.mxu1 }
 0x43a   : > { %v8181_v47 = vadd.f32 %v8138_v4, %v3710_v60 }
 0x43b   : > { %v3712_v18 = vpop.f32.mrf.mxu1 }
 0x43c   : > { %3959 = vperm.xlu1 %5749, %v8181_v47  }
 0x43d   : > { %v3715_v33 = vpop.f32.mrf.mxu1 }
 0x43e   : > { %v8185_v63 = vadd.f32 %v8138_v4, %v3715_v33 }
 0x43f   : > { %v3717_v58 = vpop.f32.mrf.mxu1 }
 0x440   : > { %3964 = vperm.xlu0 %5748, %v8185_v63  }
 0x441   : > { %v3720_v41 = vpop.f32.mrf.mxu1 }
 0x442   : > { %v8189_v46 = vadd.f32 %v8138_v4, %v3720_v41 }
 0x443   : > { %v3722_v56 = vpop.f32.mrf.mxu1 }
 0x444   : > { %3969 = vperm.xlu1 %5749, %v8189_v46  }
 0x445   : > { %v3725_v61 = vpop.f32.mrf.mxu1 }
 0x446   : > { %v8193_v44 = vadd.f32 %v8138_v4, %v3725_v61 }
 0x447   : > { %v3727_v13 = vpop.f32.mrf.mxu1 }
 0x448   : > { %3974 = vperm.xlu0 %5748, %v8193_v44  }
 0x449   : > { %v3730_v51 = vpop.f32.mrf.mxu1 }
 0x44a   : > { %v8197_v14 = vadd.f32 %v8138_v4, %v3730_v51  ;;  %v3906_v51 = vld [vmem:[%s8609_s11] sm:$0x3] }
 0x44b   : > { %v3732_v34 = vpop.f32.mrf.mxu1 }
 0x44c   : > { %3979 = vperm.xlu1 %5749, %v8197_v14   ;;  %v4142_v34 = vld [vmem:[%s8610_s12] sm:$0x3] }
 0x44d   : > { %v3735_v16 = vpop.f32.mrf.mxu1 }
 0x44e   : > { %v8201_v19 = vadd.f32 %v8138_v4, %v3735_v16 }
 0x44f   : > { %v3737_v40 = vpop.f32.mrf.mxu1 }
 0x450   : > { %3984 = vperm.xlu0 %5748, %v8201_v19  }
 0x451   : > { %v3740_v1 = vpop.f32.mrf.mxu1 }
 0x452   : > { %v8205_v43 = vadd.f32 %v8138_v4, %v3740_v1 }
 0x453   : > { %v3742_v21 = vpop.f32.mrf.mxu1 }
 0x454   : > { %3989 = vperm.xlu1 %5749, %v8205_v43   ;;  %v8270_v21 = vrot.slane %v3906_v51, %v7281_v29 }
 0x455   : > { %v3745_v10 = vpop.f32.mrf.mxu1 }
 0x456   : > { %v8209_v24 = vadd.f32 %v8138_v4, %v3745_v10  ;;  %v8273_v10 = vrot.slane %v4142_v34, %v7281_v29 }
 0x457   : > { %v3747_v3 = vpop.f32.mrf.mxu1 }
 0x458   : > { %3994 = vperm.xlu0 %5748, %v8209_v24   ;;  %v8729_v3 = vld [vmem:[#allocation16_spill] sm:$0xff] }
 0x459   : > { %v3750_v50 = vpop.f32.mrf.mxu1 }
 0x45a   : > { %v8213_v38 = vadd.f32 %v8138_v4, %v3750_v50  ;;  %v8277_v50 = vrot.slane %v3906_v51, %v8729_v3 }
 0x45b   : > { %v3752_v36 = vpop.f32.mrf.mxu1 }
 0x45c   : > { %3999 = vperm.xlu1 %5749, %v8213_v38   ;;  %v8280_v36 = vrot.slane %v4142_v34, %v8729_v3 }
 0x45d   : > { %v3755_v62 = vpop.f32.mrf.mxu1 }
 0x45e   : > { %v8217_v59 = vadd.f32 %v8138_v4, %v3755_v62 }
 0x45f   : > { %v3757_v53 = vpop.f32.mrf.mxu1 }
 0x460   : > { %4004 = vperm.xlu0 %5748, %v8217_v59  }
 0x461   : > { %v3760_v12 = vpop.f32.mrf.mxu1 }
 0x462   : > { %v8221_v39 = vadd.f32 %v8138_v4, %v3760_v12 }
 0x463   : > { %v3762_v15 = vpop.f32.mrf.mxu1 }
 0x464   : > { %4009 = vperm.xlu1 %5749, %v8221_v39  }
 0x465   : > { %v3765_v31 = vpop.f32.mrf.mxu1 }
 0x466   : > { %v8225_v9 = vadd.f32 %v8138_v4, %v3765_v31 }
 0x467   : > { %v3767_v22 = vpop.f32.mrf.mxu1 }
 0x468   : > { %4014 = vperm.xlu0 %5748, %v8225_v9   ;;  %v6172_v22 = vmov 1.0|1.0  }
 0x469   : > { %v3770_v28 = vpop.f32.mrf.mxu1 }
 0x46a   : > { %v8229_v49 = vadd.f32 %v8138_v4, %v3770_v28 }
 0x46b   : > { %v3772_v48 = vpop.f32.mrf.mxu1 }
 0x46c   : > { %4019 = vperm.xlu1 %5749, %v8229_v49  }
 0x46d   : > { %v3775_v52 = vpop.f32.mrf.mxu1 }
 0x46e   : > { %v8233_v20 = vadd.f32 %v8138_v4, %v3775_v52 }
 0x46f   : > { %v3777_v8 = vpop.f32.mrf.mxu1 }
 0x470   : > { %4024 = vperm.xlu0 %5748, %v8233_v20  }
 0x471   : > { %v3780_v45 = vpop.f32.mrf.mxu1 }
 0x472   : > { %v8237_v6 = vadd.f32 %v8138_v4, %v3780_v45 }
 0x473   : > { %v3782_v27 = vpop.f32.mrf.mxu1 }
 0x474   : > { %4029 = vperm.xlu1 %5749, %v8237_v6  }
 0x475   : > { %v3785_v30 = vpop.f32.mrf.mxu1 }
 0x476   : > { %v8241_v35 = vadd.f32 %v8138_v4, %v3785_v30 }
 0x477   : > { %v3787_v5 = vpop.f32.mrf.mxu1 }
 0x478   : > { %4034 = vperm.xlu0 %5748, %v8241_v35  }
 0x479   : > { %v3790_v17 = vpop.f32.mrf.mxu1 }
 0x47a   : > { %v8245_v25 = vadd.f32 %v8138_v4, %v3790_v17  ;;  %v8732_v17 = vld [vmem:[#allocation15_spill] sm:$0xff] }
 0x47b   : > { %v3792_v42 = vpop.f32.mrf.mxu1 }
 0x47c   : > { %4039 = vperm.xlu1 %5749, %v8245_v25  }
 0x47d   : > { %v3795_v7 = vpop.f32.mrf.mxu1 }
 0x47e   : > { %v8249_v60 = vadd.f32 %v8138_v4, %v3795_v7 }
 0x47f   : > { %v3797_v18 = vpop.f32.mrf.mxu1 }
 0x480   : > { %4044 = vperm.xlu0 %5748, %v8249_v60  }
 0x481   : > { %v3800_v33 = vpop.f32.mrf.mxu1 }
 0x482   : > { %v8253_v58 = vadd.f32 %v8138_v4, %v3800_v33  ;;  %v8733_v33 = vlaneseq }
 0x483   : > { %v3802_v41 = vpop.f32.mrf.mxu1 }
 0x484   : > { %4049 = vperm.xlu1 %5749, %v8253_v58  }
 0x485   : > { %v3805_v56 = vpop.f32.mrf.mxu1 }
 0x486   : > { %v8257_v61 = vadd.f32 %v8138_v4, %v3805_v56 }
 0x487   : > { %v3807_v13 = vpop.f32.mrf.mxu1 }
 0x488   : > { %4054 = vperm.xlu0 %5748, %v8257_v61  }
 0x489   : > { %v3810_v16 = vpop.f32.mrf.mxu1 }
 0x48a   : > { %v8267_v40 = vadd.f32 %v8138_v4, %v3810_v16 }
 0x48b   : > { %v3812_v1 = vpop.f32.mrf.mxu1 }
 0x48c   : > { %4059 = vperm.xlu1 %5749, %v8267_v40  }
 0x48d   : > { %v3815_v62 = vpop.f32.mrf.mxu1 }
 0x48e   : > { %v8283_v12 = vadd.f32 %v8138_v4, %v3815_v62 }
 0x48f   : > { %v3910_v53 = vpop.permute.xlu0 %3909  ;;  %v3817_v15 = vpop.f32.mrf.mxu1 }
 0x490   : > { %vm4078_vm6 = vcmp.gt.f32.partialorder %v3910_v53, %v8270_v21  ;;  %vm4154_vm7 = vcmp.le.f32.partialorder %v3910_v53, %v8273_v10  ;;  %4064 = vperm.xlu0 %5748, %v8283_v12   ;;  %vm4079_vm8 = vcmp.gt.f32.partialorder %v3910_v53, %v8277_v50  ;;  %vm4155_vm9 = vcmp.le.f32.partialorder %v3910_v53, %v8280_v36 }
 0x491   : > { %vm8290_vm10 = vmand %vm4078_vm6, %vm4154_vm7 }
 0x492   : > { %vm4219_vm15 = vmand %vm4079_vm8, %vm4155_vm9 }
 0x493   : > { %v3915_v31 = vpop.permute.xlu1 %3914 }
 0x494   : > { %vm4080_vm11 = vcmp.gt.f32.partialorder %v3915_v31, %v8270_v21  ;;  %vm4156_vm12 = vcmp.le.f32.partialorder %v3915_v31, %v8273_v10  ;;  %vm4081_vm13 = vcmp.gt.f32.partialorder %v3915_v31, %v8277_v50  ;;  %vm4157_vm14 = vcmp.le.f32.partialorder %v3915_v31, %v8280_v36 }
 0x495   : > { %vm4220_vm0 = vmand %vm4080_vm11, %vm4156_vm12 }
 0x496   : > { %vm5405_vm1 = vmpackc.low %vm4220_vm0, %vm8290_vm10 }
 0x497   : > { %v3920_v4 = vpop.permute.xlu1 %3919  ;;  %vm4221_vm2 = vmand %vm4081_vm13, %vm4157_vm14 }
 0x498   : > { %vm5403_vm3 = vmpackc.low %vm4221_vm2, %vm4219_vm15  ;;  %vm4083_vm4 = vcmp.gt.f32.partialorder %v3920_v4, %v8277_v50  ;;  %vm4159_vm5 = vcmp.le.f32.partialorder %v3920_v4, %v8280_v36  ;;  %vm4082_vm6 = vcmp.gt.f32.partialorder %v3920_v4, %v8270_v21  ;;  %vm4158_vm7 = vcmp.le.f32.partialorder %v3920_v4, %v8273_v10 }
 0x499   : > { %5404 = vmatprep.mubr.msk.bf16.mxu0 %vm5403_vm3, %v6172_v22  ;;  %vm4223_vm8 = vmand %vm4083_vm4, %vm4159_vm5 }
 0x49a   : > { %5406 = vmatmul.mubr.msk.bf16.vlgmr.msra.gmra.mxu0 %vm5405_vm1, %v6172_v22  ;;  %vm4222_vm13 = vmand %vm4082_vm6, %vm4158_vm7 }
 0x49b   : > { %v3925_v28 = vpop.permute.xlu1 %3924 }
 0x49c   : > { %vm4085_vm9 = vcmp.gt.f32.partialorder %v3925_v28, %v8277_v50  ;;  %vm4161_vm10 = vcmp.le.f32.partialorder %v3925_v28, %v8280_v36  ;;  %vm4084_vm11 = vcmp.gt.f32.partialorder %v3925_v28, %v8270_v21  ;;  %vm4160_vm12 = vcmp.le.f32.partialorder %v3925_v28, %v8273_v10 }
 0x49d   : > { %vm4225_vm14 = vmand %vm4085_vm9, %vm4161_vm10 }
 0x49e   : > { %vm5407_vm15 = vmpackc.low %vm4225_vm14, %vm4223_vm8 }
 0x49f   : > { %v3930_v48 = vpop.permute.xlu1 %3929  ;;  %5408 = vmatprep.mubr.msk.bf16.mxu0 %vm5407_vm15, %v6172_v22  ;;  %vm4224_vm0 = vmand %vm4084_vm11, %vm4160_vm12 }
 0x4a0   : > { %vm5409_vm2 = vmpackc.low %vm4224_vm0, %vm4222_vm13  ;;  %vm4087_vm1 = vcmp.gt.f32.partialorder %v3930_v48, %v8277_v50  ;;  %vm4163_vm3 = vcmp.le.f32.partialorder %v3930_v48, %v8280_v36  ;;  %vm4086_vm4 = vcmp.gt.f32.partialorder %v3930_v48, %v8270_v21  ;;  %vm4162_vm5 = vcmp.le.f32.partialorder %v3930_v48, %v8273_v10 }
 0x4a1   : > { %vm4227_vm6 = vmand %vm4087_vm1, %vm4163_vm3 }
 0x4a2   : > { %5410 = vmatmul.mubr.msk.bf16.gmra.mxu0 %vm5409_vm2, %v6172_v22  ;;  %vm4226_vm11 = vmand %vm4086_vm4, %vm4162_vm5 }
 0x4a3   : > { %v3935_v52 = vpop.permute.xlu1 %3934 }
 0x4a4   : > { %vm4089_vm7 = vcmp.gt.f32.partialorder %v3935_v52, %v8277_v50  ;;  %vm4165_vm8 = vcmp.le.f32.partialorder %v3935_v52, %v8280_v36  ;;  %vm4088_vm9 = vcmp.gt.f32.partialorder %v3935_v52, %v8270_v21  ;;  %vm4164_vm10 = vcmp.le.f32.partialorder %v3935_v52, %v8273_v10 }
 0x4a5   : > { %vm4229_vm12 = vmand %vm4089_vm7, %vm4165_vm8 }
 0x4a6   : > { %vm5411_vm13 = vmpackc.low %vm4229_vm12, %vm4227_vm6 }
 0x4a7   : > { %v3940_v8 = vpop.permute.xlu1 %3939  ;;  %5412 = vmatprep.mubr.msk.bf16.mxu0 %vm5411_vm13, %v6172_v22  ;;  %vm4228_vm14 = vmand %vm4088_vm9, %vm4164_vm10 }
 0x4a8   : > { %vm5413_vm15 = vmpackc.low %vm4228_vm14, %vm4226_vm11  ;;  %vm4091_vm0 = vcmp.gt.f32.partialorder %v3940_v8, %v8277_v50  ;;  %vm4167_vm2 = vcmp.le.f32.partialorder %v3940_v8, %v8280_v36  ;;  %vm4090_vm1 = vcmp.gt.f32.partialorder %v3940_v8, %v8270_v21  ;;  %vm4166_vm3 = vcmp.le.f32.partialorder %v3940_v8, %v8273_v10 }
 0x4a9   : > { %vm4231_vm4 = vmand %vm4091_vm0, %vm4167_vm2 }
 0x4aa   : > { %5414 = vmatmul.mubr.msk.bf16.gmra.mxu0 %vm5413_vm15, %v6172_v22  ;;  %vm4230_vm9 = vmand %vm4090_vm1, %vm4166_vm3 }
 0x4ab   : > { %v3945_v45 = vpop.permute.xlu1 %3944 }
 0x4ac   : > { %vm4092_vm5 = vcmp.gt.f32.partialorder %v3945_v45, %v8270_v21  ;;  %vm4168_vm6 = vcmp.le.f32.partialorder %v3945_v45, %v8273_v10  ;;  %vm4093_vm7 = vcmp.gt.f32.partialorder %v3945_v45, %v8277_v50  ;;  %vm4169_vm8 = vcmp.le.f32.partialorder %v3945_v45, %v8280_v36 }
 0x4ad   : > { %vm4233_vm10 = vmand %vm4093_vm7, %vm4169_vm8 }
 0x4ae   : > { %3851 = vxpose.xlu0.b32.start [1/16] (narrow) %v8205_v43, 8  ;;  %vm5415_vm11 = vmpackc.low %vm4233_vm10, %vm4231_vm4 }
 0x4af   : > { %v3950_v27 = vpop.permute.xlu1 %3949  ;;  %5416 = vmatprep.mubr.msk.bf16.mxu0 %vm5415_vm11, %v6172_v22  ;;  %vm4232_vm12 = vmand %vm4092_vm5, %vm4168_vm6 }
 0x4b0   : > { %vm5417_vm13 = vmpackc.low %vm4232_vm12, %vm4230_vm9  ;;  %vm4095_vm14 = vcmp.gt.f32.partialorder %v3950_v27, %v8277_v50  ;;  %vm4171_vm15 = vcmp.le.f32.partialorder %v3950_v27, %v8280_v36  ;;  %vm4094_vm0 = vcmp.gt.f32.partialorder %v3950_v27, %v8270_v21  ;;  %vm4170_vm2 = vcmp.le.f32.partialorder %v3950_v27, %v8273_v10 }
 0x4b1   : > { %vm4235_vm1 = vmand %vm4095_vm14, %vm4171_vm15 }
 0x4b2   : > { %5418 = vmatmul.mubr.msk.bf16.gmra.mxu0 %vm5417_vm13, %v6172_v22  ;;  %3852 = vxpose.xlu0.b32.cont [2/16] (narrow) %v8209_v24, 8  ;;  %vm4234_vm7 = vmand %vm4094_vm0, %vm4170_vm2 }
 0x4b3   : > { %v3955_v30 = vpop.permute.xlu0 %3954 }
 0x4b4   : > { %vm4096_vm3 = vcmp.gt.f32.partialorder %v3955_v30, %v8270_v21  ;;  %vm4172_vm4 = vcmp.le.f32.partialorder %v3955_v30, %v8273_v10  ;;  %vm4097_vm5 = vcmp.gt.f32.partialorder %v3955_v30, %v8277_v50  ;;  %vm4173_vm6 = vcmp.le.f32.partialorder %v3955_v30, %v8280_v36 }
 0x4b5   : > { %3819 = vxpose.xlu1.b32.start [1/16] (narrow) %v8141_v11, 8  ;;  %vm4237_vm8 = vmand %vm4097_vm5, %vm4173_vm6 }
 0x4b6   : > { %3853 = vxpose.xlu0.b32.cont [3/16] (narrow) %v8213_v38, 8  ;;  %vm5419_vm9 = vmpackc.low %vm4237_vm8, %vm4235_vm1 }
 0x4b7   : > { %v3960_v43 = vpop.permute.xlu1 %3959  ;;  %5420 = vmatprep.mubr.msk.bf16.mxu0 %vm5419_vm9, %v6172_v22  ;;  %vm4236_vm10 = vmand %vm4096_vm3, %vm4172_vm4 }
 0x4b8   : > { %vm5421_vm11 = vmpackc.low %vm4236_vm10, %vm4234_vm7  ;;  %vm4099_vm12 = vcmp.gt.f32.partialorder %v3960_v43, %v8277_v50  ;;  %vm4175_vm13 = vcmp.le.f32.partialorder %v3960_v43, %v8280_v36  ;;  %vm4098_vm14 = vcmp.gt.f32.partialorder %v3960_v43, %v8270_v21  ;;  %vm4174_vm15 = vcmp.le.f32.partialorder %v3960_v43, %v8273_v10 }
 0x4b9   : > { %3820 = vxpose.xlu1.b32.cont [2/16] (narrow) %v8145_v2, 8  ;;  %vm4239_vm0 = vmand %vm4099_vm12, %vm4175_vm13 }
 0x4ba   : > { %5422 = vmatmul.mubr.msk.bf16.gmra.mxu0 %vm5421_vm11, %v6172_v22  ;;  %3854 = vxpose.xlu0.b32.cont [4/16] (narrow) %v8217_v59, 8  ;;  %vm4238_vm5 = vmand %vm4098_vm14, %vm4174_vm15 }
 0x4bb   : > { %v3965_v11 = vpop.permute.xlu0 %3964 }
 0x4bc   : > { %vm4100_vm2 = vcmp.gt.f32.partialorder %v3965_v11, %v8270_v21  ;;  %vm4176_vm1 = vcmp.le.f32.partialorder %v3965_v11, %v8273_v10  ;;  %vm4101_vm3 = vcmp.gt.f32.partialorder %v3965_v11, %v8277_v50  ;;  %vm4177_vm4 = vcmp.le.f32.partialorder %v3965_v11, %v8280_v36 }
 0x4bd   : > { %3821 = vxpose.xlu1.b32.cont [3/16] (narrow) %v8149_v32, 8  ;;  %vm4241_vm6 = vmand %vm4101_vm3, %vm4177_vm4 }
 0x4be   : > { %3855 = vxpose.xlu0.b32.cont [5/16] (narrow) %v8221_v39, 8  ;;  %vm5423_vm7 = vmpackc.low %vm4241_vm6, %vm4239_vm0 }
 0x4bf   : > { %v3970_v2 = vpop.permute.xlu1 %3969  ;;  %5424 = vmatprep.mubr.msk.bf16.mxu0 %vm5423_vm7, %v6172_v22  ;;  %vm4240_vm8 = vmand %vm4100_vm2, %vm4176_vm1 }
 0x4c0   : > { %vm5425_vm9 = vmpackc.low %vm4240_vm8, %vm4238_vm5  ;;  %vm4103_vm10 = vcmp.gt.f32.partialorder %v3970_v2, %v8277_v50  ;;  %vm4179_vm11 = vcmp.le.f32.partialorder %v3970_v2, %v8280_v36  ;;  %vm4102_vm12 = vcmp.gt.f32.partialorder %v3970_v2, %v8270_v21  ;;  %vm4178_vm13 = vcmp.le.f32.partialorder %v3970_v2, %v8273_v10 }
 0x4c1   : > { %3822 = vxpose.xlu1.b32.cont [4/16] (narrow) %v8153_v37, 8  ;;  %vm4243_vm14 = vmand %vm4103_vm10, %vm4179_vm11 }
 0x4c2   : > { %5426 = vmatmul.mubr.msk.bf16.gmra.mxu0 %vm5425_vm9, %v6172_v22  ;;  %3856 = vxpose.xlu0.b32.cont [6/16] (narrow) %v8225_v9, 8  ;;  %vm4242_vm3 = vmand %vm4102_vm12, %vm4178_vm13 }
 0x4c3   : > { %v3975_v32 = vpop.permute.xlu0 %3974 }
 0x4c4   : > { %vm4104_vm15 = vcmp.gt.f32.partialorder %v3975_v32, %v8270_v21  ;;  %vm4180_vm0 = vcmp.le.f32.partialorder %v3975_v32, %v8273_v10  ;;  %vm4105_vm2 = vcmp.gt.f32.partialorder %v3975_v32, %v8277_v50  ;;  %vm4181_vm1 = vcmp.le.f32.partialorder %v3975_v32, %v8280_v36 }
 0x4c5   : > { %3823 = vxpose.xlu1.b32.cont [5/16] (narrow) %v8157_v0, 8  ;;  %vm4245_vm4 = vmand %vm4105_vm2, %vm4181_vm1 }
 0x4c6   : > { %3857 = vxpose.xlu0.b32.cont [7/16] (narrow) %v8229_v49, 8  ;;  %vm5427_vm5 = vmpackc.low %vm4245_vm4, %vm4243_vm14  ;;  %v6173_v49 = vmov 1966171168  }
 0x4c7   : > { %v3980_v37 = vpop.permute.xlu1 %3979  ;;  %5428 = vmatprep.mubr.msk.bf16.mxu0 %vm5427_vm5, %v6172_v22  ;;  %vm4244_vm6 = vmand %vm4104_vm15, %vm4180_vm0 }
 0x4c8   : > { %vm5429_vm7 = vmpackc.low %vm4244_vm6, %vm4242_vm3  ;;  %vm4107_vm8 = vcmp.gt.f32.partialorder %v3980_v37, %v8277_v50  ;;  %vm4183_vm9 = vcmp.le.f32.partialorder %v3980_v37, %v8280_v36  ;;  %vm4106_vm10 = vcmp.gt.f32.partialorder %v3980_v37, %v8270_v21  ;;  %vm4182_vm11 = vcmp.le.f32.partialorder %v3980_v37, %v8273_v10 }
 0x4c9   : > { %3824 = vxpose.xlu1.b32.cont [6/16] (narrow) %v8161_v55, 8  ;;  %vm4247_vm12 = vmand %vm4107_vm8, %vm4183_vm9 }
 0x4ca   : > { %5430 = vmatmul.mubr.msk.bf16.gmra.mxu0 %vm5429_vm7, %v6172_v22  ;;  %3858 = vxpose.xlu0.b32.cont [8/16] (narrow) %v8233_v20, 8  ;;  %vm4246_vm2 = vmand %vm4106_vm10, %vm4182_vm11  ;;  %v3887_v20 = vunpack.c.l.s4 %v6173_v49 }
 0x4cb   : > { %v3985_v0 = vpop.permute.xlu0 %3984 }
 0x4cc   : > { %vm4108_vm13 = vcmp.gt.f32.partialorder %v3985_v0, %v8270_v21  ;;  %vm4184_vm14 = vcmp.le.f32.partialorder %v3985_v0, %v8273_v10  ;;  %vm4109_vm15 = vcmp.gt.f32.partialorder %v3985_v0, %v8277_v50  ;;  %vm4185_vm0 = vcmp.le.f32.partialorder %v3985_v0, %v8280_v36 }
 0x4cd   : > { %3825 = vxpose.xlu1.b32.cont [7/16] (narrow) %v8165_v57, 8  ;;  %vm4249_vm1 = vmand %vm4109_vm15, %vm4185_vm0 }
 0x4ce   : > { %3859 = vxpose.xlu0.b32.cont [9/16] (narrow) %v8237_v6, 8  ;;  %vm5431_vm3 = vmpackc.low %vm4249_vm1, %vm4247_vm12 }
 0x4cf   : > { %v3990_v55 = vpop.permute.xlu1 %3989  ;;  %5432 = vmatprep.mubr.msk.bf16.mxu0 %vm5431_vm3, %v6172_v22  ;;  %vm4248_vm4 = vmand %vm4108_vm13, %vm4184_vm14 }
 0x4d0   : > { %vm5433_vm5 = vmpackc.low %vm4248_vm4, %vm4246_vm2  ;;  %vm4111_vm6 = vcmp.gt.f32.partialorder %v3990_v55, %v8277_v50  ;;  %vm4187_vm7 = vcmp.le.f32.partialorder %v3990_v55, %v8280_v36  ;;  %vm4110_vm8 = vcmp.gt.f32.partialorder %v3990_v55, %v8270_v21  ;;  %vm4186_vm9 = vcmp.le.f32.partialorder %v3990_v55, %v8273_v10 }
 0x4d1   : > { %3826 = vxpose.xlu1.b32.cont [8/16] (narrow) %v8169_v23, 8  ;;  %vm4251_vm10 = vmand %vm4111_vm6, %vm4187_vm7 }
 0x4d2   : > { %5434 = vmatmul.mubr.msk.bf16.gmra.mxu0 %vm5433_vm5, %v6172_v22  ;;  %3860 = vxpose.xlu0.b32.cont [10/16] (narrow) %v8241_v35, 8  ;;  %vm4250_vm15 = vmand %vm4110_vm8, %vm4186_vm9  ;;  %v3888_v35 = vunpack.c.0.s8 %v3887_v20 }
 0x4d3   : > { %v3995_v57 = vpop.permute.xlu0 %3994 }
 0x4d4   : > { %vm4112_vm11 = vcmp.gt.f32.partialorder %v3995_v57, %v8270_v21  ;;  %vm4188_vm12 = vcmp.le.f32.partialorder %v3995_v57, %v8273_v10  ;;  %vm4113_vm13 = vcmp.gt.f32.partialorder %v3995_v57, %v8277_v50  ;;  %vm4189_vm14 = vcmp.le.f32.partialorder %v3995_v57, %v8280_v36 }
 0x4d5   : > { %3827 = vxpose.xlu1.b32.cont [9/16] (narrow) %v8173_v26, 8  ;;  %vm4253_vm0 = vmand %vm4113_vm13, %vm4189_vm14 }
 0x4d6   : > { %3861 = vxpose.xlu0.b32.cont [11/16] (narrow) %v8245_v25, 8  ;;  %vm5435_vm2 = vmpackc.low %vm4253_vm0, %vm4251_vm10  ;;  %v3891_v25 = vsub.s32 %v3888_v35, %v8732_v17 }
 0x4d7   : > { %v4000_v23 = vpop.permute.xlu1 %3999  ;;  %5436 = vmatprep.mubr.msk.bf16.mxu0 %vm5435_vm2, %v6172_v22  ;;  %vm4252_vm1 = vmand %vm4112_vm11, %vm4188_vm12 }
 0x4d8   : > { %vm5437_vm3 = vmpackc.low %vm4252_vm1, %vm4250_vm15  ;;  %vm4115_vm4 = vcmp.gt.f32.partialorder %v4000_v23, %v8277_v50  ;;  %vm4191_vm5 = vcmp.le.f32.partialorder %v4000_v23, %v8280_v36  ;;  %vm4114_vm6 = vcmp.gt.f32.partialorder %v4000_v23, %v8270_v21  ;;  %vm4190_vm7 = vcmp.le.f32.partialorder %v4000_v23, %v8273_v10 }
 0x4d9   : > { %3828 = vxpose.xlu1.b32.cont [10/16] (narrow) %v8177_v54, 8  ;;  %vm4255_vm8 = vmand %vm4115_vm4, %vm4191_vm5 }
 0x4da   : > { %5438 = vmatmul.mubr.msk.bf16.gmra.mxu0 %vm5437_vm3, %v6172_v22  ;;  %3862 = vxpose.xlu0.b32.cont [12/16] (narrow) %v8249_v60, 8  ;;  %vm4254_vm13 = vmand %vm4114_vm6, %vm4190_vm7 }
 0x4db   : > { %v4005_v26 = vpop.permute.xlu0 %4004 }
 0x4dc   : > { %vm4116_vm9 = vcmp.gt.f32.partialorder %v4005_v26, %v8270_v21  ;;  %vm4192_vm10 = vcmp.le.f32.partialorder %v4005_v26, %v8273_v10  ;;  %vm4117_vm11 = vcmp.gt.f32.partialorder %v4005_v26, %v8277_v50  ;;  %vm4193_vm12 = vcmp.le.f32.partialorder %v4005_v26, %v8280_v36 }
 0x4dd   : > { %3829 = vxpose.xlu1.b32.cont [11/16] (narrow) %v8181_v47, 8  ;;  %vm4257_vm14 = vmand %vm4117_vm11, %vm4193_vm12 }
 0x4de   : > { %3863 = vxpose.xlu0.b32.cont [13/16] (narrow) %v8253_v58, 8  ;;  %vm5439_vm15 = vmpackc.low %vm4257_vm14, %vm4255_vm8 }
 0x4df   : > { %v4010_v54 = vpop.permute.xlu1 %4009  ;;  %5440 = vmatprep.mubr.msk.bf16.mxu0 %vm5439_vm15, %v6172_v22  ;;  %vm4256_vm0 = vmand %vm4116_vm9, %vm4192_vm10 }
 0x4e0   : > { %vm5441_vm2 = vmpackc.low %vm4256_vm0, %vm4254_vm13  ;;  %vm4119_vm1 = vcmp.gt.f32.partialorder %v4010_v54, %v8277_v50  ;;  %vm4195_vm3 = vcmp.le.f32.partialorder %v4010_v54, %v8280_v36  ;;  %vm4118_vm4 = vcmp.gt.f32.partialorder %v4010_v54, %v8270_v21  ;;  %vm4194_vm5 = vcmp.le.f32.partialorder %v4010_v54, %v8273_v10 }
 0x4e1   : > { %3830 = vxpose.xlu1.b32.cont [12/16] (narrow) %v8185_v63, 8  ;;  %vm4259_vm6 = vmand %vm4119_vm1, %vm4195_vm3 }
 0x4e2   : > { %5442 = vmatmul.mubr.msk.bf16.gmra.mxu0 %vm5441_vm2, %v6172_v22  ;;  %3864 = vxpose.xlu0.b32.cont [14/16] (narrow) %v8257_v61, 8  ;;  %vm4258_vm11 = vmand %vm4118_vm4, %vm4194_vm5 }
 0x4e3   : > { %v4015_v47 = vpop.permute.xlu0 %4014 }
 0x4e4   : > { %vm4120_vm7 = vcmp.gt.f32.partialorder %v4015_v47, %v8270_v21  ;;  %vm4196_vm8 = vcmp.le.f32.partialorder %v4015_v47, %v8273_v10  ;;  %vm4121_vm9 = vcmp.gt.f32.partialorder %v4015_v47, %v8277_v50  ;;  %vm4197_vm10 = vcmp.le.f32.partialorder %v4015_v47, %v8280_v36 }
 0x4e5   : > { %3831 = vxpose.xlu1.b32.cont [13/16] (narrow) %v8189_v46, 8  ;;  %vm4261_vm12 = vmand %vm4121_vm9, %vm4197_vm10 }
 0x4e6   : > { %3865 = vxpose.xlu0.b32.cont [15/16] (narrow) %v8267_v40, 8  ;;  %vm5443_vm13 = vmpackc.low %vm4261_vm12, %vm4259_vm6 }
 0x4e7   : > { %v4020_v63 = vpop.permute.xlu1 %4019  ;;  %5444 = vmatprep.mubr.msk.bf16.mxu0 %vm5443_vm13, %v6172_v22  ;;  %vm4260_vm14 = vmand %vm4120_vm7, %vm4196_vm8 }
 0x4e8   : > { %vm5445_vm15 = vmpackc.low %vm4260_vm14, %vm4258_vm11  ;;  %vm4123_vm0 = vcmp.gt.f32.partialorder %v4020_v63, %v8277_v50  ;;  %vm4199_vm2 = vcmp.le.f32.partialorder %v4020_v63, %v8280_v36  ;;  %vm4122_vm1 = vcmp.gt.f32.partialorder %v4020_v63, %v8270_v21  ;;  %vm4198_vm3 = vcmp.le.f32.partialorder %v4020_v63, %v8273_v10 }
 0x4e9   : > { %3832 = vxpose.xlu1.b32.cont [14/16] (narrow) %v8193_v44, 8  ;;  %vm4263_vm4 = vmand %vm4123_vm0, %vm4199_vm2 }
 0x4ea   : > { %5446 = vmatmul.mubr.msk.bf16.gmra.mxu0 %vm5445_vm15, %v6172_v22  ;;  %3866 = vxpose.xlu0.b32.end [16/16] (narrow) %v8283_v12, 8  ;;  %vm4262_vm9 = vmand %vm4122_vm1, %vm4198_vm3 }
 0x4eb   : > { %v4025_v46 = vpop.permute.xlu0 %4024 }
 0x4ec   : > { %vm4124_vm5 = vcmp.gt.f32.partialorder %v4025_v46, %v8270_v21  ;;  %vm4200_vm6 = vcmp.le.f32.partialorder %v4025_v46, %v8273_v10  ;;  %vm4125_vm7 = vcmp.gt.f32.partialorder %v4025_v46, %v8277_v50  ;;  %vm4201_vm8 = vcmp.le.f32.partialorder %v4025_v46, %v8280_v36 }
 0x4ed   : > { %3833 = vxpose.xlu1.b32.cont [15/16] (narrow) %v8197_v14, 8  ;;  %vm4265_vm10 = vmand %vm4125_vm7, %vm4201_vm8 }
 0x4ee   : > { %vm5447_vm11 = vmpackc.low %vm4265_vm10, %vm4263_vm4 }
 0x4ef   : > { %v4030_v44 = vpop.permute.xlu1 %4029  ;;  %5448 = vmatprep.mubr.msk.bf16.mxu0 %vm5447_vm11, %v6172_v22  ;;  %vm4264_vm12 = vmand %vm4124_vm5, %vm4200_vm6 }
 0x4f0   : > { %vm5449_vm13 = vmpackc.low %vm4264_vm12, %vm4262_vm9  ;;  %vm4127_vm14 = vcmp.gt.f32.partialorder %v4030_v44, %v8277_v50  ;;  %vm4203_vm15 = vcmp.le.f32.partialorder %v4030_v44, %v8280_v36  ;;  %vm4126_vm0 = vcmp.gt.f32.partialorder %v4030_v44, %v8270_v21  ;;  %vm4202_vm2 = vcmp.le.f32.partialorder %v4030_v44, %v8273_v10 }
 0x4f1   : > { %3834 = vxpose.xlu1.b32.end [16/16] (narrow) %v8201_v19, 8  ;;  %vm4267_vm1 = vmand %vm4127_vm14, %vm4203_vm15 }
 0x4f2   : > { %5450 = vmatmul.mubr.msk.bf16.gmra.mxu0 %vm5449_vm13, %v6172_v22  ;;  %vm4266_vm7 = vmand %vm4126_vm0, %vm4202_vm2 }
 0x4f3   : > { %v4035_v14 = vpop.permute.xlu0 %4034 }
 0x4f4   : > { %vm4128_vm3 = vcmp.gt.f32.partialorder %v4035_v14, %v8270_v21  ;;  %vm4204_vm4 = vcmp.le.f32.partialorder %v4035_v14, %v8273_v10  ;;  %vm4129_vm5 = vcmp.gt.f32.partialorder %v4035_v14, %v8277_v50  ;;  %vm4205_vm6 = vcmp.le.f32.partialorder %v4035_v14, %v8280_v36 }
 0x4f5   : > { %vm4269_vm8 = vmand %vm4129_vm5, %vm4205_vm6 }
 0x4f6   : > { %vm5451_vm9 = vmpackc.low %vm4269_vm8, %vm4267_vm1 }
 0x4f7   : > { %v4040_v24 = vpop.permute.xlu1 %4039  ;;  %5452 = vmatprep.mubr.msk.bf16.mxu0 %vm5451_vm9, %v6172_v22  ;;  %vm4268_vm10 = vmand %vm4128_vm3, %vm4204_vm4 }
 0x4f8   : > { %vm5453_vm11 = vmpackc.low %vm4268_vm10, %vm4266_vm7  ;;  %vm4131_vm12 = vcmp.gt.f32.partialorder %v4040_v24, %v8277_v50  ;;  %vm4207_vm13 = vcmp.le.f32.partialorder %v4040_v24, %v8280_v36  ;;  %vm4130_vm14 = vcmp.gt.f32.partialorder %v4040_v24, %v8270_v21  ;;  %vm4206_vm15 = vcmp.le.f32.partialorder %v4040_v24, %v8273_v10 }
 0x4f9   : > { %vm4271_vm0 = vmand %vm4131_vm12, %vm4207_vm13 }
 0x4fa   : > { %5454 = vmatmul.mubr.msk.bf16.gmra.mxu0 %vm5453_vm11, %v6172_v22  ;;  %vm4270_vm4 = vmand %vm4130_vm14, %vm4206_vm15 }
 0x4fb   : > { %v4045_v19 = vpop.permute.xlu0 %4044 }
 0x4fc   : > { %vm4132_vm2 = vcmp.gt.f32.partialorder %v4045_v19, %v8270_v21  ;;  %vm4208_vm1 = vcmp.le.f32.partialorder %v4045_v19, %v8273_v10  ;;  %vm4133_vm5 = vcmp.gt.f32.partialorder %v4045_v19, %v8277_v50  ;;  %vm4209_vm3 = vcmp.le.f32.partialorder %v4045_v19, %v8280_v36 }
 0x4fd   : > { %vm4273_vm6 = vmand %vm4133_vm5, %vm4209_vm3 }
 0x4fe   : > { %vm5455_vm7 = vmpackc.low %vm4273_vm6, %vm4271_vm0 }
 0x4ff   : > { %v4050_v38 = vpop.permute.xlu1 %4049  ;;  %5456 = vmatprep.mubr.msk.bf16.mxu0 %vm5455_vm7, %v6172_v22  ;;  %vm4272_vm8 = vmand %vm4132_vm2, %vm4208_vm1 }
 0x500   : > { %vm5457_vm9 = vmpackc.low %vm4272_vm8, %vm4270_vm4  ;;  %vm4135_vm10 = vcmp.gt.f32.partialorder %v4050_v38, %v8277_v50  ;;  %vm4211_vm11 = vcmp.le.f32.partialorder %v4050_v38, %v8280_v36  ;;  %vm4134_vm12 = vcmp.gt.f32.partialorder %v4050_v38, %v8270_v21  ;;  %vm4210_vm13 = vcmp.le.f32.partialorder %v4050_v38, %v8273_v10 }
 0x501   : > { %vm4275_vm14 = vmand %vm4135_vm10, %vm4211_vm11 }
 0x502   : > { %5458 = vmatmul.mubr.msk.bf16.gmra.mxu0 %vm5457_vm9, %v6172_v22  ;;  %vm4274_vm1 = vmand %vm4134_vm12, %vm4210_vm13 }
 0x503   : > { %v4055_v59 = vpop.permute.xlu0 %4054 }
 0x504   : > { %vm4136_vm15 = vcmp.gt.f32.partialorder %v4055_v59, %v8270_v21  ;;  %vm4212_vm0 = vcmp.le.f32.partialorder %v4055_v59, %v8273_v10  ;;  %vm4137_vm5 = vcmp.gt.f32.partialorder %v4055_v59, %v8277_v50  ;;  %vm4213_vm2 = vcmp.le.f32.partialorder %v4055_v59, %v8280_v36 }
 0x505   : > { %vm4277_vm3 = vmand %vm4137_vm5, %vm4213_vm2 }
 0x506   : > { %vm5459_vm4 = vmpackc.low %vm4277_vm3, %vm4275_vm14 }
 0x507   : > { %v4060_v39 = vpop.permute.xlu1 %4059  ;;  %5460 = vmatprep.mubr.msk.bf16.mxu0 %vm5459_vm4, %v6172_v22  ;;  %vm4276_vm6 = vmand %vm4136_vm15, %vm4212_vm0 }
 0x508   : > { %vm5461_vm7 = vmpackc.low %vm4276_vm6, %vm4274_vm1  ;;  %vm4139_vm8 = vcmp.gt.f32.partialorder %v4060_v39, %v8277_v50  ;;  %vm4215_vm9 = vcmp.le.f32.partialorder %v4060_v39, %v8280_v36  ;;  %vm4138_vm10 = vcmp.gt.f32.partialorder %v4060_v39, %v8270_v21  ;;  %vm4214_vm11 = vcmp.le.f32.partialorder %v4060_v39, %v8273_v10 }
 0x509   : > { %vm4279_vm12 = vmand %vm4139_vm8, %vm4215_vm9  ;;  %vm3903_vm6 = vcmp.lt.s32.totalorder %v8733_v33, 256 }
 0x50a   : > { %5462 = vmatmul.mubr.msk.bf16.gmra.mxu0 %vm5461_vm7, %v6172_v22  ;;  %vm4278_vm5 = vmand %vm4138_vm10, %vm4214_vm11 }
 0x50b   : > { %v4065_v9 = vpop.permute.xlu0 %4064 }
 0x50c   : > { %vm4140_vm13 = vcmp.gt.f32.partialorder %v4065_v9, %v8270_v21  ;;  %vm4216_vm14 = vcmp.le.f32.partialorder %v4065_v9, %v8273_v10  ;;  %vm4141_vm15 = vcmp.gt.f32.partialorder %v4065_v9, %v8277_v50  ;;  %vm4217_vm0 = vcmp.le.f32.partialorder %v4065_v9, %v8280_v36 }
 0x50d   : > { %vm4281_vm2 = vmand %vm4141_vm15, %vm4217_vm0 }
 0x50e   : > { %vm5463_vm1 = vmpackc.low %vm4281_vm2, %vm4279_vm12 }
 0x50f   : > { %5464 = vmatprep.mubr.msk.bf16.mxu0 %vm5463_vm1, %v6172_v22  ;;  %vm4280_vm3 = vmand %vm4140_vm13, %vm4216_vm14 }
 0x510   : > { %vm5465_vm4 = vmpackc.low %vm4280_vm3, %vm4278_vm5 }
 0x512   : > { %5466 = vmatmul.mubr.msk.bf16.gmra.mxu0 %vm5465_vm4, %v6172_v22 }
 0x52a   : > { %v3867_v5 = vpop.trf.xlu0 }
 0x531   : > { %v3835_v6 = vpop.trf.xlu1 }
 0x532   : > { %v3885_v42 = vcombine.low %v3835_v6, %v3867_v5 }
 0x534   : > { %v3892_v7 = vrot.slane %v3885_v42, %v3891_v25 }
 0x536   : > { %v3899_v60 = vrot.slane %v3892_v7, %v3891_v25 }
 0x538   : > { %3905 = vst.msk [vmem:[%s534_s10] sm:$0x3] %vm3903_vm6, %v3899_v60 }
 0x55a   : > { %v4668_v18 = vpop.f32.mrf.mxu0 }
 0x55c   : > { %v4670_v58 = vpop.f32.mrf.mxu0 }
 0x55d   : > { %v5507_v41 = vpack.c.bf16 %v4670_v58, %v4668_v18 }
 0x55e   : > { %6066 = shalt.err (!%p6063_p3)
}
 0x55f   : > { %s6067_s26 = scalar_lea.hbm %s5071_s24, 32  ;;  %s6071_s17 = scalar_lea.hbm %s8612_s14, 64 }
 0x560   : > { %p6068_p5 = scmp.ne.s32.totalorder %s5071_s24, %s6067_s26  ;;  %p6072_p9 = scmp.lt.s32.totalorder %s5071_s24, %s8612_s14 }
 0x561   : > { %p6073_p12 = scmp.lt.s32.totalorder %s6071_s17, %s6067_s26 }
 0x562   : > { %p6069_p6 = pnand %p6068_p5, %p6301_p4 }
 0x563   : > { %p6074_p10 = por %p6073_p12, %p6072_p9 }
 0x564   : > { %p6070_p7 = pneg %p6069_p6 }
 0x566   : > { %p6075_p11 = pnand %p6074_p10, %p6070_p7 }
 0x568   : > { %6078 = shalt.err (!%p6075_p11)
}
 0x569   : > { %5671 = dma.vmem_to_hbm [thread:$0]  (%p6301_p4), %s5074_s27, 32, %s5071_s24, %s5052_s0   ;;  %v4672_v56 = vpop.f32.mrf.mxu0 }
 0x56a   : > { %s8734_s1 = sshll.u32 %s8485_s19, 8  ;;  %s5540_s0 = sshll.u32 %s6155_s23, 12 }
 0x56b   : > { %s8510_s2 = scalar_lea.vmem [#allocation7], %s8734_s1  ;;  %v4674_v61 = vpop.f32.mrf.mxu0  ;;  %s8548_s27 = scalar_lea.hbm %s8613_s15, %s5540_s0 }
 0x56c   : > { %5019 = vst [vmem:[%s8510_s2] sm:$0xff] %v5507_v41  ;;  %v5508_v13 = vpack.c.bf16 %v4674_v61, %v4672_v56  ;;  %s5089_s3 = sshll.u32 %s8510_s2, 4  ;;  %s5057_s24 = scalar_lea.sflag [#allocation8], %s8485_s19  ;;  %s8550_s3 = int_to_ptr.vmem [resolvable:$true] %s5089_s3 }
 0x56d   : > { %v4678_v51 = vpop.f32.mrf.mxu0  ;;  %s6079_s26 = scalar_lea.vmem %s8550_s3, 4096  ;;  %s6175_s23 = smov [#allocation7]  }
 0x56e   : > { %5020 = vst [vmem:[%s8510_s2 + $0x8] sm:$0xff] %v5508_v13  ;;  %p6080_p13 = scmp.ne.s32.totalorder %s8550_s3, %s6079_s26  ;;  %s6083_s28 = sshll.u32 %s6175_s23, 4  ;;  %s6084_s28 = int_to_ptr.vmem [resolvable:$false] %s6083_s28 }
 0x56f   : > { %v4680_v34 = vpop.f32.mrf.mxu0  ;;  %s6085_s10 = scalar_lea.vmem %s6084_s28, 8192  ;;  %p6086_p2 = scmp.lt.s32.totalorder %s8550_s3, %s6084_s28 }
 0x570   : > { %v5509_v16 = vpack.c.bf16 %v4680_v34, %v4678_v51  ;;  %p6081_p0 = pnand %p6080_p13, %p6301_p4  ;;  %p6087_p3 = scmp.lt.s32.totalorder %s6085_s10, %s6079_s26 }
 0x571   : > { %v4682_v40 = vpop.f32.mrf.mxu0 }
 0x572   : > { %5021 = vst [vmem:[%s8510_s2 + $0x10] sm:$0xff] %v5509_v16  ;;  %p6082_p1 = pneg %p6081_p0  ;;  %p6088_p5 = por %p6087_p3, %p6086_p2 }
 0x573   : > { %v4684_v1 = vpop.f32.mrf.mxu0 }
 0x574   : > { %v5510_v21 = vpack.c.bf16 %v4684_v1, %v4682_v40  ;;  %p6089_p6 = pnand %p6088_p5, %p6082_p1 }
 0x575   : > { %v4688_v10 = vpop.f32.mrf.mxu0 }
 0x576   : > { %5022 = vst [vmem:[%s8510_s2 + $0x18] sm:$0xff] %v5510_v21 }
 0x577   : > { %v4690_v3 = vpop.f32.mrf.mxu0 }
 0x578   : > { %v5511_v50 = vpack.c.bf16 %v4690_v3, %v4688_v10 }
 0x579   : > { %v4692_v36 = vpop.f32.mrf.mxu0 }
 0x57a   : > { %5023 = vst [vmem:[%s8510_s2 + $0x20] sm:$0xff] %v5511_v50 }
 0x57b   : > { %v4694_v62 = vpop.f32.mrf.mxu0 }
 0x57c   : > { %v5512_v53 = vpack.c.bf16 %v4694_v62, %v4692_v36 }
 0x57d   : > { %v4698_v12 = vpop.f32.mrf.mxu0 }
 0x57e   : > { %5024 = vst [vmem:[%s8510_s2 + $0x28] sm:$0xff] %v5512_v53 }
 0x57f   : > { %v4700_v15 = vpop.f32.mrf.mxu0 }
 0x580   : > { %v5513_v29 = vpack.c.bf16 %v4700_v15, %v4698_v12 }
 0x581   : > { %v4702_v31 = vpop.f32.mrf.mxu0 }
 0x582   : > { %5025 = vst [vmem:[%s8510_s2 + $0x30] sm:$0xff] %v5513_v29 }
 0x583   : > { %v4704_v4 = vpop.f32.mrf.mxu0 }
 0x584   : > { %v5514_v22 = vpack.c.bf16 %v4704_v4, %v4702_v31 }
 0x585   : > { %v4708_v28 = vpop.f32.mrf.mxu0 }
 0x586   : > { %5026 = vst [vmem:[%s8510_s2 + $0x38] sm:$0xff] %v5514_v22 }
 0x587   : > { %v4710_v48 = vpop.f32.mrf.mxu0 }
 0x588   : > { %v5515_v52 = vpack.c.bf16 %v4710_v48, %v4708_v28 }
 0x589   : > { %v4712_v8 = vpop.f32.mrf.mxu0 }
 0x58a   : > { %5027 = vst [vmem:[%s8510_s2 + $0x40] sm:$0xff] %v5515_v52 }
 0x58b   : > { %v4714_v45 = vpop.f32.mrf.mxu0 }
 0x58c   : > { %v5516_v27 = vpack.c.bf16 %v4714_v45, %v4712_v8 }
 0x58d   : > { %v4718_v30 = vpop.f32.mrf.mxu0 }
 0x58e   : > { %5028 = vst [vmem:[%s8510_s2 + $0x48] sm:$0xff] %v5516_v27 }
 0x58f   : > { %v4720_v43 = vpop.f32.mrf.mxu0 }
 0x590   : > { %v5517_v11 = vpack.c.bf16 %v4720_v43, %v4718_v30 }
 0x591   : > { %v4722_v2 = vpop.f32.mrf.mxu0 }
 0x592   : > { %5029 = vst [vmem:[%s8510_s2 + $0x50] sm:$0xff] %v5517_v11 }
 0x593   : > { %v4724_v32 = vpop.f32.mrf.mxu0 }
 0x594   : > { %v5518_v37 = vpack.c.bf16 %v4724_v32, %v4722_v2 }
 0x595   : > { %v4728_v0 = vpop.f32.mrf.mxu0 }
 0x596   : > { %5030 = vst [vmem:[%s8510_s2 + $0x58] sm:$0xff] %v5518_v37 }
 0x597   : > { %v4730_v55 = vpop.f32.mrf.mxu0 }
 0x598   : > { %v5519_v57 = vpack.c.bf16 %v4730_v55, %v4728_v0 }
 0x599   : > { %v4732_v23 = vpop.f32.mrf.mxu0 }
 0x59a   : > { %5031 = vst [vmem:[%s8510_s2 + $0x60] sm:$0xff] %v5519_v57 }
 0x59b   : > { %v4734_v26 = vpop.f32.mrf.mxu0 }
 0x59c   : > { %v5520_v54 = vpack.c.bf16 %v4734_v26, %v4732_v23 }
 0x59d   : > { %v4738_v47 = vpop.f32.mrf.mxu0 }
 0x59e   : > { %5032 = vst [vmem:[%s8510_s2 + $0x68] sm:$0xff] %v5520_v54 }
 0x59f   : > { %v4740_v63 = vpop.f32.mrf.mxu0 }
 0x5a0   : > { %v5521_v46 = vpack.c.bf16 %v4740_v63, %v4738_v47 }
 0x5a1   : > { %v4742_v44 = vpop.f32.mrf.mxu0 }
 0x5a2   : > { %5033 = vst [vmem:[%s8510_s2 + $0x70] sm:$0xff] %v5521_v46 }
 0x5a3   : > { %v4744_v14 = vpop.f32.mrf.mxu0 }
 0x5a4   : > { %v5522_v24 = vpack.c.bf16 %v4744_v14, %v4742_v44 }
 0x5a5   : > { %v4748_v19 = vpop.f32.mrf.mxu0 }
 0x5a6   : > { %5034 = vst [vmem:[%s8510_s2 + $0x78] sm:$0xff] %v5522_v24 }
 0x5a7   : > { %v4750_v38 = vpop.f32.mrf.mxu0 }
 0x5a8   : > { %v5523_v59 = vpack.c.bf16 %v4750_v38, %v4748_v19 }
 0x5a9   : > { %v4752_v39 = vpop.f32.mrf.mxu0 }
 0x5aa   : > { %5035 = vst [vmem:[%s8510_s2 + $0x80] sm:$0xff] %v5523_v59 }
 0x5ab   : > { %v4754_v9 = vpop.f32.mrf.mxu0 }
 0x5ac   : > { %v5524_v49 = vpack.c.bf16 %v4754_v9, %v4752_v39 }
 0x5ad   : > { %v4758_v20 = vpop.f32.mrf.mxu0 }
 0x5ae   : > { %5036 = vst [vmem:[%s8510_s2 + $0x88] sm:$0xff] %v5524_v49 }
 0x5af   : > { %v4760_v6 = vpop.f32.mrf.mxu0 }
 0x5b0   : > { %v5525_v35 = vpack.c.bf16 %v4760_v6, %v4758_v20 }
 0x5b1   : > { %v4762_v5 = vpop.f32.mrf.mxu0 }
 0x5b2   : > { %5037 = vst [vmem:[%s8510_s2 + $0x90] sm:$0xff] %v5525_v35 }
 0x5b3   : > { %v4764_v17 = vpop.f32.mrf.mxu0 }
 0x5b4   : > { %v5526_v25 = vpack.c.bf16 %v4764_v17, %v4762_v5 }
 0x5b5   : > { %v4768_v42 = vpop.f32.mrf.mxu0 }
 0x5b6   : > { %5038 = vst [vmem:[%s8510_s2 + $0x98] sm:$0xff] %v5526_v25 }
 0x5b7   : > { %v4770_v7 = vpop.f32.mrf.mxu0 }
 0x5b8   : > { %v5527_v60 = vpack.c.bf16 %v4770_v7, %v4768_v42 }
 0x5b9   : > { %v4772_v18 = vpop.f32.mrf.mxu0 }
 0x5ba   : > { %5039 = vst [vmem:[%s8510_s2 + $0xa0] sm:$0xff] %v5527_v60 }
 0x5bb   : > { %v4774_v33 = vpop.f32.mrf.mxu0 }
 0x5bc   : > { %v5528_v58 = vpack.c.bf16 %v4774_v33, %v4772_v18 }
 0x5bd   : > { %v4778_v41 = vpop.f32.mrf.mxu0 }
 0x5be   : > { %5040 = vst [vmem:[%s8510_s2 + $0xa8] sm:$0xff] %v5528_v58 }
 0x5bf   : > { %v4780_v56 = vpop.f32.mrf.mxu0 }
 0x5c0   : > { %v5529_v61 = vpack.c.bf16 %v4780_v56, %v4778_v41 }
 0x5c1   : > { %v4782_v13 = vpop.f32.mrf.mxu0 }
 0x5c2   : > { %5041 = vst [vmem:[%s8510_s2 + $0xb0] sm:$0xff] %v5529_v61 }
 0x5c3   : > { %v4784_v51 = vpop.f32.mrf.mxu0 }
 0x5c4   : > { %v5530_v34 = vpack.c.bf16 %v4784_v51, %v4782_v13 }
 0x5c5   : > { %v4788_v16 = vpop.f32.mrf.mxu0 }
 0x5c6   : > { %5042 = vst [vmem:[%s8510_s2 + $0xb8] sm:$0xff] %v5530_v34 }
 0x5c7   : > { %v4790_v40 = vpop.f32.mrf.mxu0 }
 0x5c8   : > { %v5531_v1 = vpack.c.bf16 %v4790_v40, %v4788_v16 }
 0x5c9   : > { %v4792_v21 = vpop.f32.mrf.mxu0 }
 0x5ca   : > { %5043 = vst [vmem:[%s8510_s2 + $0xc0] sm:$0xff] %v5531_v1 }
 0x5cb   : > { %v4794_v10 = vpop.f32.mrf.mxu0 }
 0x5cc   : > { %v5532_v3 = vpack.c.bf16 %v4794_v10, %v4792_v21 }
 0x5cd   : > { %v4798_v50 = vpop.f32.mrf.mxu0 }
 0x5ce   : > { %5044 = vst [vmem:[%s8510_s2 + $0xc8] sm:$0xff] %v5532_v3 }
 0x5cf   : > { %v4800_v36 = vpop.f32.mrf.mxu0 }
 0x5d0   : > { %v5533_v62 = vpack.c.bf16 %v4800_v36, %v4798_v50 }
 0x5d1   : > { %v4802_v53 = vpop.f32.mrf.mxu0 }
 0x5d2   : > { %5045 = vst [vmem:[%s8510_s2 + $0xd0] sm:$0xff] %v5533_v62 }
 0x5d3   : > { %v4804_v12 = vpop.f32.mrf.mxu0 }
 0x5d4   : > { %v5534_v15 = vpack.c.bf16 %v4804_v12, %v4802_v53 }
 0x5d5   : > { %v4808_v29 = vpop.f32.mrf.mxu0 }
 0x5d6   : > { %5046 = vst [vmem:[%s8510_s2 + $0xd8] sm:$0xff] %v5534_v15 }
 0x5d7   : > { %v4810_v31 = vpop.f32.mrf.mxu0 }
 0x5d8   : > { %v5535_v4 = vpack.c.bf16 %v4810_v31, %v4808_v29 }
 0x5d9   : > { %v4812_v22 = vpop.f32.mrf.mxu0 }
 0x5da   : > { %5047 = vst [vmem:[%s8510_s2 + $0xe0] sm:$0xff] %v5535_v4 }
 0x5db   : > { %v4814_v28 = vpop.f32.mrf.mxu0 }
 0x5dc   : > { %v5536_v48 = vpack.c.bf16 %v4814_v28, %v4812_v22 }
 0x5dd   : > { %v4818_v52 = vpop.f32.mrf.mxu0 }
 0x5de   : > { %5048 = vst [vmem:[%s8510_s2 + $0xe8] sm:$0xff] %v5536_v48 }
 0x5df   : > { %v4820_v8 = vpop.f32.mrf.mxu0 }
 0x5e0   : > { %v5537_v45 = vpack.c.bf16 %v4820_v8, %v4818_v52 }
 0x5e1   : > { %v4822_v27 = vpop.f32.mrf.mxu0 }
 0x5e2   : > { %5049 = vst [vmem:[%s8510_s2 + $0xf0] sm:$0xff] %v5537_v45 }
 0x5e3   : > { %v4824_v30 = vpop.f32.mrf.mxu0 }
 0x5e4   : > { %v5538_v43 = vpack.c.bf16 %v4824_v30, %v4822_v27 }
 0x5e6   : > { %5050 = vst [vmem:[%s8510_s2 + $0xf8] sm:$0xff] %v5538_v43 }
 0x5e7   : > { %6092 = shalt.err (!%p6089_p6)
}
 0x5e8   : > { %s6093_s17 = scalar_lea.hbm %s8548_s27, 4096  ;;  %s6097_s2 = scalar_lea.hbm %s8613_s15, 8192 }
 0x5e9   : > { %p6094_p7 = scmp.ne.s32.totalorder %s8548_s27, %s6093_s17  ;;  %p6098_p10 = scmp.lt.s32.totalorder %s8548_s27, %s8613_s15 }
 0x5ea   : > { %p6099_p11 = scmp.lt.s32.totalorder %s6097_s2, %s6093_s17 }
 0x5eb   : > { %p6095_p9 = pnand %p6094_p7, %p6301_p4 }
 0x5ec   : > { %p6100_p13 = por %p6099_p11, %p6098_p10 }
 0x5ed   : > { %p6096_p12 = pneg %p6095_p9 }
 0x5ef   : > { %p6101_p0 = pnand %p6100_p13, %p6096_p12 }
 0x5f1   : > { %6104 = shalt.err (!%p6101_p0)
}
 0x5f2   : > { %s6176_s30 = smov 128   ;;  %s6177_s26 = smov 8  }
 0x5f3   : > { %5672 = dma.vmem_to_hbm [thread:$0]  (%p6301_p4), %s8550_s3, 4096, %s8548_s27, %s5057_s24, %s6176_s30, %s6176_s30, %s6177_s26  }
 0x5f4 PF: > { %p5688_p1 = scmp.ge.s32.totalorder %s6163_s25, 2  ;;  %s5104_s23 = sand.u32 1, %s6143_s20  }
 0x5f5   : > { %s5105_s28 = scalar_lea.sflag [#allocation5], %s5104_s23 }
 0x5f6   : > { %p5680_p2 = pnand %p5688_p1, %p6308_p8 }
 0x5f8   : > { %p5681_p3 = pneg %p5680_p2 }
 0x5fa   : > { %6134 = dma.done.wait (%p5681_p3), %s5105_s28, 32  }
 0x5fb   : > { %6136 = vsyncadd (%p5681_p3), %s5105_s28, 4294967264  ;;  %s5114_s10 = scalar_lea.sflag [#allocation8], %s5104_s23 }
 0x5fc   : > { %6138 = dma.done.wait (%p5681_p3), %s5114_s10, 4096  }
 0x5fd   : > { %6140 = vsyncadd (%p5681_p3), %s5114_s10, 4294963200  ;;  %s35_s25 = sadd.s32 1, %s6163_s25   ;;  %s8735_s29 = sld [smem:[#allocation14_spill]] }
 0x5fe   : > { %p32_p5 = scmp.ge.s32.totalorder %s35_s25, 4   ;;  %s8736_s23 = sld [smem:[#allocation12_spill]] }
 0x5ff   : > { %s8737_s24 = sld [smem:[#allocation13_spill]]  ;;  %s8738_s20 = smov %s6147_s21 }
 0x600   : > { %s8739_s21 = smov %s6151_s22  ;;  %34 = sbr.rel (!%p32_p5) target bundleno = 13 (0xd), region = 133 }
 0x603   : > { %s8740_s22 = smov %s8735_s29 }
 0x605   :  { %5119 = vsyncpa [#allocation4], 1 }
 0x606   :  { %5121 = vsyncpa [#allocation4 + $0x1], 1 }
 0x607   :  { %5122 = vsyncpa [#allocation5], 1 }
 0x608   :  { %5124 = vsyncpa [#allocation5 + $0x1], 1 }
 0x609   :  { %5125 = vsyncpa [#allocation8], 1 }
 0x60a   :  { %5127 = vsyncpa [#allocation8 + $0x1], 1 }

</bundles_post_ra>
